<compile_context>
chip_gen: v5e
topology: v5e:2x2
jax: 0.10.0
libtpu: 0.0.40
codegen_flags: <defaults>
</compile_context>

<pallas_src>
import math
from functools import partial

import jax
import jax.numpy as jnp
from jax.experimental import pallas as pl
from jax.experimental.pallas import tpu as pltpu


# ----------------------------------------------------------------------------
# Shared math helpers (used by kernels AND the pure-JAX reference).
# ----------------------------------------------------------------------------
def _erf(x):
    # Abramowitz & Stegun 7.1.26 polynomial (|err| < 1.5e-7), built only from
    # exp / mul / add / div / select so it lowers on every TPU generation.
    a1, a2, a3, a4, a5 = (0.254829592, -0.284496736, 1.421413741,
                          -1.453152027, 1.061405429)
    p_ = 0.3275911
    ax = jnp.abs(x)
    t = 1.0 / (1.0 + p_ * ax)
    poly = t * (a1 + t * (a2 + t * (a3 + t * (a4 + t * a5))))
    y = 1.0 - poly * jnp.exp(-ax * ax)
    return jnp.where(x >= 0, y, -y)


def _gelu_exact(x):
    # Matches torch.nn.GELU() (erf formulation) to ~1e-7.
    return 0.5 * x * (1.0 + _erf(x * (1.0 / math.sqrt(2.0))))


def _layernorm(x, g, b, eps):
    mean = jnp.mean(x, axis=-1, keepdims=True)
    xc = x - mean
    var = jnp.mean(xc * xc, axis=-1, keepdims=True)
    return xc * jax.lax.rsqrt(var + eps) * g + b


def _round_up(a, b):
    return ((a + b - 1) // b) * b


def _vmem_limit_bytes():
    # Re-queried on every trace (no global cache) so compiles for a different
    # TPU generation pick up the right capacity.
    try:
        cap = int(pltpu.get_tpu_info().vmem_capacity_bytes)
    except Exception:  # pragma: no cover - conservative fallback (v7x per-TC)
        cap = 64 * 1024 * 1024
    return (cap * 3) // 4


def _const_spec(shape, single_buffer):
    """Constant-index full-extent block (weights / biases / LN params)."""
    index_map = lambda *args: (0,) * len(shape)
    if single_buffer:
        # The block never changes across grid steps; default double-buffering
        # would waste 2x its VMEM footprint for no benefit.
        return pl.BlockSpec(shape, index_map, pipeline_mode=pl.Buffered(1))
    return pl.BlockSpec(shape, index_map)


# ----------------------------------------------------------------------------
# Kernel 1: y = x + Proj(MHA(LayerNorm1(x)))   (grid over batch blocks)
# ----------------------------------------------------------------------------
def _make_attn_kernel(*, num_heads, eps, compute_dtype, has_qkv_bias):
    cd = compute_dtype

    def kernel(*refs):
        if has_qkv_bias:
            (x_ref, g_ref, b_ref, wqkv_ref, bqkv_ref, wproj_ref, bproj_ref,
             o_ref, ocat_ref) = refs
        else:
            (x_ref, g_ref, b_ref, wqkv_ref, wproj_ref, bproj_ref,
             o_ref, ocat_ref) = refs
        Bb, N, C = x_ref.shape
        D = C // num_heads
        M = Bb * N

        x = x_ref[...].astype(jnp.float32).reshape(M, C)        # (M, C)
        xn = _layernorm(x, g_ref[...], b_ref[...], eps)

        # QKV projection (MXU, bf16 operands, f32 accumulation).  The
        # attention scale is pre-folded into the Q columns of wqkv.
        qkv = jnp.dot(xn.astype(cd), wqkv_ref[...],
                      preferred_element_type=jnp.float32)       # (M, 3C)
        if has_qkv_bias:
            qkv = qkv + bqkv_ref[...]

        # Per-head attention.  Each head's output goes into a contiguous
        # 128-aligned column slice of the (M, C) bf16 scratch so the output
        # projection runs as ONE (M,C)@(C,C) matmul afterwards.
        # TODO(synk): for many-head models (12+) switch this Python loop to
        # lax.fori_loop over a qkv scratch to bound vreg live ranges.
        for h in range(num_heads):
            q = qkv[:, h * D:(h + 1) * D].reshape(Bb, N, D).astype(cd)
            k = qkv[:, C + h * D:C + (h + 1) * D].reshape(Bb, N, D).astype(cd)
            v = qkv[:, 2 * C + h * D:2 * C + (h + 1) * D].reshape(Bb, N, D).astype(cd)

            s = jnp.einsum("bqd,bkd->bqk", q, k,
                           preferred_element_type=jnp.float32)  # (Bb, N, N)
            s = s - jnp.max(s, axis=-1, keepdims=True)
            e = jnp.exp(s)
            denom = jnp.sum(e, axis=-1, keepdims=True)
            attn = e * pl.reciprocal(denom, approx=True)        # EUP recip

            o_h = jnp.einsum("bqk,bkd->bqd", attn.astype(cd), v,
                             preferred_element_type=jnp.float32)
            ocat_ref[:, h * D:(h + 1) * D] = o_h.reshape(M, D).astype(cd)

        out = jnp.dot(ocat_ref[...], wproj_ref[...],
                      preferred_element_type=jnp.float32)       # (M, C)
        out = out + bproj_ref[...]
        # attn_drop / proj_drop / drop_path are identities at p = 0.0.
        o_ref[...] = (x + out).reshape(Bb, N, C).astype(o_ref.dtype)

    return kernel


def _choose_block_b(B, N, C, act_bytes, w_bytes, budget):
    """Batch elements per grid step: Bb*N rows for the MXU, grid >= 2 steps."""
    resident = 4 * C * C * w_bytes + 4 * 6 * C
    per_b = (2 * 2 * N * C * act_bytes      # x & out blocks (double-buffered)
             + 4 * 3 * N * C                # qkv f32
             + w_bytes * N * C              # o_cat scratch (bf16)
             + 4 * 3 * N * N                # score / exp / attn f32 temps
             + 4 * 2 * N * C)               # xn / proj-out f32
    cap = max(1, int(max(budget - resident, per_b) // per_b))
    target = max(1, -(-256 // N))           # want Bb*N >= 256 MXU rows
    best = 1
    for d in range(1, B + 1):
        if B % d:
            continue
        if d > cap:
            break
        if B >= 2 and B // d < 2:
            # Keep >= 2 grid steps: shards across both v7x TensorCores and
            # lets the x/out DMAs pipeline against compute.
            continue
        if d <= target:
            best = d
    return best


def _attn_residual(x, p, *, num_heads, eps, compute_dtype, qk_scale=None):
    B, N, C = x.shape
    D = C // num_heads
    scale = qk_scale if qk_scale is not None else D ** -0.5

    # Fold the attention scale into the Q columns of wqkv at trace time
    # (free) instead of scaling the (N, N) score matrix per head.
    scale_row = jnp.concatenate([jnp.full((C,), scale, jnp.float32),
                                 jnp.ones((2 * C,), jnp.float32)])
    wqkv = (p["wqkv"].astype(jnp.float32) * scale_row[None, :]).astype(compute_dtype)
    wproj = p["wproj"].astype(compute_dtype)
    bproj = p["bproj"].reshape(1, C).astype(jnp.float32)
    g1 = p["ln1_g"].reshape(1, C).astype(jnp.float32)
    b1 = p["ln1_b"].reshape(1, C).astype(jnp.float32)

    bqkv = p.get("bqkv")
    has_qkv_bias = bqkv is not None
    if has_qkv_bias:
        bqkv = (bqkv.astype(jnp.float32) * scale_row).reshape(1, 3 * C)

    act_bytes = jnp.dtype(x.dtype).itemsize
    w_bytes = jnp.dtype(compute_dtype).itemsize
    vmem_limit = _vmem_limit_bytes()
    Bb = _choose_block_b(B, N, C, act_bytes, w_bytes, (vmem_limit * 4) // 5)
    grid = (B // Bb,)
    # TODO(synk): when B // Bb == 1 (e.g. B == 1), add a second "parallel"
    # grid axis over query-row tiles so both v7x TensorCores stay busy.

    flops = B * (2 * N * C * 3 * C + num_heads * 4 * N * N * D + 2 * N * C * C)
    cost = pl.CostEstimate(
        flops=int(flops),
        transcendentals=int(B * num_heads * N * N + B * N),
        bytes_accessed=int(2 * B * N * C * act_bytes + 4 * C * C * w_bytes
                           + 8 * C),
    )

    kernel = _make_attn_kernel(num_heads=num_heads, eps=eps,
                               compute_dtype=compute_dtype,
                               has_qkv_bias=has_qkv_bias)

    operands = [x, g1, b1, wqkv] + ([bqkv] if has_qkv_bias else []) \
        + [wproj, bproj]

    def build(single_buffer):
        in_specs = [pl.BlockSpec((Bb, N, C), lambda i: (i, 0, 0)),
                    _const_spec((1, C), single_buffer),
                    _const_spec((1, C), single_buffer),
                    _const_spec((C, 3 * C), single_buffer)]
        if has_qkv_bias:
            in_specs.append(_const_spec((1, 3 * C), single_buffer))
        in_specs += [_const_spec((C, C), single_buffer),
                     _const_spec((1, C), single_buffer)]
        return pl.pallas_call(
            kernel,
            out_shape=jax.ShapeDtypeStruct((B, N, C), x.dtype),
            grid_spec=pltpu.PrefetchScalarGridSpec(
                num_scalar_prefetch=0,
                grid=grid,
                in_specs=in_specs,
                out_specs=pl.BlockSpec((Bb, N, C), lambda i: (i, 0, 0)),
                scratch_shapes=[pltpu.VMEM((Bb * N, C), compute_dtype)],
            ),
            compiler_params=pltpu.CompilerParams(
                dimension_semantics=("parallel",),
                vmem_limit_bytes=vmem_limit,
            ),
            cost_estimate=cost,
        )

    try:
        return build(True)(*operands)
    except Exception:  # pragma: no cover - jax without Buffered(1) support
        return build(False)(*operands)


# ----------------------------------------------------------------------------
# Kernel 2: y = x + fc2(GELU(fc1(LayerNorm2(x))))   (grid over row tiles of B*N)
# ----------------------------------------------------------------------------
def _mlp_block_kernel(x_ref, g_ref, bln_ref, w1_ref, b1_ref, w2_ref, b2_ref,
                      o_ref, *, eps, compute_dtype):
    cd = compute_dtype
    x = x_ref[...].astype(jnp.float32)                          # (tile_m, C)
    xn = _layernorm(x, g_ref[...], bln_ref[...], eps)

    h = jnp.dot(xn.astype(cd), w1_ref[...],
                preferred_element_type=jnp.float32)             # (tile_m, H)
    # Exact-erf GELU in f32 (torch.nn.GELU parity; safe on v5e's f32-only VPU).
    # TODO(synk): on v6e/v7x the GELU polynomial could run in bf16 (or use the
    # tanh approximation on the EUP) if exact torch parity is not required.
    h = _gelu_exact(h + b1_ref[...])

    y = jnp.dot(h.astype(cd), w2_ref[...],
                preferred_element_type=jnp.float32)             # (tile_m, C)
    y = y + b2_ref[...]

    # Dropout(p=0.0) / DropPath(0.0) are identities; just the residual add.
    o_ref[...] = (x + y).astype(o_ref.dtype)


def _choose_tile_m(M, C, H, act_bytes, w_bytes, budget):
    """Row tile for the MLP kernel.

    Returns (tile_m, needs_padding).  Prefers a tile that divides M exactly
    (no host-side pad / slice round trip) and keeps the grid >= 2 steps so
    both v7x TensorCores get work and the pipeline can overlap DMA/compute.
    """
    resident = 2 * C * H * w_bytes + 4 * (3 * C + H)     # single-buffered wts
    per_row = 2 * 2 * C * act_bytes + 4 * (2 * H + 3 * C)
    avail = max(budget - resident, per_row * 8)
    cap = max(8, min(1024, (int(avail // per_row) // 8) * 8))
    if M >= 16:
        cap = min(cap, max(8, ((M // 2) // 8) * 8))      # force grid >= 2
    cap = min(cap, _round_up(M, 8))
    if M % 8 == 0:
        for t in range(cap, 7, -8):
            if M % t == 0:
                if t >= min(64, cap):
                    return t, False                      # exact divisor, no pad
                break
    return cap, True                                     # pad M to tile_m mult


def _mlp_residual(x, p, *, eps, compute_dtype):
    B, N, C = x.shape
    H = p["w1"].shape[1]
    M = B * N

    w1 = p["w1"].astype(compute_dtype)
    w2 = p["w2"].astype(compute_dtype)
    b1 = p["b1"].reshape(1, H).astype(jnp.float32)
    b2 = p["b2"].reshape(1, C).astype(jnp.float32)
    g2 = p["ln2_g"].reshape(1, C).astype(jnp.float32)
    bl2 = p["ln2_b"].reshape(1, C).astype(jnp.float32)

    act_bytes = jnp.dtype(x.dtype).itemsize
    w_bytes = jnp.dtype(compute_dtype).itemsize
    vmem_limit = _vmem_limit_bytes()
    tile_m, needs_pad = _choose_tile_m(M, C, H, act_bytes, w_bytes,
                                       (vmem_limit * 4) // 5)

    # TODO(synk): for very large hidden dims (2*C*H weights beyond ~40% of
    # VMEM, e.g. ViT-H on v7x's 64 MiB) add an H-reduction grid axis with an
    # f32 accumulator instead of full-extent fc1/fc2 blocks.

    x2d = x.reshape(M, C)
    if needs_pad:
        M_pad = _round_up(M, tile_m)
        # Padded rows produce LN output == bias (finite via eps); sliced away.
        x2d = jnp.pad(x2d, ((0, M_pad - M), (0, 0)))
    else:
        M_pad = M
    grid = (M_pad // tile_m,)

    cost = pl.CostEstimate(
        flops=int(4 * M * C * H + 10 * M * C),
        transcendentals=int(M * H + M),
        bytes_accessed=int(2 * M * C * act_bytes + 2 * C * H * w_bytes
                           + 4 * (H + 3 * C)),
    )

    kernel = partial(_mlp_block_kernel, eps=eps, compute_dtype=compute_dtype)

    def build(single_buffer):
        return pl.pallas_call(
            kernel,
            out_shape=jax.ShapeDtypeStruct((M_pad, C), x.dtype),
            grid_spec=pltpu.PrefetchScalarGridSpec(
                num_scalar_prefetch=0,
                grid=grid,
                in_specs=[
                    pl.BlockSpec((tile_m, C), lambda i: (i, 0)),
                    _const_spec((1, C), single_buffer),
                    _const_spec((1, C), single_buffer),
                    _const_spec((C, H), single_buffer),
                    _const_spec((1, H), single_buffer),
                    _const_spec((H, C), single_buffer),
                    _const_spec((1, C), single_buffer),
                ],
                out_specs=pl.BlockSpec((tile_m, C), lambda i: (i, 0)),
            ),
            compiler_params=pltpu.CompilerParams(
                dimension_semantics=("parallel",),
                vmem_limit_bytes=vmem_limit,
            ),
            cost_estimate=cost,
        )

    try:
        out2d = build(True)(x2d, g2, bl2, w1, b1, w2, b2)
    except Exception:  # pragma: no cover - jax without Buffered(1) support
        out2d = build(False)(x2d, g2, bl2, w1, b1, w2, b2)

    if needs_pad:
        out2d = out2d[:M]
    return out2d.reshape(B, N, C)


# ----------------------------------------------------------------------------
# Full Block forward
# ----------------------------------------------------------------------------
def vit_block_forward(x, params, *, num_heads, eps=1e-5, qk_scale=None,
                      compute_dtype=jnp.bfloat16):
    """x: (B, N, C). params: dict of pre-transposed (in, out) weights."""
    x1 = _attn_residual(x, params, num_heads=num_heads, eps=eps,
                        compute_dtype=compute_dtype, qk_scale=qk_scale)
    # TODO(synk): optionally carry x1 in bf16 between the two pallas_calls to
    # halve inter-kernel HBM traffic (gate on an accuracy budget).
    return _mlp_residual(x1, params, eps=eps, compute_dtype=compute_dtype)


# ----------------------------------------------------------------------------
# Pure-JAX reference (mirrors the kernels' bf16-operand / f32-accumulate math)
# ----------------------------------------------------------------------------
def block_reference(x, p, *, num_heads, eps=1e-5, compute_dtype=jnp.bfloat16):
    f32 = jnp.float32
    cd = compute_dtype
    B, N, C = x.shape
    D = C // num_heads
    scale = D ** -0.5

    def mm(a, w):
        return jnp.dot(a.astype(cd), w.astype(cd), preferred_element_type=f32)

    xf = x.astype(f32)

    # x = x + Attn(LN1(x))
    xn = _layernorm(xf, p["ln1_g"].astype(f32), p["ln1_b"].astype(f32), eps)
    qkv = mm(xn.reshape(B * N, C), p["wqkv"])
    if p.get("bqkv") is not None:
        qkv = qkv + p["bqkv"].astype(f32)
    qkv = qkv.reshape(B, N, 3, num_heads, D).transpose(2, 0, 3, 1, 4)
    q, k, v = qkv[0], qkv[1], qkv[2]                            # (B, H, N, D)
    s = jnp.einsum("bhqd,bhkd->bhqk", q.astype(cd), k.astype(cd),
                   preferred_element_type=f32) * scale
    a = jax.nn.softmax(s, axis=-1)
    o = jnp.einsum("bhqk,bhkd->bhqd", a.astype(cd), v.astype(cd),
                   preferred_element_type=f32)
    o = o.transpose(0, 2, 1, 3).reshape(B * N, C)
    attn_out = mm(o, p["wproj"]) + p["bproj"].astype(f32)
    x1 = xf + attn_out.reshape(B, N, C)

    # x = x + Mlp(LN2(x))
    xn2 = _layernorm(x1, p["ln2_g"].astype(f32), p["ln2_b"].astype(f32), eps)
    h = mm(xn2.reshape(B * N, C), p["w1"]) + p["b1"].astype(f32)
    h = _gelu_exact(h)
    y = mm(h, p["w2"]) + p["b2"].astype(f32)
    return (x1 + y.reshape(B, N, C)).astype(x.dtype)


if __name__ == "__main__":
    # Small, lane-dense, module-consistent shapes:
    #   batch=2, seq=64, dim=256, heads=2 (head_dim=128), mlp_ratio=4 -> 1024.
    B, N, dim, num_heads = 2, 64, 256, 2
    hidden = dim * 4

    key = jax.random.PRNGKey(0)
    keys = jax.random.split(key, 12)

    def uni(k, shape, fan_in):
        bound = 1.0 / math.sqrt(fan_in)
        return jax.random.uniform(k, shape, minval=-bound, maxval=bound,
                                  dtype=jnp.float32)

    params = dict(
        ln1_g=1.0 + 0.1 * jax.random.normal(keys[0], (dim,), jnp.float32),
        ln1_b=0.05 * jax.random.normal(keys[1], (dim,), jnp.float32),
        wqkv=uni(keys[2], (dim, 3 * dim), dim),
        # qkv_bias=False (Block default) -> no bqkv entry (bias add skipped).
        wproj=uni(keys[3], (dim, dim), dim),
        bproj=uni(keys[4], (dim,), dim),
        ln2_g=1.0 + 0.1 * jax.random.normal(keys[5], (dim,), jnp.float32),
        ln2_b=0.05 * jax.random.normal(keys[6], (dim,), jnp.float32),
        w1=uni(keys[7], (dim, hidden), dim),
        b1=uni(keys[8], (hidden,), dim),
        w2=uni(keys[9], (hidden, dim), hidden),
        b2=uni(keys[10], (dim,), hidden),
    )
    x = jax.random.normal(keys[11], (B, N, dim), dtype=jnp.float32)

    out = vit_block_forward(x, params, num_heads=num_heads)
    out = jax.block_until_ready(out)

    ref = block_reference(x, params, num_heads=num_heads)
    ref = jax.block_until_ready(ref)

    assert out.shape == (B, N, dim)
    # Tolerance covers bf16 MXU operands + f32 accumulation on both sides
    # (rounding-point / accumulation-order differences only).
    assert jnp.allclose(out, ref, atol=1e-2, rtol=1e-2), "mismatch vs reference"

    print("KERNEL_OK")
</pallas_src>

<mosaic_0001>
module attributes {stable_mosaic.version = 11 : i64} {
  func.func @kernel(%arg0: i32, %arg1: memref<1x64x256xf32, #tpu.memory_space<vmem>>, %arg2: memref<1x256xf32, #tpu.memory_space<vmem>>, %arg3: memref<1x256xf32, #tpu.memory_space<vmem>>, %arg4: memref<256x768xbf16, #tpu.memory_space<vmem>>, %arg5: memref<256x256xbf16, #tpu.memory_space<vmem>>, %arg6: memref<1x256xf32, #tpu.memory_space<vmem>>, %arg7: memref<1x64x256xf32, #tpu.memory_space<vmem>>, %arg8: memref<64x256xbf16, #tpu.memory_space<vmem>>) attributes {dimension_semantics = [#tpu.dimension_semantics<parallel>], iteration_bounds = array<i64: 2>, scalar_prefetch = 0 : i64, scratch_operands = 1 : i64, tpu.core_type = #tpu.core_type<tc>, window_params = [{transform_indices = @transform_0, window_bounds = array<i64: 1, 64, 256>}, {pipeline_mode = #tpu.pipeline_mode<synchronous>, transform_indices = @transform_1, window_bounds = array<i64: 1, 256>}, {pipeline_mode = #tpu.pipeline_mode<synchronous>, transform_indices = @transform_2, window_bounds = array<i64: 1, 256>}, {pipeline_mode = #tpu.pipeline_mode<synchronous>, transform_indices = @transform_3, window_bounds = array<i64: 256, 768>}, {pipeline_mode = #tpu.pipeline_mode<synchronous>, transform_indices = @transform_4, window_bounds = array<i64: 256, 256>}, {pipeline_mode = #tpu.pipeline_mode<synchronous>, transform_indices = @transform_5, window_bounds = array<i64: 1, 256>}, {transform_indices = @transform_6, window_bounds = array<i64: 1, 64, 256>}]} {
    %c0 = arith.constant 0 : index
    %c0_0 = arith.constant 0 : index
    %c0_1 = arith.constant 0 : index
    %0 = vector.load %arg1[%c0, %c0_0, %c0_1] : memref<1x64x256xf32, #tpu.memory_space<vmem>>, vector<1x64x256xf32>
    %1 = vector.shape_cast %0 : vector<1x64x256xf32> to vector<64x256xf32>
    %c0_2 = arith.constant 0 : index
    %c0_3 = arith.constant 0 : index
    %2 = vector.load %arg2[%c0_2, %c0_3] : memref<1x256xf32, #tpu.memory_space<vmem>>, vector<1x256xf32>
    %c0_4 = arith.constant 0 : index
    %c0_5 = arith.constant 0 : index
    %3 = vector.load %arg3[%c0_4, %c0_5] : memref<1x256xf32, #tpu.memory_space<vmem>>, vector<1x256xf32>
    %cst = arith.constant dense<0.000000e+00> : vector<64xf32>
    %4 = vector.multi_reduction <add>, %1, %cst [1] : vector<64x256xf32> to vector<64xf32>
    %5 = vector.shape_cast %4 : vector<64xf32> to vector<64x1xf32>
    %cst_6 = arith.constant 2.560000e+02 : f32
    %6 = vector.broadcast %cst_6 : f32 to vector<64x1xf32>
    %7 = arith.divf %5, %6 : vector<64x1xf32>
    %8 = vector.broadcast %7 : vector<64x1xf32> to vector<64x256xf32>
    %9 = arith.subf %1, %8 : vector<64x256xf32>
    %10 = arith.mulf %9, %9 : vector<64x256xf32>
    %cst_7 = arith.constant dense<0.000000e+00> : vector<64xf32>
    %11 = vector.multi_reduction <add>, %10, %cst_7 [1] : vector<64x256xf32> to vector<64xf32>
    %12 = vector.shape_cast %11 : vector<64xf32> to vector<64x1xf32>
    %cst_8 = arith.constant 2.560000e+02 : f32
    %13 = vector.broadcast %cst_8 : f32 to vector<64x1xf32>
    %14 = arith.divf %12, %13 : vector<64x1xf32>
    %cst_9 = arith.constant 9.99999974E-6 : f32
    %15 = vector.broadcast %cst_9 : f32 to vector<64x1xf32>
    %16 = arith.addf %14, %15 : vector<64x1xf32>
    %17 = math.rsqrt %16 : vector<64x1xf32>
    %18 = vector.broadcast %17 : vector<64x1xf32> to vector<64x256xf32>
    %19 = arith.mulf %9, %18 : vector<64x256xf32>
    %20 = vector.broadcast %2 : vector<1x256xf32> to vector<64x256xf32>
    %21 = arith.mulf %19, %20 : vector<64x256xf32>
    %22 = vector.broadcast %3 : vector<1x256xf32> to vector<64x256xf32>
    %23 = arith.addf %21, %22 : vector<64x256xf32>
    %24 = arith.truncf %23 : vector<64x256xf32> to vector<64x256xbf16>
    %c0_10 = arith.constant 0 : index
    %c0_11 = arith.constant 0 : index
    %25 = vector.load %arg4[%c0_10, %c0_11] : memref<256x768xbf16, #tpu.memory_space<vmem>>, vector<256x768xbf16>
    %cst_12 = arith.constant dense<0.000000e+00> : vector<64x768xf32>
    %26 = tpu.matmul %24, %25, %cst_12 {dimension_numbers = #tpu.dot_dimension_numbers<[1], [0], [0], [1], [0, 0, 1, 1], [], []>} : vector<64x256xbf16>, vector<256x768xbf16>, vector<64x768xf32> -> vector<64x768xf32>
    %27 = vector.extract_strided_slice %26 {offsets = [0, 0], sizes = [64, 128], strides = [1, 1]} : vector<64x768xf32> to vector<64x128xf32>
    %28 = vector.shape_cast %27 : vector<64x128xf32> to vector<1x64x128xf32>
    %29 = arith.truncf %28 : vector<1x64x128xf32> to vector<1x64x128xbf16>
    %30 = vector.extract_strided_slice %26 {offsets = [0, 256], sizes = [64, 128], strides = [1, 1]} : vector<64x768xf32> to vector<64x128xf32>
    %31 = vector.shape_cast %30 : vector<64x128xf32> to vector<1x64x128xf32>
    %32 = arith.truncf %31 : vector<1x64x128xf32> to vector<1x64x128xbf16>
    %33 = vector.extract_strided_slice %26 {offsets = [0, 512], sizes = [64, 128], strides = [1, 1]} : vector<64x768xf32> to vector<64x128xf32>
    %34 = vector.shape_cast %33 : vector<64x128xf32> to vector<1x64x128xf32>
    %35 = arith.truncf %34 : vector<1x64x128xf32> to vector<1x64x128xbf16>
    "tpu.trace_start"() <{level = 10 : i32, message = "bqd,bkd->bqk"}> : () -> ()
    %cst_13 = arith.constant dense<0.000000e+00> : vector<1x64x64xf32>
    %36 = tpu.matmul %29, %32, %cst_13 {dimension_numbers = #tpu.dot_dimension_numbers<[2], [2], [1], [1], [0, 0, 0, 1, 1, 1], [0], [0]>} : vector<1x64x128xbf16>, vector<1x64x128xbf16>, vector<1x64x64xf32> -> vector<1x64x64xf32>
    "tpu.trace_stop"() : () -> ()
    %cst_14 = arith.constant dense<0xFF800000> : vector<1x64xf32>
    %37 = vector.multi_reduction <maximumf>, %36, %cst_14 [2] : vector<1x64x64xf32> to vector<1x64xf32>
    %38 = vector.shape_cast %37 : vector<1x64xf32> to vector<1x64x1xf32>
    %39 = vector.broadcast %38 : vector<1x64x1xf32> to vector<1x64x64xf32>
    %40 = arith.subf %36, %39 : vector<1x64x64xf32>
    %41 = math.exp %40 : vector<1x64x64xf32>
    %cst_15 = arith.constant dense<0.000000e+00> : vector<1x64xf32>
    %42 = vector.multi_reduction <add>, %41, %cst_15 [2] : vector<1x64x64xf32> to vector<1x64xf32>
    %43 = vector.shape_cast %42 : vector<1x64xf32> to vector<1x64x1xf32>
    %44 = tpu.reciprocal %43 {approx = true} : vector<1x64x1xf32> -> vector<1x64x1xf32>
    %45 = vector.broadcast %44 : vector<1x64x1xf32> to vector<1x64x64xf32>
    %46 = arith.mulf %41, %45 : vector<1x64x64xf32>
    %47 = arith.truncf %46 : vector<1x64x64xf32> to vector<1x64x64xbf16>
    "tpu.trace_start"() <{level = 10 : i32, message = "bqk,bkd->bqd"}> : () -> ()
    %cst_16 = arith.constant dense<0.000000e+00> : vector<1x64x128xf32>
    %48 = tpu.matmul %47, %35, %cst_16 {dimension_numbers = #tpu.dot_dimension_numbers<[2], [1], [1], [2], [0, 0, 0, 1, 1, 2], [0], [0]>} : vector<1x64x64xbf16>, vector<1x64x128xbf16>, vector<1x64x128xf32> -> vector<1x64x128xf32>
    "tpu.trace_stop"() : () -> ()
    %49 = vector.shape_cast %48 : vector<1x64x128xf32> to vector<64x128xf32>
    %50 = arith.truncf %49 : vector<64x128xf32> to vector<64x128xbf16>
    %c0_17 = arith.constant 0 : index
    %c0_18 = arith.constant 0 : index
    %51 = vector.load %arg8[%c0_17, %c0_18] : memref<64x256xbf16, #tpu.memory_space<vmem>>, vector<64x128xbf16>
    tpu.vector_store %arg8[%c0_17, %c0_18], %50 {strides = array<i32>} : memref<64x256xbf16, #tpu.memory_space<vmem>>, vector<64x128xbf16>,
    %52 = vector.extract_strided_slice %26 {offsets = [0, 128], sizes = [64, 128], strides = [1, 1]} : vector<64x768xf32> to vector<64x128xf32>
    %53 = vector.shape_cast %52 : vector<64x128xf32> to vector<1x64x128xf32>
    %54 = arith.truncf %53 : vector<1x64x128xf32> to vector<1x64x128xbf16>
    %55 = vector.extract_strided_slice %26 {offsets = [0, 384], sizes = [64, 128], strides = [1, 1]} : vector<64x768xf32> to vector<64x128xf32>
    %56 = vector.shape_cast %55 : vector<64x128xf32> to vector<1x64x128xf32>
    %57 = arith.truncf %56 : vector<1x64x128xf32> to vector<1x64x128xbf16>
    %58 = vector.extract_strided_slice %26 {offsets = [0, 640], sizes = [64, 128], strides = [1, 1]} : vector<64x768xf32> to vector<64x128xf32>
    %59 = vector.shape_cast %58 : vector<64x128xf32> to vector<1x64x128xf32>
    %60 = arith.truncf %59 : vector<1x64x128xf32> to vector<1x64x128xbf16>
    "tpu.trace_start"() <{level = 10 : i32, message = "bqd,bkd->bqk"}> : () -> ()
    %cst_19 = arith.constant dense<0.000000e+00> : vector<1x64x64xf32>
    %61 = tpu.matmul %54, %57, %cst_19 {dimension_numbers = #tpu.dot_dimension_numbers<[2], [2], [1], [1], [0, 0, 0, 1, 1, 1], [0], [0]>} : vector<1x64x128xbf16>, vector<1x64x128xbf16>, vector<1x64x64xf32> -> vector<1x64x64xf32>
    "tpu.trace_stop"() : () -> ()
    %cst_20 = arith.constant dense<0xFF800000> : vector<1x64xf32>
    %62 = vector.multi_reduction <maximumf>, %61, %cst_20 [2] : vector<1x64x64xf32> to vector<1x64xf32>
    %63 = vector.shape_cast %62 : vector<1x64xf32> to vector<1x64x1xf32>
    %64 = vector.broadcast %63 : vector<1x64x1xf32> to vector<1x64x64xf32>
    %65 = arith.subf %61, %64 : vector<1x64x64xf32>
    %66 = math.exp %65 : vector<1x64x64xf32>
    %cst_21 = arith.constant dense<0.000000e+00> : vector<1x64xf32>
    %67 = vector.multi_reduction <add>, %66, %cst_21 [2] : vector<1x64x64xf32> to vector<1x64xf32>
    %68 = vector.shape_cast %67 : vector<1x64xf32> to vector<1x64x1xf32>
    %69 = tpu.reciprocal %68 {approx = true} : vector<1x64x1xf32> -> vector<1x64x1xf32>
    %70 = vector.broadcast %69 : vector<1x64x1xf32> to vector<1x64x64xf32>
    %71 = arith.mulf %66, %70 : vector<1x64x64xf32>
    %72 = arith.truncf %71 : vector<1x64x64xf32> to vector<1x64x64xbf16>
    "tpu.trace_start"() <{level = 10 : i32, message = "bqk,bkd->bqd"}> : () -> ()
    %cst_22 = arith.constant dense<0.000000e+00> : vector<1x64x128xf32>
    %73 = tpu.matmul %72, %60, %cst_22 {dimension_numbers = #tpu.dot_dimension_numbers<[2], [1], [1], [2], [0, 0, 0, 1, 1, 2], [0], [0]>} : vector<1x64x64xbf16>, vector<1x64x128xbf16>, vector<1x64x128xf32> -> vector<1x64x128xf32>
    "tpu.trace_stop"() : () -> ()
    %74 = vector.shape_cast %73 : vector<1x64x128xf32> to vector<64x128xf32>
    %75 = arith.truncf %74 : vector<64x128xf32> to vector<64x128xbf16>
    %c0_23 = arith.constant 0 : index
    %c128 = arith.constant 128 : index
    %76 = vector.load %arg8[%c0_23, %c128] : memref<64x256xbf16, #tpu.memory_space<vmem>>, vector<64x128xbf16>
    tpu.vector_store %arg8[%c0_23, %c128], %75 {strides = array<i32>} : memref<64x256xbf16, #tpu.memory_space<vmem>>, vector<64x128xbf16>,
    %c0_24 = arith.constant 0 : index
    %c0_25 = arith.constant 0 : index
    %77 = vector.load %arg8[%c0_24, %c0_25] : memref<64x256xbf16, #tpu.memory_space<vmem>>, vector<64x256xbf16>
    %c0_26 = arith.constant 0 : index
    %c0_27 = arith.constant 0 : index
    %78 = vector.load %arg5[%c0_26, %c0_27] : memref<256x256xbf16, #tpu.memory_space<vmem>>, vector<256x256xbf16>
    %cst_28 = arith.constant dense<0.000000e+00> : vector<64x256xf32>
    %79 = tpu.matmul %77, %78, %cst_28 {dimension_numbers = #tpu.dot_dimension_numbers<[1], [0], [0], [1], [0, 0, 1, 1], [], []>} : vector<64x256xbf16>, vector<256x256xbf16>, vector<64x256xf32> -> vector<64x256xf32>
    %c0_29 = arith.constant 0 : index
    %c0_30 = arith.constant 0 : index
    %80 = vector.load %arg6[%c0_29, %c0_30] : memref<1x256xf32, #tpu.memory_space<vmem>>, vector<1x256xf32>
    %81 = vector.broadcast %80 : vector<1x256xf32> to vector<64x256xf32>
    %82 = arith.addf %79, %81 : vector<64x256xf32>
    %83 = arith.addf %1, %82 : vector<64x256xf32>
    %84 = vector.shape_cast %83 : vector<64x256xf32> to vector<1x64x256xf32>
    %c0_31 = arith.constant 0 : index
    %c0_32 = arith.constant 0 : index
    %c0_33 = arith.constant 0 : index
    %85 = vector.load %arg7[%c0_31, %c0_32, %c0_33] : memref<1x64x256xf32, #tpu.memory_space<vmem>>, vector<1x64x256xf32>
    tpu.vector_store %arg7[%c0_31, %c0_32, %c0_33], %84 {strides = array<i32>} : memref<1x64x256xf32, #tpu.memory_space<vmem>>, vector<1x64x256xf32>,
    return
  }
  func.func @transform_0(%arg0: i32) -> (i32, i32, i32) {
    %c0_i32 = arith.constant 0 : i32
    %c0_i32_0 = arith.constant 0 : i32
    %c0_i32_1 = arith.constant 0 : i32
    return %arg0, %c0_i32, %c0_i32_0 : i32, i32, i32
  }
  func.func @transform_1(%arg0: i32) -> (i32, i32) {
    %c0_i32 = arith.constant 0 : i32
    %c0_i32_0 = arith.constant 0 : i32
    %c0_i32_1 = arith.constant 0 : i32
    return %c0_i32, %c0_i32_0 : i32, i32
  }
  func.func @transform_2(%arg0: i32) -> (i32, i32) {
    %c0_i32 = arith.constant 0 : i32
    %c0_i32_0 = arith.constant 0 : i32
    %c0_i32_1 = arith.constant 0 : i32
    return %c0_i32, %c0_i32_0 : i32, i32
  }
  func.func @transform_3(%arg0: i32) -> (i32, i32) {
    %c0_i32 = arith.constant 0 : i32
    %c0_i32_0 = arith.constant 0 : i32
    %c0_i32_1 = arith.constant 0 : i32
    return %c0_i32, %c0_i32_0 : i32, i32
  }
  func.func @transform_4(%arg0: i32) -> (i32, i32) {
    %c0_i32 = arith.constant 0 : i32
    %c0_i32_0 = arith.constant 0 : i32
    %c0_i32_1 = arith.constant 0 : i32
    return %c0_i32, %c0_i32_0 : i32, i32
  }
  func.func @transform_5(%arg0: i32) -> (i32, i32) {
    %c0_i32 = arith.constant 0 : i32
    %c0_i32_0 = arith.constant 0 : i32
    %c0_i32_1 = arith.constant 0 : i32
    return %c0_i32, %c0_i32_0 : i32, i32
  }
  func.func @transform_6(%arg0: i32) -> (i32, i32, i32) {
    %c0_i32 = arith.constant 0 : i32
    %c0_i32_0 = arith.constant 0 : i32
    %c0_i32_1 = arith.constant 0 : i32
    return %arg0, %c0_i32, %c0_i32_0 : i32, i32, i32
  }
}

module attributes {stable_mosaic.version = 11 : i64} {
  func.func @kernel(%arg0: i32, %arg1: memref<1x64x256xf32, #tpu.memory_space<vmem>>, %arg2: memref<1x256xf32, #tpu.memory_space<vmem>>, %arg3: memref<1x256xf32, #tpu.memory_space<vmem>>, %arg4: memref<256x768xbf16, #tpu.memory_space<vmem>>, %arg5: memref<256x256xbf16, #tpu.memory_space<vmem>>, %arg6: memref<1x256xf32, #tpu.memory_space<vmem>>, %arg7: memref<1x64x256xf32, #tpu.memory_space<vmem>>, %arg8: memref<64x256xbf16, #tpu.memory_space<vmem>>) attributes {dimension_semantics = [#tpu.dimension_semantics<parallel>], iteration_bounds = array<i64: 2>, scalar_prefetch = 0 : i64, scratch_operands = 1 : i64, tpu.core_type = #tpu.core_type<tc>, window_params = [{transform_indices = @transform_0, window_bounds = array<i64: 1, 64, 256>}, {pipeline_mode = #tpu.pipeline_mode<synchronous>, transform_indices = @transform_1, window_bounds = array<i64: 1, 256>}, {pipeline_mode = #tpu.pipeline_mode<synchronous>, transform_indices = @transform_2, window_bounds = array<i64: 1, 256>}, {pipeline_mode = #tpu.pipeline_mode<synchronous>, transform_indices = @transform_3, window_bounds = array<i64: 256, 768>}, {pipeline_mode = #tpu.pipeline_mode<synchronous>, transform_indices = @transform_4, window_bounds = array<i64: 256, 256>}, {pipeline_mode = #tpu.pipeline_mode<synchronous>, transform_indices = @transform_5, window_bounds = array<i64: 1, 256>}, {transform_indices = @transform_6, window_bounds = array<i64: 1, 64, 256>}]} {
    %c0 = arith.constant 0 : index
    %c0_0 = arith.constant 0 : index
    %c0_1 = arith.constant 0 : index
    %0 = vector.load %arg1[%c0, %c0_0, %c0_1] : memref<1x64x256xf32, #tpu.memory_space<vmem>>, vector<1x64x256xf32>
    %1 = vector.shape_cast %0 : vector<1x64x256xf32> to vector<64x256xf32>
    %c0_2 = arith.constant 0 : index
    %c0_3 = arith.constant 0 : index
    %2 = vector.load %arg2[%c0_2, %c0_3] : memref<1x256xf32, #tpu.memory_space<vmem>>, vector<1x256xf32>
    %c0_4 = arith.constant 0 : index
    %c0_5 = arith.constant 0 : index
    %3 = vector.load %arg3[%c0_4, %c0_5] : memref<1x256xf32, #tpu.memory_space<vmem>>, vector<1x256xf32>
    %cst = arith.constant dense<0.000000e+00> : vector<64xf32>
    %4 = vector.multi_reduction <add>, %1, %cst [1] : vector<64x256xf32> to vector<64xf32>
    %5 = vector.shape_cast %4 : vector<64xf32> to vector<64x1xf32>
    %cst_6 = arith.constant 2.560000e+02 : f32
    %6 = vector.broadcast %cst_6 : f32 to vector<64x1xf32>
    %7 = arith.divf %5, %6 : vector<64x1xf32>
    %8 = vector.broadcast %7 : vector<64x1xf32> to vector<64x256xf32>
    %9 = arith.subf %1, %8 : vector<64x256xf32>
    %10 = arith.mulf %9, %9 : vector<64x256xf32>
    %cst_7 = arith.constant dense<0.000000e+00> : vector<64xf32>
    %11 = vector.multi_reduction <add>, %10, %cst_7 [1] : vector<64x256xf32> to vector<64xf32>
    %12 = vector.shape_cast %11 : vector<64xf32> to vector<64x1xf32>
    %cst_8 = arith.constant 2.560000e+02 : f32
    %13 = vector.broadcast %cst_8 : f32 to vector<64x1xf32>
    %14 = arith.divf %12, %13 : vector<64x1xf32>
    %cst_9 = arith.constant 9.99999974E-6 : f32
    %15 = vector.broadcast %cst_9 : f32 to vector<64x1xf32>
    %16 = arith.addf %14, %15 : vector<64x1xf32>
    %17 = math.rsqrt %16 : vector<64x1xf32>
    %18 = vector.broadcast %17 : vector<64x1xf32> to vector<64x256xf32>
    %19 = arith.mulf %9, %18 : vector<64x256xf32>
    %20 = vector.broadcast %2 : vector<1x256xf32> to vector<64x256xf32>
    %21 = arith.mulf %19, %20 : vector<64x256xf32>
    %22 = vector.broadcast %3 : vector<1x256xf32> to vector<64x256xf32>
    %23 = arith.addf %21, %22 : vector<64x256xf32>
    %24 = arith.truncf %23 : vector<64x256xf32> to vector<64x256xbf16>
    %c0_10 = arith.constant 0 : index
    %c0_11 = arith.constant 0 : index
    %25 = vector.load %arg4[%c0_10, %c0_11] : memref<256x768xbf16, #tpu.memory_space<vmem>>, vector<256x768xbf16>
    %cst_12 = arith.constant dense<0.000000e+00> : vector<64x768xf32>
    %26 = tpu.matmul %24, %25, %cst_12 {dimension_numbers = #tpu.dot_dimension_numbers<[1], [0], [0], [1], [0, 0, 1, 1], [], []>} : vector<64x256xbf16>, vector<256x768xbf16>, vector<64x768xf32> -> vector<64x768xf32>
    %27 = vector.extract_strided_slice %26 {offsets = [0, 0], sizes = [64, 128], strides = [1, 1]} : vector<64x768xf32> to vector<64x128xf32>
    %28 = vector.shape_cast %27 : vector<64x128xf32> to vector<1x64x128xf32>
    %29 = arith.truncf %28 : vector<1x64x128xf32> to vector<1x64x128xbf16>
    %30 = vector.extract_strided_slice %26 {offsets = [0, 256], sizes = [64, 128], strides = [1, 1]} : vector<64x768xf32> to vector<64x128xf32>
    %31 = vector.shape_cast %30 : vector<64x128xf32> to vector<1x64x128xf32>
    %32 = arith.truncf %31 : vector<1x64x128xf32> to vector<1x64x128xbf16>
    %33 = vector.extract_strided_slice %26 {offsets = [0, 512], sizes = [64, 128], strides = [1, 1]} : vector<64x768xf32> to vector<64x128xf32>
    %34 = vector.shape_cast %33 : vector<64x128xf32> to vector<1x64x128xf32>
    %35 = arith.truncf %34 : vector<1x64x128xf32> to vector<1x64x128xbf16>
    "tpu.trace_start"() <{level = 10 : i32, message = "bqd,bkd->bqk"}> : () -> ()
    %cst_13 = arith.constant dense<0.000000e+00> : vector<1x64x64xf32>
    %36 = tpu.matmul %29, %32, %cst_13 {dimension_numbers = #tpu.dot_dimension_numbers<[2], [2], [1], [1], [0, 0, 0, 1, 1, 1], [0], [0]>} : vector<1x64x128xbf16>, vector<1x64x128xbf16>, vector<1x64x64xf32> -> vector<1x64x64xf32>
    "tpu.trace_stop"() : () -> ()
    %cst_14 = arith.constant dense<0xFF800000> : vector<1x64xf32>
    %37 = vector.multi_reduction <maximumf>, %36, %cst_14 [2] : vector<1x64x64xf32> to vector<1x64xf32>
    %38 = vector.shape_cast %37 : vector<1x64xf32> to vector<1x64x1xf32>
    %39 = vector.broadcast %38 : vector<1x64x1xf32> to vector<1x64x64xf32>
    %40 = arith.subf %36, %39 : vector<1x64x64xf32>
    %41 = math.exp %40 : vector<1x64x64xf32>
    %cst_15 = arith.constant dense<0.000000e+00> : vector<1x64xf32>
    %42 = vector.multi_reduction <add>, %41, %cst_15 [2] : vector<1x64x64xf32> to vector<1x64xf32>
    %43 = vector.shape_cast %42 : vector<1x64xf32> to vector<1x64x1xf32>
    %44 = tpu.reciprocal %43 {approx = true} : vector<1x64x1xf32> -> vector<1x64x1xf32>
    %45 = vector.broadcast %44 : vector<1x64x1xf32> to vector<1x64x64xf32>
    %46 = arith.mulf %41, %45 : vector<1x64x64xf32>
    %47 = arith.truncf %46 : vector<1x64x64xf32> to vector<1x64x64xbf16>
    "tpu.trace_start"() <{level = 10 : i32, message = "bqk,bkd->bqd"}> : () -> ()
    %cst_16 = arith.constant dense<0.000000e+00> : vector<1x64x128xf32>
    %48 = tpu.matmul %47, %35, %cst_16 {dimension_numbers = #tpu.dot_dimension_numbers<[2], [1], [1], [2], [0, 0, 0, 1, 1, 2], [0], [0]>} : vector<1x64x64xbf16>, vector<1x64x128xbf16>, vector<1x64x128xf32> -> vector<1x64x128xf32>
    "tpu.trace_stop"() : () -> ()
    %49 = vector.shape_cast %48 : vector<1x64x128xf32> to vector<64x128xf32>
    %50 = arith.truncf %49 : vector<64x128xf32> to vector<64x128xbf16>
    %c0_17 = arith.constant 0 : index
    %c0_18 = arith.constant 0 : index
    %51 = vector.load %arg8[%c0_17, %c0_18] : memref<64x256xbf16, #tpu.memory_space<vmem>>, vector<64x128xbf16>
    tpu.vector_store %arg8[%c0_17, %c0_18], %50 {strides = array<i32>} : memref<64x256xbf16, #tpu.memory_space<vmem>>, vector<64x128xbf16>,
    %52 = vector.extract_strided_slice %26 {offsets = [0, 128], sizes = [64, 128], strides = [1, 1]} : vector<64x768xf32> to vector<64x128xf32>
    %53 = vector.shape_cast %52 : vector<64x128xf32> to vector<1x64x128xf32>
    %54 = arith.truncf %53 : vector<1x64x128xf32> to vector<1x64x128xbf16>
    %55 = vector.extract_strided_slice %26 {offsets = [0, 384], sizes = [64, 128], strides = [1, 1]} : vector<64x768xf32> to vector<64x128xf32>
    %56 = vector.shape_cast %55 : vector<64x128xf32> to vector<1x64x128xf32>
    %57 = arith.truncf %56 : vector<1x64x128xf32> to vector<1x64x128xbf16>
    %58 = vector.extract_strided_slice %26 {offsets = [0, 640], sizes = [64, 128], strides = [1, 1]} : vector<64x768xf32> to vector<64x128xf32>
    %59 = vector.shape_cast %58 : vector<64x128xf32> to vector<1x64x128xf32>
    %60 = arith.truncf %59 : vector<1x64x128xf32> to vector<1x64x128xbf16>
    "tpu.trace_start"() <{level = 10 : i32, message = "bqd,bkd->bqk"}> : () -> ()
    %cst_19 = arith.constant dense<0.000000e+00> : vector<1x64x64xf32>
    %61 = tpu.matmul %54, %57, %cst_19 {dimension_numbers = #tpu.dot_dimension_numbers<[2], [2], [1], [1], [0, 0, 0, 1, 1, 1], [0], [0]>} : vector<1x64x128xbf16>, vector<1x64x128xbf16>, vector<1x64x64xf32> -> vector<1x64x64xf32>
    "tpu.trace_stop"() : () -> ()
    %cst_20 = arith.constant dense<0xFF800000> : vector<1x64xf32>
    %62 = vector.multi_reduction <maximumf>, %61, %cst_20 [2] : vector<1x64x64xf32> to vector<1x64xf32>
    %63 = vector.shape_cast %62 : vector<1x64xf32> to vector<1x64x1xf32>
    %64 = vector.broadcast %63 : vector<1x64x1xf32> to vector<1x64x64xf32>
    %65 = arith.subf %61, %64 : vector<1x64x64xf32>
    %66 = math.exp %65 : vector<1x64x64xf32>
    %cst_21 = arith.constant dense<0.000000e+00> : vector<1x64xf32>
    %67 = vector.multi_reduction <add>, %66, %cst_21 [2] : vector<1x64x64xf32> to vector<1x64xf32>
    %68 = vector.shape_cast %67 : vector<1x64xf32> to vector<1x64x1xf32>
    %69 = tpu.reciprocal %68 {approx = true} : vector<1x64x1xf32> -> vector<1x64x1xf32>
    %70 = vector.broadcast %69 : vector<1x64x1xf32> to vector<1x64x64xf32>
    %71 = arith.mulf %66, %70 : vector<1x64x64xf32>
    %72 = arith.truncf %71 : vector<1x64x64xf32> to vector<1x64x64xbf16>
    "tpu.trace_start"() <{level = 10 : i32, message = "bqk,bkd->bqd"}> : () -> ()
    %cst_22 = arith.constant dense<0.000000e+00> : vector<1x64x128xf32>
    %73 = tpu.matmul %72, %60, %cst_22 {dimension_numbers = #tpu.dot_dimension_numbers<[2], [1], [1], [2], [0, 0, 0, 1, 1, 2], [0], [0]>} : vector<1x64x64xbf16>, vector<1x64x128xbf16>, vector<1x64x128xf32> -> vector<1x64x128xf32>
    "tpu.trace_stop"() : () -> ()
    %74 = vector.shape_cast %73 : vector<1x64x128xf32> to vector<64x128xf32>
    %75 = arith.truncf %74 : vector<64x128xf32> to vector<64x128xbf16>
    %c0_23 = arith.constant 0 : index
    %c128 = arith.constant 128 : index
    %76 = vector.load %arg8[%c0_23, %c128] : memref<64x256xbf16, #tpu.memory_space<vmem>>, vector<64x128xbf16>
    tpu.vector_store %arg8[%c0_23, %c128], %75 {strides = array<i32>} : memref<64x256xbf16, #tpu.memory_space<vmem>>, vector<64x128xbf16>,
    %c0_24 = arith.constant 0 : index
    %c0_25 = arith.constant 0 : index
    %77 = vector.load %arg8[%c0_24, %c0_25] : memref<64x256xbf16, #tpu.memory_space<vmem>>, vector<64x256xbf16>
    %c0_26 = arith.constant 0 : index
    %c0_27 = arith.constant 0 : index
    %78 = vector.load %arg5[%c0_26, %c0_27] : memref<256x256xbf16, #tpu.memory_space<vmem>>, vector<256x256xbf16>
    %cst_28 = arith.constant dense<0.000000e+00> : vector<64x256xf32>
    %79 = tpu.matmul %77, %78, %cst_28 {dimension_numbers = #tpu.dot_dimension_numbers<[1], [0], [0], [1], [0, 0, 1, 1], [], []>} : vector<64x256xbf16>, vector<256x256xbf16>, vector<64x256xf32> -> vector<64x256xf32>
    %c0_29 = arith.constant 0 : index
    %c0_30 = arith.constant 0 : index
    %80 = vector.load %arg6[%c0_29, %c0_30] : memref<1x256xf32, #tpu.memory_space<vmem>>, vector<1x256xf32>
    %81 = vector.broadcast %80 : vector<1x256xf32> to vector<64x256xf32>
    %82 = arith.addf %79, %81 : vector<64x256xf32>
    %83 = arith.addf %1, %82 : vector<64x256xf32>
    %84 = vector.shape_cast %83 : vector<64x256xf32> to vector<1x64x256xf32>
    %c0_31 = arith.constant 0 : index
    %c0_32 = arith.constant 0 : index
    %c0_33 = arith.constant 0 : index
    %85 = vector.load %arg7[%c0_31, %c0_32, %c0_33] : memref<1x64x256xf32, #tpu.memory_space<vmem>>, vector<1x64x256xf32>
    tpu.vector_store %arg7[%c0_31, %c0_32, %c0_33], %84 {strides = array<i32>} : memref<1x64x256xf32, #tpu.memory_space<vmem>>, vector<1x64x256xf32>,
    return
  }
  func.func @transform_0(%arg0: i32) -> (i32, i32, i32) {
    %c0_i32 = arith.constant 0 : i32
    %c0_i32_0 = arith.constant 0 : i32
    %c0_i32_1 = arith.constant 0 : i32
    return %arg0, %c0_i32, %c0_i32_0 : i32, i32, i32
  }
  func.func @transform_1(%arg0: i32) -> (i32, i32) {
    %c0_i32 = arith.constant 0 : i32
    %c0_i32_0 = arith.constant 0 : i32
    %c0_i32_1 = arith.constant 0 : i32
    return %c0_i32, %c0_i32_0 : i32, i32
  }
  func.func @transform_2(%arg0: i32) -> (i32, i32) {
    %c0_i32 = arith.constant 0 : i32
    %c0_i32_0 = arith.constant 0 : i32
    %c0_i32_1 = arith.constant 0 : i32
    return %c0_i32, %c0_i32_0 : i32, i32
  }
  func.func @transform_3(%arg0: i32) -> (i32, i32) {
    %c0_i32 = arith.constant 0 : i32
    %c0_i32_0 = arith.constant 0 : i32
    %c0_i32_1 = arith.constant 0 : i32
    return %c0_i32, %c0_i32_0 : i32, i32
  }
  func.func @transform_4(%arg0: i32) -> (i32, i32) {
    %c0_i32 = arith.constant 0 : i32
    %c0_i32_0 = arith.constant 0 : i32
    %c0_i32_1 = arith.constant 0 : i32
    return %c0_i32, %c0_i32_0 : i32, i32
  }
  func.func @transform_5(%arg0: i32) -> (i32, i32) {
    %c0_i32 = arith.constant 0 : i32
    %c0_i32_0 = arith.constant 0 : i32
    %c0_i32_1 = arith.constant 0 : i32
    return %c0_i32, %c0_i32_0 : i32, i32
  }
  func.func @transform_6(%arg0: i32) -> (i32, i32, i32) {
    %c0_i32 = arith.constant 0 : i32
    %c0_i32_0 = arith.constant 0 : i32
    %c0_i32_1 = arith.constant 0 : i32
    return %arg0, %c0_i32, %c0_i32_0 : i32, i32, i32
  }
}

</mosaic_0001>

<bundles_post_ra>
// kernel: tpu_custom_call.1
= control target key start
LH: loop header
LB: loop body
LE: loop exit
PB: predicated region body
PF: predicated region fallthrough
CT: control target
= control target key end

     0   :  { %11 = vsyncpa [#allocation4], 0  ;;  %s4719_s0 = inlined_call_operand.hbm [shape: f32[2,64,256], index: 0, kind: input, shape index: {}]   ;;  %s4720_s1 = inlined_call_operand.hbm [shape: f32[1,256], index: 1, kind: input, shape index: {}]   ;;  %s4721_s2 = inlined_call_operand.hbm [shape: f32[1,256], index: 2, kind: input, shape index: {}]   ;;  %s4722_s3 = inlined_call_operand.hbm [shape: bf16[256,768], index: 3, kind: input, shape index: {}]   ;;  %s4723_s4 = inlined_call_operand.hbm [shape: bf16[256,256], index: 4, kind: input, shape index: {}]   ;;  %s4724_s5 = inlined_call_operand.vmem [shape: f32[1,256], index: 5, kind: input, shape index: {}]   ;;  %s4725_s6 = inlined_call_operand.hbm [shape: f32[2,64,256], index: 6, kind: output, shape index: {}]  }
   0x1   :  { %13 = vsyncpa [#allocation4 + $0x1], 0 }
   0x2   :  { %14 = vsyncpa [#allocation7], 0 }
   0x3   :  { %15 = vsyncpa [#allocation10], 0 }
   0x4   :  { %16 = vsyncpa [#allocation5], 0 }
   0x5   :  { %18 = vsyncpa [#allocation5 + $0x1], 0  ;;  %s3832_s21 = smov 0   ;;  %s3834_s22 = smov 0  }
   0x6   :  { %s3836_s23 = smov 0   ;;  %s3838_s24 = smov 0  }
   0x7 LB: > { %s3853_s25 = sadd.s32 4294967295, %s3782_s24   ;;  %s2652_s26 = sadd.s32 4294967294, %s3782_s24   ;;  %s3782_s24 = sphi %s3838_s24, %s4752_s24   ;;  %s3778_s23 = sphi %s3836_s23, %s4751_s23   ;;  %s3774_s22 = sphi %s3834_s22, %s4750_s22   ;;  %s3770_s21 = sphi %s3832_s21, %s4749_s21  }
   0x8   : > { %p44_p0 = scmp.ne.s32.totalorder %s3774_s22, %s3770_s21  ;;  %p45_p1 = scmp.eq.s32.totalorder %s3853_s25, 0 }
   0x9   : > { %p173_p2 = scmp.eq.s32.totalorder %s3853_s25, 1  ;;  %p179_p3 = scmp.eq.s32.totalorder %s2652_s26, 1 }
   0xa   : > { %p3862_p4 = por %p45_p1, %p44_p0  ;;  %p2653_p5 = scmp.ge.s32.totalorder %s3782_s24, 1 }
   0xb   : > { %p3867_p6 = por %p179_p3, %p44_p0  ;;  %p186_p7 = scmp.lt.s32.totalorder %s3782_s24, 3 }
   0xc   : > { %s198_s7 = sshll.u32 %s4720_s1, 4  ;;  %s3784_s9 = smov [#allocation6]   ;;  %s199_s7 = int_to_ptr.hbm [resolvable:$true] %s198_s7 }
   0xd   : > { %p3875_p8 = pnand %p2653_p5, %p186_p7  ;;  %s200_s10 = sshll.u32 %s3784_s9, 4  ;;  %s201_s10 = int_to_ptr.vmem [resolvable:$true] %s200_s10 }
   0xe   : > { %s221_s13 = sshll.u32 %s4722_s3, 4  ;;  %s3785_s15 = smov [#allocation9]   ;;  %s222_s13 = int_to_ptr.hbm [resolvable:$true] %s221_s13 }
   0xf   : > { %p3384_p10 = pneg %p3875_p8  ;;  %s223_s16 = sshll.u32 %s3785_s15, 4  ;;  %s224_s16 = int_to_ptr.vmem [resolvable:$true] %s223_s16 }
  0x10   : > { %s3786_s17 = smov 384   ;;  %s3787_s18 = smov 24  }
  0x11   : > { %p3887_p11 = pnand %p3384_p10, %p45_p1  ;;  %s210_s26 = sshll.u32 %s4721_s2, 4  ;;  %s211_s26 = int_to_ptr.hbm [resolvable:$true] %s210_s26 }
  0x12   : > { %s3788_s29 = smov [#allocation8]   ;;  %s3789_s11 = smov [#allocation11]  }
  0x13   : > { %3387 = dma.hbm_to_vmem [thread:$0]  (!%p3887_p11), %s199_s7, 32, %s201_s10, [#allocation7]  }
  0x14   : > { %3393 = dma.hbm_to_vmem [thread:$0]  (!%p3887_p11), %s222_s13, 12288, %s224_s16, [#allocation10], %s3786_s17, %s3786_s17, %s3787_s18  }
  0x15   : > { %s212_s30 = sshll.u32 %s3788_s29, 4  ;;  %s235_s10 = sshll.u32 %s4723_s4, 4  ;;  %s213_s30 = int_to_ptr.vmem [resolvable:$true] %s212_s30  ;;  %s236_s10 = int_to_ptr.hbm [resolvable:$true] %s235_s10 }
  0x16   : > { %3390 = dma.hbm_to_vmem [thread:$0]  (!%p3887_p11), %s211_s26, 32, %s213_s30, [#allocation7]  }
  0x17   : > { %s237_s12 = sshll.u32 %s3789_s11, 4  ;;  %s3790_s13 = smov 128   ;;  %s238_s12 = int_to_ptr.vmem [resolvable:$true] %s237_s12 }
  0x18   : > { %s3791_s15 = smov 8   ;;  %s3906_s16 = sadd.s32 1, %s3782_s24  }
  0x19   : > { %3396 = dma.hbm_to_vmem [thread:$0]  (!%p3887_p11), %s236_s10, 4096, %s238_s12, [#allocation10], %s3790_s13, %s3790_s13, %s3791_s15  }
  0x1a   : > { %s28_s17 = ssub.s32 %s3782_s24, %s3906_s16  ;;  %s31_s18 = sadd.s32 1, %s3778_s23 }
  0x1b   : > { %p29_p12 = scmp.eq.s32.totalorder %s28_s17, 0  ;;  %p38_p13 = scmp.ne.s32.totalorder %s3778_s23, %s3774_s22 }
  0x1c   : > { %p39_p0 = scmp.eq.s32.totalorder %s3782_s24, 0  ;;  %p3409_p7 = scmp.lt.s32.totalorder %s3782_s24, 2 }
  0x1d   : > { %s3915_s19 = scalar_select %p29_p12, %s3778_s23, %s31_s18  }
  0x1e   : > { %p40_p3 = por %p39_p0, %p38_p13  ;;  %p3919_p5 = por %p173_p2, %p38_p13 }
  0x1f   : > { %s254_s26 = sand.u32 1, %s3778_s23   ;;  %s3226_s29 = sshll.u32 %s3782_s24, 7 }
  0x20   : > { %s2659_s14 = sshll.u32 %s254_s26, 7  ;;  %s263_s9 = scalar_lea.hbm %s4719_s0, %s3226_s29 }
  0x21   : > { %s258_s10 = scalar_lea.vmem [#allocation3], %s2659_s14  ;;  %s264_s12 = sshll.u32 %s263_s9, 4  ;;  %s265_s12 = int_to_ptr.hbm [resolvable:$true] %s264_s12 }
  0x22   : > { %s266_s11 = sshll.u32 %s258_s10, 4  ;;  %p3929_p10 = pnand %p3409_p7, %p40_p3  ;;  %s267_s11 = int_to_ptr.vmem [resolvable:$true] %s266_s11 }
  0x23   : > { %s255_s15 = scalar_lea.sflag [#allocation4], %s254_s26  ;;  %s3678_s17 = sshra.s32 %s265_s12, 4  ;;  %s3679_s17 = int_to_ptr.hbm [resolvable:$true] %s3678_s17 }
  0x24   : > { %s3680_s18 = scalar_lea.hbm %s3679_s17, 128  ;;  %p3682_p11 = pneg %p3929_p10 }
  0x25   : > { %p3681_p2 = scmp.ne.s32.totalorder %s3679_s17, %s3680_s18  ;;  %s3685_s30 = scalar_lea.hbm %s4719_s0, 256 }
  0x26   : > { %p3686_p0 = scmp.lt.s32.totalorder %s3679_s17, %s4719_s0  ;;  %p3687_p3 = scmp.lt.s32.totalorder %s3685_s30, %s3680_s18 }
  0x27   : > { %p3683_p12 = pnand %p3682_p11, %p3681_p2 }
  0x28   : > { %p3688_p7 = por %p3687_p3, %p3686_p0 }
  0x29   : > { %p3684_p13 = pneg %p3683_p12 }
  0x2b   : > { %p3689_p9 = pnand %p3688_p7, %p3684_p13 }
  0x2d   : > { %3692 = shalt.err (!%p3689_p9)
}
  0x2e   : > { %s3792_s26 = smov 256   ;;  %s3793_s10 = smov 16  }
  0x2f   : > { %3400 = dma.hbm_to_vmem [thread:$0]  (!%p3929_p10), %s265_s12, 2048, %s267_s11, %s255_s15, %s3792_s26, %s3792_s26, %s3793_s10  }
  0x30   : > { %278 = sbr.rel (%p3875_p8) target bundleno = 1390 (0x56e), region = 44 }
  0x35   : > { %s3946_s29 = sand.u32 1, %s3774_s22  }
  0x36   : > { %s2663_s17 = sshll.u32 %s3946_s29, 7  ;;  %s281_s18 = scalar_lea.sflag [#allocation4], %s3946_s29 }
  0x37   : > { %s3952_s14 = scalar_lea.vmem [#allocation3], %s2663_s17 }
  0x38   : > { %3753 = dma.done.wait (%p3862_p4), %s281_s18, 2048  }
  0x39   : > { %3755 = vsyncadd (%p3862_p4), %s281_s18, 4294965248 }
  0x3a   : > { %3757 = dma.done.wait (%p45_p1), [#allocation7], 64  }
  0x3b   : > { %3759 = vsyncadd (%p45_p1), [#allocation7], 4294967232 }
  0x3c   : > { %3761 = dma.done.wait (%p45_p1), [#allocation10], 16384  }
  0x3d   : > { %3763 = vsyncadd (%p45_p1), [#allocation10], 4294950912  ;;  %v3967_v0 = vld [vmem:[%s3952_s14 + $0x40] sm:$0xff]  ;;  %v3970_v1 = vld [vmem:[%s3952_s14 + $0x48] sm:$0xff]  ;;  %v3794_v24 = vmov 256.0   ;;  %s4637_s11 = scalar_lea.vmem [#allocation12], %s2663_s17 }
  0x3e   : > { %v339_v2 = vld [vmem:[%s3952_s14 + $0x20] sm:$0xff]  ;;  %v365_v3 = vadd.f32 %v3970_v1, %v3967_v0  ;;  %v340_v4 = vld [vmem:[%s3952_s14 + $0x28] sm:$0xff]  ;;  %v345_v9 = vld [vmem:[%s3952_s14 + $0x50] sm:$0xff]  ;;  %3460 = vrcp.f32 %v3794_v24  ;;  %s3363_s12 = sshll.u32 %s3853_s25, 7  ;;  %s2538_s25 = sshll.u32 %s4637_s11, 4  ;;  %s2539_s25 = int_to_ptr.vmem [resolvable:$true] %s2538_s25 }
  0x3f   : > { %v335_v5 = vld [vmem:[%s3952_s14] sm:$0xff]  ;;  %v336_v6 = vld [vmem:[%s3952_s14 + $0x8] sm:$0xff]  ;;  %v359_v7 = vadd.f32 %v340_v4, %v339_v2  ;;  %v346_v10 = vld [vmem:[%s3952_s14 + $0x58] sm:$0xff]  ;;  %s2537_s30 = scalar_lea.hbm %s4725_s6, %s3363_s12  ;;  %s2526_s9 = scalar_lea.sflag [#allocation5], %s3946_s29 }
  0x40   : > { %v353_v8 = vadd.f32 %v336_v6, %v335_v5  ;;  %366 = vadd.xlane.f32.xlu2 %v365_v3  ;;  %v341_v11 = vld [vmem:[%s3952_s14 + $0x30] sm:$0xff]  ;;  %v342_v12 = vld [vmem:[%s3952_s14 + $0x38] sm:$0xff]  ;;  %v368_v15 = vadd.f32 %v346_v10, %v345_v9  ;;  %v3985_v18 = vld [vmem:[%s3952_s14 + $0x60] sm:$0xff]  ;;  %s2540_s7 = sshll.u32 %s2537_s30, 4  ;;  %s3728_s27 = scalar_lea.hbm %s4725_s6, 256  ;;  %s2541_s7 = int_to_ptr.hbm [resolvable:$true] %s2540_s7 }
  0x41   : > { %360 = vadd.xlane.f32.xlu1 %v359_v7  ;;  %v337_v13 = vld [vmem:[%s3952_s14 + $0x10] sm:$0xff]  ;;  %v338_v14 = vld [vmem:[%s3952_s14 + $0x18] sm:$0xff]  ;;  %v362_v16 = vadd.f32 %v342_v12, %v341_v11  ;;  %v3988_v19 = vld [vmem:[%s3952_s14 + $0x68] sm:$0xff]  ;;  %s3722_s26 = sshra.s32 %s2541_s7, 4  ;;  %s3723_s26 = int_to_ptr.hbm [resolvable:$true] %s3722_s26 }
  0x42   : > { %354 = vadd.xlane.f32.xlu0 %v353_v8  ;;  %v356_v17 = vadd.f32 %v338_v14, %v337_v13  ;;  %v3991_v20 = vld [vmem:[%s3952_s14 + $0x70] sm:$0xff]  ;;  %v3994_v21 = vld [vmem:[%s3952_s14 + $0x78] sm:$0xff]  ;;  %v371_v22 = vadd.f32 %v3988_v19, %v3985_v18  ;;  %s3724_s10 = scalar_lea.hbm %s3723_s26, 128  ;;  %p3729_p9 = scmp.lt.s32.totalorder %s3723_s26, %s4725_s6 }
  0x43   : > { %v374_v23 = vadd.f32 %v3994_v21, %v3991_v20  ;;  %p3725_p1 = scmp.ne.s32.totalorder %s3723_s26, %s3724_s10  ;;  %p3730_p10 = scmp.lt.s32.totalorder %s3728_s27, %s3724_s10 }
  0x44   : > { %v3461_v25 = vpop.eup %3460 }
  0x45   : > { %v378_v26 = vmul.f32 256.0, %v3461_v25  ;;  %vm382_vm0 = vweird.f32 %v3461_v25  ;;  %p3726_p4 = pnand %p3725_p1, %p3919_p5  ;;  %p3731_p2 = por %p3730_p10, %p3729_p9 }
  0x47   : > { %v379_v27 = vsub.f32 1.0, %v378_v26  ;;  %v3272_v26 = vld [vmem:[#allocation9 + $0x164] sm:$0xf0]  ;;  %p3727_p8 = pneg %p3726_p4 }
  0x48   : > { %369 = vadd.xlane.f32.xlu2 %v368_v15 }
  0x49   : > { %363 = vadd.xlane.f32.xlu1 %v362_v16  ;;  %v380_v28 = vmul.f32 %v3461_v25, %v379_v27  ;;  %v3031_v27 = vld [vmem:[#allocation9 + $0x2d0] sm:$0xf]  ;;  %p3732_p11 = pnand %p3731_p2, %p3727_p8 }
  0x4a   : > { %357 = vadd.xlane.f32.xlu0 %v356_v17 }
  0x4b   : > { %v381_v29 = vadd.f32 %v3461_v25, %v380_v28  ;;  %v3320_v28 = vld [vmem:[#allocation9 + $0x2e4] sm:$0xf0] }
  0x4d   : > { %v4000_v30 = vsel %vm382_vm0, %v3461_v25, %v381_v29  ;;  %v2839_v25 = vld [vmem:[#allocation9 + $0x150] sm:$0xf]  ;;  %v3269_v29 = vld [vmem:[#allocation9 + $0x154] sm:$0xf] }
  0x51   : > { %375 = vadd.xlane.f32.xlu1 %v374_v23 }
  0x52   : > { %372 = vadd.xlane.f32.xlu0 %v371_v22 }
  0xb3   : > { %v367_v31 = vpop.xlane.xlu2 %366 }
  0xb4   : > { %v361_v32 = vpop.xlane.xlu1 %360  ;;  %v388_v52 = vmul.f32 %v4000_v30, %v367_v31  ;;  %v3032_v31 = vor.u32 %v3320_v28, %v3031_v27  ;;  %v3248_v27 = vld [vmem:[#allocation9 + $0xa4] sm:$0xf0] }
  0xb5   : > { %v355_v33 = vpop.xlane.xlu0 %354  ;;  %v386_v34 = vmul.f32 %v4000_v30, %v361_v32 }
  0xb6   : > { %v384_v35 = vmul.f32 %v4000_v30, %v355_v33  ;;  %v4049_v3 = vsub.f32 %v3967_v0, %v388_v52  ;;  %v3317_v33 = vld [vmem:[#allocation9 + $0x2d4] sm:$0xf]  ;;  %1215 = vmatpush.bf16.msra.mxu1 %v3032_v31  ;;  %v2745_v31 = vld [vmem:[#allocation9 + $0xa8] sm:$0xf0] }
  0xb7   : > { %v4004_v36 = vsub.f32 %v339_v2, %v386_v34  ;;  %v4006_v37 = vsub.f32 %v340_v4, %v386_v34  ;;  %v4052_v4 = vsub.f32 %v3970_v1, %v388_v52  ;;  %v3033_v34 = vld [vmem:[#allocation9 + $0x2e8] sm:$0xf0]  ;;  %v2791_v52 = vld [vmem:[#allocation9 + $0xf0] sm:$0xf] }
  0xb8   : > { %v4008_v38 = vsub.f32 %v335_v5, %v384_v35  ;;  %v4010_v39 = vsub.f32 %v336_v6, %v384_v35  ;;  %v3036_v35 = vor.u32 %v3317_v33, %v3033_v34  ;;  %v3293_v34 = vld [vmem:[#allocation9 + $0x214] sm:$0xf] }
  0xb9   : > { %v412_v40 = vmul.f32 %v4004_v36, %v4004_v36  ;;  %v413_v41 = vmul.f32 %v4006_v37, %v4006_v37  ;;  %v417_v0 = vmul.f32 %v4052_v4, %v4052_v4 }
  0xba   : > { %v408_v42 = vmul.f32 %v4008_v38, %v4008_v38  ;;  %v409_v43 = vmul.f32 %v4010_v39, %v4010_v39  ;;  %1273 = vmatpush.bf16.msra.mxu3 %v3036_v35  ;;  %v2937_v35 = vld [vmem:[#allocation9 + $0x228] sm:$0xf0] }
  0xbb   : > { %v370_v44 = vpop.xlane.xlu2 %369  ;;  %v430_v45 = vadd.f32 %v413_v41, %v412_v40  ;;  %v2815_v40 = vld [vmem:[#allocation9 + $0x120] sm:$0xf]  ;;  %v3266_v41 = vld [vmem:[#allocation9 + $0x134] sm:$0xf0] }
  0xbc   : > { %v424_v46 = vadd.f32 %v409_v43, %v408_v42  ;;  %v389_v47 = vmul.f32 %v4000_v30, %v370_v44  ;;  %v364_v48 = vpop.xlane.xlu1 %363  ;;  %v3007_v42 = vld [vmem:[#allocation9 + $0x2a0] sm:$0xf]  ;;  %v2816_v43 = vor.u32 %v3266_v41, %v2815_v40  ;;  %v3314_v44 = vld [vmem:[#allocation9 + $0x2b4] sm:$0xf0]  ;;  %v2940_v40 = vor.u32 %v3293_v34, %v2937_v35 }
  0xbd   : > { %v358_v49 = vpop.xlane.xlu0 %357  ;;  %v387_v50 = vmul.f32 %v4000_v30, %v364_v48  ;;  %431 = vadd.xlane.f32.xlu1 %v430_v45  ;;  %v3263_v45 = vld [vmem:[#allocation9 + $0x124] sm:$0xf] }
  0xbe   : > { %v385_v51 = vmul.f32 %v4000_v30, %v358_v49  ;;  %425 = vadd.xlane.f32.xlu2 %v424_v46  ;;  %v4024_v53 = vsub.f32 %v345_v9, %v389_v47  ;;  %v4026_v54 = vsub.f32 %v346_v10, %v389_v47  ;;  %v2817_v46 = vld [vmem:[#allocation9 + $0x138] sm:$0xf0]  ;;  %v3008_v47 = vor.u32 %v3314_v44, %v3007_v42  ;;  %v3311_v49 = vld [vmem:[#allocation9 + $0x2a4] sm:$0xf] }
  0xbf   : > { %v4028_v55 = vsub.f32 %v341_v11, %v387_v50  ;;  %v4030_v56 = vsub.f32 %v342_v12, %v387_v50  ;;  %v416_v12 = vmul.f32 %v4049_v3, %v4049_v3  ;;  %v2820_v48 = vor.u32 %v3263_v45, %v2817_v46  ;;  %v3009_v50 = vld [vmem:[#allocation9 + $0x2b8] sm:$0xf0]  ;;  %v2719_v45 = vld [vmem:[#allocation9 + $0x60] sm:$0xf]  ;;  %v3242_v46 = vld [vmem:[#allocation9 + $0x74] sm:$0xf0] }
  0xc0   : > { %v4032_v57 = vsub.f32 %v337_v13, %v385_v51  ;;  %v4034_v58 = vsub.f32 %v338_v14, %v385_v51  ;;  %v418_v59 = vmul.f32 %v4024_v53, %v4024_v53  ;;  %v419_v60 = vmul.f32 %v4026_v54, %v4026_v54  ;;  %1216 = vmatpush.bf16.msra.mxu1 %v3008_v47  ;;  %v2911_v47 = vld [vmem:[#allocation9 + $0x1e0] sm:$0xf] }
  0xc1   : > { %v414_v61 = vmul.f32 %v4028_v55, %v4028_v55  ;;  %v415_v62 = vmul.f32 %v4030_v56, %v4030_v56  ;;  %v436_v22 = vadd.f32 %v417_v0, %v416_v12  ;;  %v3012_v51 = vor.u32 %v3311_v49, %v3009_v50  ;;  %v2959_v12 = vld [vmem:[#allocation9 + $0x240] sm:$0xf]  ;;  %v3290_v49 = vld [vmem:[#allocation9 + $0x1f4] sm:$0xf0]  ;;  %v3239_v50 = vld [vmem:[#allocation9 + $0x64] sm:$0xf] }
  0xc2   : > { %v410_v63 = vmul.f32 %v4032_v57, %v4032_v57  ;;  %v411_v2 = vmul.f32 %v4034_v58, %v4034_v58  ;;  %v439_v5 = vadd.f32 %v419_v60, %v418_v59  ;;  %v3260_v59 = vld [vmem:[#allocation9 + $0x104] sm:$0xf0]  ;;  %v2983_v60 = vld [vmem:[#allocation9 + $0x270] sm:$0xf] }
  0xc3   : > { %v433_v6 = vadd.f32 %v415_v62, %v414_v61  ;;  %1274 = vmatpush.bf16.msra.mxu3 %v3012_v51  ;;  %v2792_v61 = vor.u32 %v3260_v59, %v2791_v52  ;;  %v3308_v62 = vld [vmem:[#allocation9 + $0x284] sm:$0xf0]  ;;  %v2721_v51 = vld [vmem:[#allocation9 + $0x78] sm:$0xf0]  ;;  %v2912_v59 = vor.u32 %v3290_v49, %v2911_v47 }
  0xc4   : > { %v427_v7 = vadd.f32 %v411_v2, %v410_v63  ;;  %v376_v9 = vpop.xlane.xlu1 %375  ;;  %v3257_v63 = vld [vmem:[#allocation9 + $0xf4] sm:$0xf]  ;;  %v2793_v2 = vld [vmem:[#allocation9 + $0x108] sm:$0xf0] }
  0xc5   : > { %v373_v8 = vpop.xlane.xlu0 %372  ;;  %440 = vadd.xlane.f32.xlu1 %v439_v5  ;;  %v391_v11 = vmul.f32 %v4000_v30, %v376_v9  ;;  %v2984_v5 = vor.u32 %v3308_v62, %v2983_v60  ;;  %v2724_v60 = vor.u32 %v3239_v50, %v2721_v51 }
  0xc6   : > { %v390_v10 = vmul.f32 %v4000_v30, %v373_v8  ;;  %434 = vadd.xlane.f32.xlu2 %v433_v6  ;;  %428 = vadd.xlane.f32.xlu0 %v427_v7  ;;  %v2796_v6 = vor.u32 %v3257_v63, %v2793_v2  ;;  %v3305_v7 = vld [vmem:[#allocation9 + $0x274] sm:$0xf]  ;;  %v2985_v8 = vld [vmem:[#allocation9 + $0x288] sm:$0xf0]  ;;  %v2913_v63 = vld [vmem:[#allocation9 + $0x1f8] sm:$0xf0] }
  0xc7   : > { %v4071_v16 = vsub.f32 %v3991_v20, %v391_v11  ;;  %v4074_v17 = vsub.f32 %v3994_v21, %v391_v11  ;;  %v2840_v20 = vor.u32 %v3272_v26, %v2839_v25  ;;  %v2841_v21 = vld [vmem:[#allocation9 + $0x168] sm:$0xf0]  ;;  %v2988_v9 = vor.u32 %v3305_v7, %v2985_v8  ;;  %1217 = vmatpush.bf16.msra.mxu1 %v2984_v5  ;;  %v3254_v11 = vld [vmem:[#allocation9 + $0xd4] sm:$0xf0]  ;;  %v2743_v26 = vld [vmem:[#allocation9 + $0x90] sm:$0xf] }
  0xc8   : > { %v4061_v1 = vsub.f32 %v3985_v18, %v390_v10  ;;  %v4064_v13 = vsub.f32 %v3988_v19, %v390_v10  ;;  %v2844_v32 = vor.u32 %v3269_v29, %v2841_v21  ;;  %v2767_v10 = vld [vmem:[#allocation9 + $0xc0] sm:$0xf]  ;;  %v2744_v28 = vor.u32 %v3248_v27, %v2743_v26  ;;  %v3296_v29 = vld [vmem:[#allocation9 + $0x224] sm:$0xf0]  ;;  %v3245_v21 = vld [vmem:[#allocation9 + $0x94] sm:$0xf] }
  0xc9   : > { %v422_v18 = vmul.f32 %v4071_v16, %v4071_v16  ;;  %v423_v19 = vmul.f32 %v4074_v17, %v4074_v17  ;;  %1186 = vmatpush.bf16.msra.mxu0 %v2840_v20  ;;  %1275 = vmatpush.bf16.msra.mxu3 %v2988_v9  ;;  %v2768_v0 = vor.u32 %v3254_v11, %v2767_v10  ;;  %v2935_v20 = vld [vmem:[#allocation9 + $0x210] sm:$0xf]  ;;  %v3284_v9 = vld [vmem:[#allocation9 + $0x1c4] sm:$0xf0]  ;;  %v3233_v10 = vld [vmem:[#allocation9 + $0x34] sm:$0xf] }
  0xca   : > { %v420_v14 = vmul.f32 %v4061_v1, %v4061_v1  ;;  %v421_v15 = vmul.f32 %v4064_v13, %v4064_v13  ;;  %1244 = vmatpush.bf16.msra.mxu2 %v2844_v32  ;;  %v2936_v32 = vor.u32 %v3296_v29, %v2935_v20  ;;  %v2748_v33 = vor.u32 %v3245_v21, %v2745_v31  ;;  %v2695_v5 = vld [vmem:[#allocation9 + $0x30] sm:$0xf]  ;;  %v2697_v11 = vld [vmem:[#allocation9 + $0x48] sm:$0xf0]  ;;  %v2863_v26 = vld [vmem:[#allocation9 + $0x180] sm:$0xf] }
  0xcb   : > { %v445_v24 = vadd.f32 %v423_v19, %v422_v18  ;;  %v3299_v19 = vld [vmem:[#allocation9 + $0x244] sm:$0xf]  ;;  %v2887_v7 = vld [vmem:[#allocation9 + $0x1b0] sm:$0xf]  ;;  %v2673_v21 = vld [vmem:[#allocation9 + $0x18] sm:$0xf0] }
  0xcc   : > { %v442_v23 = vadd.f32 %v421_v15, %v420_v14  ;;  %v3302_v14 = vld [vmem:[#allocation9 + $0x254] sm:$0xf0]  ;;  %v3251_v15 = vld [vmem:[#allocation9 + $0xc4] sm:$0xf] }
  0xcd   : > { %1187 = vmatpush.bf16.msra.mxu0 %v2816_v43  ;;  %v3227_v29 = vld [vmem:[#allocation9 + $0x4] sm:$0xf] }
  0xce   : > { %443 = vadd.xlane.f32.xlu2 %v442_v23  ;;  %437 = vadd.xlane.f32.xlu0 %v436_v22  ;;  %v2769_v22 = vld [vmem:[#allocation9 + $0xd8] sm:$0xf0]  ;;  %v2960_v23 = vor.u32 %v3302_v14, %v2959_v12  ;;  %v2888_v12 = vor.u32 %v3284_v9, %v2887_v7  ;;  %v3281_v14 = vld [vmem:[#allocation9 + $0x1b4] sm:$0xf] }
  0xcf   : > { %1245 = vmatpush.bf16.msra.mxu2 %v2820_v48  ;;  %v2772_v18 = vor.u32 %v3251_v15, %v2769_v22  ;;  %v2720_v48 = vor.u32 %v3242_v46, %v2719_v45  ;;  %v2889_v15 = vld [vmem:[#allocation9 + $0x1c8] sm:$0xf0]  ;;  %v351_v7 = vld [vmem:[#allocation6] sm:$0x3] }
  0xd0   : > { %1218 = vmatpush.bf16.msra.mxu1 %v2960_v23  ;;  %v2892_v23 = vor.u32 %v3281_v14, %v2889_v15  ;;  %v4112_v14 = vperm.slane %v351_v7, 0 }
  0xd1   : > { %1188 = vmatpush.bf16.msra.mxu0 %v2792_v61  ;;  %v3287_v61 = vld [vmem:[#allocation9 + $0x1e4] sm:$0xf] }
  0xd2   : > { %v2916_v2 = vor.u32 %v3287_v61, %v2913_v63 }
  0xd3   : > { %1246 = vmatpush.bf16.msra.mxu2 %v2796_v6  ;;  %v3236_v6 = vld [vmem:[#allocation9 + $0x44] sm:$0xf0] }
  0xd4   : > { %1219 = vmatpush.bf16.msra.mxu1 %v2936_v32  ;;  %v2696_v8 = vor.u32 %v3236_v6, %v2695_v5 }
  0xd5   : > { %1189 = vmatpush.bf16.msra.mxu0 %v2768_v0  ;;  %v2700_v0 = vor.u32 %v3233_v10, %v2697_v11 }
  0xd6   : > { %446 = vadd.xlane.f32.xlu0 %v445_v24  ;;  %v2961_v24 = vld [vmem:[#allocation9 + $0x258] sm:$0xf0] }
  0xd7   : > { %v2964_v25 = vor.u32 %v3299_v19, %v2961_v24  ;;  %1247 = vmatpush.bf16.msra.mxu2 %v2772_v18  ;;  %v2671_v24 = vld [vmem:[#allocation9] sm:$0xf] }
  0xd8   : > { %1220 = vmatpush.bf16.msra.mxu1 %v2912_v59 }
  0xd9   : > { %1276 = vmatpush.bf16.msra.mxu3 %v2964_v25  ;;  %1190 = vmatpush.bf16.msra.mxu0 %v2744_v28  ;;  %v3230_v25 = vld [vmem:[#allocation9 + $0x14] sm:$0xf0] }
  0xda   : > { %v2672_v20 = vor.u32 %v3230_v25, %v2671_v24  ;;  %v3278_v28 = vld [vmem:[#allocation9 + $0x194] sm:$0xf0] }
  0xdb   : > { %1248 = vmatpush.bf16.msra.mxu2 %v2748_v33  ;;  %v2864_v32 = vor.u32 %v3278_v28, %v2863_v26  ;;  %v2676_v33 = vor.u32 %v3227_v29, %v2673_v21 }
  0xdc   : > { %1221 = vmatpush.bf16.msra.mxu1 %v2888_v12 }
  0xdd   : > { %1277 = vmatpush.bf16.msra.mxu3 %v2940_v40  ;;  %1191 = vmatpush.bf16.msra.mxu0 %v2720_v48 }
  0xdf   : > { %1249 = vmatpush.bf16.msra.mxu2 %v2724_v60 }
  0xe0   : > { %1222 = vmatpush.bf16.msra.mxu1 %v2864_v32 }
  0xe1   : > { %1278 = vmatpush.bf16.msra.mxu3 %v2916_v2  ;;  %1192 = vmatpush.bf16.msra.mxu0 %v2696_v8 }
  0xe3   : > { %1250 = vmatpush.bf16.msra.mxu2 %v2700_v0  ;;  %v352_v0 = vld [vmem:[#allocation8] sm:$0x3] }
  0xe4   : > { %v4123_v28 = vperm.slane %v352_v0, 1 }
  0xe5   : > { %1279 = vmatpush.bf16.msra.mxu3 %v2892_v23  ;;  %1193 = vmatpush.bf16.msra.mxu0 %v2672_v20  ;;  %v4121_v20 = vperm.slane %v352_v0, 0 }
  0xe7   : > { %1251 = vmatpush.bf16.msra.mxu2 %v2676_v33 }
 0x130   : > { %v432_v41 = vpop.xlane.xlu1 %431 }
 0x131   : > { %v426_v42 = vpop.xlane.xlu2 %425  ;;  %v450_v43 = vmul.f32 %v432_v41, %v4000_v30  ;;  %v3275_v41 = vld [vmem:[#allocation9 + $0x184] sm:$0xf] }
 0x132   : > { %v448_v44 = vmul.f32 %v426_v42, %v4000_v30  ;;  %v2865_v42 = vld [vmem:[#allocation9 + $0x198] sm:$0xf0] }
 0x133   : > { %v4084_v62 = vadd.f32 1e-05, %v450_v43  ;;  %v2868_v46 = vor.u32 %v3275_v41, %v2865_v42 }
 0x134   : > { %v4082_v52 = vadd.f32 1e-05, %v448_v44 }
 0x135   : > { %1280 = vmatpush.bf16.msra.mxu3 %v2868_v46  ;;  %vm490_vm9 = vweird.f32 %v4084_v62 }
 0x136   : > { %3462 = vrsqrt.f32 %v4082_v52  ;;  %vm470_vm2 = vweird.f32 %v4082_v52 }
 0x137   : > { %3464 = vrsqrt.f32 %v4084_v62 }
 0x138   : > { %v441_v35 = vpop.xlane.xlu1 %440 }
 0x139   : > { %v435_v22 = vpop.xlane.xlu2 %434  ;;  %v429_v19 = vpop.xlane.xlu0 %428  ;;  %v453_v45 = vmul.f32 %v441_v35, %v4000_v30 }
 0x13a   : > { %v451_v18 = vmul.f32 %v435_v22, %v4000_v30  ;;  %v449_v27 = vmul.f32 %v429_v19, %v4000_v30  ;;  %v4114_v22 = vperm.slane %v351_v7, 1 }
 0x13b   : > { %v4099_v59 = vadd.f32 1e-05, %v453_v45 }
 0x13c   : > { %v4090_v31 = vadd.f32 1e-05, %v451_v18  ;;  %v3463_v34 = vpop.eup %3462  ;;  %v457_v40 = vadd.f32 1e-05, %v449_v27 }
 0x13d   : > { %v465_v43 = vmul.f32 %v3463_v34, %v4082_v52  ;;  %v4095_v47 = vpop.eup %3464  ;;  %vm471_vm1 = vweird.f32 %v3463_v34  ;;  %vm520_vm13 = vweird.f32 %v4099_v59 }
 0x13e   : > { %3466 = vrsqrt.f32 %v4090_v31  ;;  %v485_v50 = vmul.f32 %v4095_v47, %v4084_v62  ;;  %vm472_vm3 = vmor %vm470_vm2, %vm471_vm1  ;;  %vm480_vm5 = vweird.f32 %v457_v40  ;;  %vm500_vm6 = vweird.f32 %v4090_v31 }
 0x13f   : > { %v466_v44 = vmul.f32 %v3463_v34, %v465_v43  ;;  %3468 = vrsqrt.f32 %v457_v40  ;;  %vm491_vm10 = vweird.f32 %v4095_v47 }
 0x140   : > { %v486_v8 = vmul.f32 %v4095_v47, %v485_v50  ;;  %3470 = vrsqrt.f32 %v4099_v59  ;;  %vm492_vm12 = vmor %vm490_vm9, %vm491_vm10  ;;  %vm1635_vm9 = vcmask 523264  }
 0x141   : > { %v467_v48 = vmul.f32 0.5, %v466_v44  ;;  %v438_v49 = vpop.xlane.xlu0 %437  ;;  %v444_v26 = vpop.xlane.xlu2 %443 }
 0x142   : > { %v452_v60 = vmul.f32 %v438_v49, %v4000_v30  ;;  %v487_v52 = vmul.f32 0.5, %v486_v8 }
 0x143   : > { %v468_v51 = vsub.f32 1.5, %v467_v48 }
 0x144   : > { %v4102_v61 = vpop.eup %3466  ;;  %v4110_v10 = vadd.f32 1e-05, %v452_v60  ;;  %v488_v32 = vsub.f32 1.5, %v487_v52 }
 0x145   : > { %v3469_v63 = vpop.eup %3468  ;;  %v469_v2 = vmul.f32 %v3463_v34, %v468_v51  ;;  %v495_v5 = vmul.f32 %v4102_v61, %v4090_v31  ;;  %vm501_vm8 = vweird.f32 %v4102_v61 }
 0x146   : > { %v475_v6 = vmul.f32 %v3469_v63, %v457_v40  ;;  %3472 = vrsqrt.f32 %v4110_v10  ;;  %vm481_vm4 = vweird.f32 %v3469_v63  ;;  %v4119_v27 = vpop.eup %3470  ;;  %vm502_vm11 = vmor %vm500_vm6, %vm501_vm8  ;;  %vm510_vm15 = vweird.f32 %v4110_v10 }
 0x147   : > { %v496_v9 = vmul.f32 %v4102_v61, %v495_v5  ;;  %v473_v12 = vsel %vm472_vm3, %v3463_v34, %v469_v2  ;;  %vm482_vm7 = vmor %vm480_vm5, %vm481_vm4  ;;  %v515_v35 = vmul.f32 %v4119_v27, %v4099_v59  ;;  %vm521_vm14 = vweird.f32 %v4119_v27  ;;  %v3288_v59 = vld [vmem:[#allocation9 + $0x1ec] sm:$0xf] }
 0x148   : > { %v476_v11 = vmul.f32 %v3469_v63, %v475_v6  ;;  %v544_v19 = vmul.f32 %v473_v12, %v4008_v38  ;;  %v545_v24 = vmul.f32 %v473_v12, %v4010_v39  ;;  %v454_v38 = vmul.f32 %v444_v26, %v4000_v30  ;;  %v3039_v12 = vld [vmem:[#allocation9 + $0x2d8] sm:$0xf]  ;;  %v3041_v26 = vld [vmem:[#allocation9 + $0x2f0] sm:$0xf0]  ;;  %vm4200_vm1 = vmor %vm520_vm13, %vm521_vm14 }
 0x149   : > { %v497_v23 = vmul.f32 0.5, %v496_v9  ;;  %v447_v18 = vpop.xlane.xlu0 %446  ;;  %v516_v62 = vmul.f32 %v4119_v27, %v515_v35 }
 0x14a   : > { %v477_v15 = vmul.f32 0.5, %v476_v11  ;;  %v455_v21 = vmul.f32 %v447_v18, %v4000_v30  ;;  %v565_v39 = vmul.f32 %v4112_v14, %v544_v19  ;;  %v566_v34 = vmul.f32 %v4114_v22, %v545_v24  ;;  %v3273_v11 = vld [vmem:[#allocation9 + $0x16c] sm:$0xf0]  ;;  %v3270_v18 = vld [vmem:[#allocation9 + $0x15c] sm:$0xf] }
 0x14b   : > { %v498_v33 = vsub.f32 1.5, %v497_v23  ;;  %v4146_v49 = vadd.f32 1e-05, %v454_v38  ;;  %v517_v31 = vmul.f32 0.5, %v516_v62  ;;  %v3321_v23 = vld [vmem:[#allocation9 + $0x2ec] sm:$0xf0] }
 0x14c   : > { %v478_v25 = vsub.f32 1.5, %v477_v15  ;;  %v4132_v42 = vpop.eup %3472  ;;  %v4137_v44 = vadd.f32 1e-05, %v455_v21  ;;  %v587_v50 = vadd.f32 %v4123_v28, %v566_v34  ;;  %v2849_v19 = vld [vmem:[#allocation9 + $0x170] sm:$0xf0]  ;;  %v3040_v24 = vor.u32 %v3321_v23, %v3039_v12 }
 0x14d   : > { %v505_v30 = vmul.f32 %v4132_v42, %v4110_v10  ;;  %v499_v45 = vmul.f32 %v4102_v61, %v498_v33  ;;  %v3015_v33 = vld [vmem:[#allocation9 + $0x2a8] sm:$0xf]  ;;  %v2852_v34 = vor.u32 %v3270_v18, %v2849_v19  ;;  %vm511_vm0 = vweird.f32 %v4132_v42  ;;  %v2993_v23 = vld [vmem:[#allocation9 + $0x290] sm:$0xf0] }
 0x14e   : > { %v479_v29 = vmul.f32 %v3469_v63, %v478_v25  ;;  %3474 = vrsqrt.f32 %v4137_v44  ;;  %v3318_v25 = vld [vmem:[#allocation9 + $0x2dc] sm:$0xf]  ;;  %1331 = vmatpush.bf16.msrb.mxu1 %v3040_v24  ;;  %vm4211_vm2 = vmor %vm510_vm15, %vm511_vm0  ;;  %v2775_v24 = vld [vmem:[#allocation9 + $0xc8] sm:$0xf]  ;;  %vm540_vm3 = vweird.f32 %v4137_v44  ;;  %vm530_vm5 = vweird.f32 %v4146_v49 }
 0x14f   : > { %v503_v2 = vsel %vm502_vm11, %v4102_v61, %v499_v45  ;;  %3476 = vrsqrt.f32 %v4146_v49  ;;  %v2847_v61 = vld [vmem:[#allocation9 + $0x158] sm:$0xf]  ;;  %v3044_v35 = vor.u32 %v3318_v25, %v3041_v26  ;;  %1360 = vmatpush.bf16.msrb.mxu2 %v2852_v34  ;;  %v3255_v25 = vld [vmem:[#allocation9 + $0xdc] sm:$0xf0]  ;;  %v3300_v34 = vld [vmem:[#allocation9 + $0x24c] sm:$0xf] }
 0x150   : > { %v483_v41 = vsel %vm482_vm7, %v3469_v63, %v479_v29  ;;  %v506_v63 = vmul.f32 %v4132_v42, %v505_v30  ;;  %v550_v9 = vmul.f32 %v503_v2, %v4028_v55  ;;  %v551_v15 = vmul.f32 %v503_v2, %v4030_v56  ;;  %v2823_v29 = vld [vmem:[#allocation9 + $0x128] sm:$0xf]  ;;  %v3267_v56 = vld [vmem:[#allocation9 + $0x13c] sm:$0xf0]  ;;  %v2825_v30 = vld [vmem:[#allocation9 + $0x140] sm:$0xf0] }
 0x151   : > { %v546_v40 = vmul.f32 %v483_v41, %v4032_v57  ;;  %v547_v43 = vmul.f32 %v483_v41, %v4034_v58  ;;  %v489_v57 = vmul.f32 %v4095_v47, %v488_v32  ;;  %v586_v58 = vadd.f32 %v4121_v20, %v565_v39  ;;  %1389 = vmatpush.bf16.msrb.mxu3 %v3044_v35  ;;  %v2969_v35 = vld [vmem:[#allocation9 + $0x260] sm:$0xf0] }
 0x152   : > { %v4167_v8 = vmul.f32 0.5, %v506_v63  ;;  %v2848_v52 = vor.u32 %v3273_v11, %v2847_v61  ;;  %v518_v32 = vsub.f32 1.5, %v517_v31  ;;  %v571_v39 = vmul.f32 %v4112_v14, %v550_v9  ;;  %v2991_v63 = vld [vmem:[#allocation9 + $0x278] sm:$0xf]  ;;  %v3258_v9 = vld [vmem:[#allocation9 + $0xfc] sm:$0xf] }
 0x153   : > { %v567_v46 = vmul.f32 %v4112_v14, %v546_v40  ;;  %v568_v48 = vmul.f32 %v4114_v22, %v547_v43  ;;  %v493_v7 = vsel %vm492_vm12, %v4095_v47, %v489_v57  ;;  %v2824_v41 = vor.u32 %v3267_v56, %v2823_v29  ;;  %v3315_v40 = vld [vmem:[#allocation9 + $0x2bc] sm:$0xf0]  ;;  %v3264_v43 = vld [vmem:[#allocation9 + $0x12c] sm:$0xf]  ;;  %v2801_v61 = vld [vmem:[#allocation9 + $0x110] sm:$0xf0] }
 0x154   : > { %v4174_v0 = vpop.eup %3474  ;;  %v548_v47 = vmul.f32 %v493_v7, %v4004_v36  ;;  %v549_v21 = vmul.f32 %v493_v7, %v4006_v37  ;;  %v508_v36 = vsub.f32 1.5, %v4167_v8  ;;  %1302 = vmatpush.bf16.msrb.mxu0 %v2848_v52  ;;  %v572_v45 = vmul.f32 %v4114_v22, %v551_v15  ;;  %v3312_v57 = vld [vmem:[#allocation9 + $0x2ac] sm:$0xf]  ;;  %v3309_v8 = vld [vmem:[#allocation9 + $0x28c] sm:$0xf0] }
 0x155   : > { %v588_v51 = vadd.f32 %v4121_v20, %v567_v46  ;;  %v589_v60 = vadd.f32 %v4123_v28, %v568_v48  ;;  %v535_v55 = vmul.f32 %v4174_v0, %v4137_v44  ;;  %v4184_v38 = vpop.eup %3476  ;;  %v3016_v48 = vor.u32 %v3315_v40, %v3015_v33  ;;  %v3306_v52 = vld [vmem:[#allocation9 + $0x27c] sm:$0xf]  ;;  %v3252_v56 = vld [vmem:[#allocation9 + $0xcc] sm:$0xf] }
 0x156   : > { %v569_v37 = vmul.f32 %v4112_v14, %v548_v47  ;;  %v2828_v62 = vor.u32 %v3264_v43, %v2825_v30  ;;  %v570_v2 = vmul.f32 %v4114_v22, %v549_v21  ;;  %v525_v7 = vmul.f32 %v4184_v38, %v4146_v49 }
 0x157   : > { %v4161_v5 = vpack.c.bf16 %v588_v51, %v586_v58  ;;  %v4163_v6 = vpack.c.bf16 %v589_v60, %v587_v50  ;;  %v536_v46 = vmul.f32 %v4174_v0, %v535_v55  ;;  %v3017_v58 = vld [vmem:[#allocation9 + $0x2c0] sm:$0xf0]  ;;  %v2799_v50 = vld [vmem:[#allocation9 + $0xf8] sm:$0xf]  ;;  %v3261_v60 = vld [vmem:[#allocation9 + $0x10c] sm:$0xf0]  ;;  %v519_v11 = vmul.f32 %v4119_v27, %v518_v32  ;;  %1332 = vmatpush.bf16.msrb.mxu1 %v3016_v48 }
 0x158   : > { %v3020_v51 = vor.u32 %v3312_v57, %v3017_v58  ;;  %1303 = vmatpush.bf16.msrb.mxu0 %v2824_v41  ;;  %v2800_v31 = vor.u32 %v3261_v60, %v2799_v50  ;;  %v592_v47 = vadd.f32 %v4121_v20, %v571_v39  ;;  %v2992_v15 = vor.u32 %v3309_v8, %v2991_v63  ;;  %v2967_v32 = vld [vmem:[#allocation9 + $0x248] sm:$0xf]  ;;  %v2777_v39 = vld [vmem:[#allocation9 + $0xe0] sm:$0xf0] }
 0x159   : > { %1194 = vmatmul.bf16.vlgmr.msra.gmra.mxu0 %v4161_v5  ;;  %1223 = vmatmul.bf16.vlgmr.msra.gmra.mxu1 %v4163_v6  ;;  %v593_v18 = vadd.f32 %v4123_v28, %v572_v45  ;;  %v509_v19 = vmul.f32 %v4132_v42, %v508_v36  ;;  %v4215_v55 = vmul.f32 0.5, %v536_v46  ;;  %v590_v26 = vadd.f32 %v4121_v20, %v569_v37  ;;  %v3303_v36 = vld [vmem:[#allocation9 + $0x25c] sm:$0xf0] }
 0x15a   : > { %1252 = vmatmul.bf16.vlgmr.msra.gmra.mxu2 %v4161_v5  ;;  %1281 = vmatmul.bf16.vlgmr.msra.gmra.mxu3 %v4163_v6  ;;  %v2804_v29 = vor.u32 %v3258_v9, %v2801_v61  ;;  %v2996_v21 = vor.u32 %v3306_v52, %v2993_v23  ;;  %v591_v33 = vadd.f32 %v4123_v28, %v570_v2  ;;  %v3297_v2 = vld [vmem:[#allocation9 + $0x22c] sm:$0xf0]  ;;  %v2945_v9 = vld [vmem:[#allocation9 + $0x230] sm:$0xf0]  ;;  %v2727_v61 = vld [vmem:[#allocation9 + $0x68] sm:$0xf]  ;;  %vm541_vm4 = vweird.f32 %v4174_v0 }
 0x15b   : > { %1361 = vmatpush.bf16.msrb.mxu2 %v2828_v62  ;;  %1390 = vmatpush.bf16.msrb.mxu3 %v3020_v51  ;;  %v526_v10 = vmul.f32 %v4184_v38, %v525_v7  ;;  %v523_v41 = vsel %vm4200_vm1, %v4119_v27, %v519_v11  ;;  %v4223_v40 = vpack.c.bf16 %v592_v47, %v590_v26  ;;  %v538_v58 = vsub.f32 1.5, %v4215_v55  ;;  %v3249_v62 = vld [vmem:[#allocation9 + $0xac] sm:$0xf0]  ;;  %v2943_v51 = vld [vmem:[#allocation9 + $0x218] sm:$0xf]  ;;  %vm4256_vm6 = vmor %vm540_vm3, %vm541_vm4 }
 0x15c   : > { %1304 = vmatpush.bf16.msrb.mxu0 %v2800_v31  ;;  %1333 = vmatpush.bf16.msrb.mxu1 %v2992_v15  ;;  %v4225_v43 = vpack.c.bf16 %v593_v18, %v591_v33  ;;  %v513_v30 = vsel %vm4211_vm2, %v4132_v42, %v509_v19  ;;  %v2776_v37 = vor.u32 %v3255_v25, %v2775_v24  ;;  %v2751_v42 = vld [vmem:[#allocation9 + $0x98] sm:$0xf]  ;;  %v3246_v7 = vld [vmem:[#allocation9 + $0x9c] sm:$0xf]  ;;  %v2753_v31 = vld [vmem:[#allocation9 + $0xb0] sm:$0xf0]  ;;  %vm531_vm7 = vweird.f32 %v4184_v38 }
 0x15d   : > { %v2968_v45 = vor.u32 %v3303_v36, %v2967_v32  ;;  %v2780_v46 = vor.u32 %v3252_v56, %v2777_v39  ;;  %v2972_v48 = vor.u32 %v3300_v34, %v2969_v35  ;;  %v4230_v57 = vmul.f32 0.5, %v526_v10  ;;  %v3243_v47 = vld [vmem:[#allocation9 + $0x7c] sm:$0xf0]  ;;  %v2919_v15 = vld [vmem:[#allocation9 + $0x1e8] sm:$0xf]  ;;  %vm532_vm8 = vmor %vm530_vm5, %vm531_vm7 }
 0x15e   : > { %v554_v27 = vmul.f32 %v523_v41, %v4024_v53  ;;  %v552_v50 = vmul.f32 %v513_v30, %v4049_v3  ;;  %v553_v60 = vmul.f32 %v513_v30, %v4052_v4  ;;  %v2752_v63 = vor.u32 %v3249_v62, %v2751_v42  ;;  %v3294_v3 = vld [vmem:[#allocation9 + $0x21c] sm:$0xf]  ;;  %v3291_v52 = vld [vmem:[#allocation9 + $0x1fc] sm:$0xf0]  ;;  %v3240_v18 = vld [vmem:[#allocation9 + $0x6c] sm:$0xf] }
 0x15f   : > { %1362 = vmatpush.bf16.msrb.mxu2 %v2804_v29  ;;  %1391 = vmatpush.bf16.msrb.mxu3 %v2996_v21  ;;  %v2944_v53 = vor.u32 %v3297_v2, %v2943_v51  ;;  %v2756_v8 = vor.u32 %v3246_v7, %v2753_v31  ;;  %v555_v11 = vmul.f32 %v523_v41, %v4026_v54  ;;  %v2729_v19 = vld [vmem:[#allocation9 + $0x80] sm:$0xf0]  ;;  %v2703_v21 = vld [vmem:[#allocation9 + $0x38] sm:$0xf]  ;;  %v3237_v54 = vld [vmem:[#allocation9 + $0x4c] sm:$0xf0] }
 0x160   : > { %1305 = vmatpush.bf16.msrb.mxu0 %v2776_v37  ;;  %1334 = vmatpush.bf16.msrb.mxu1 %v2968_v45  ;;  %v2948_v12 = vor.u32 %v3294_v3, %v2945_v9  ;;  %v575_v4 = vmul.f32 %v4112_v14, %v554_v27  ;;  %v573_v23 = vmul.f32 %v4112_v14, %v552_v50  ;;  %v2921_v29 = vld [vmem:[#allocation9 + $0x200] sm:$0xf0]  ;;  %v2895_v56 = vld [vmem:[#allocation9 + $0x1b8] sm:$0xf]  ;;  %v3285_v33 = vld [vmem:[#allocation9 + $0x1cc] sm:$0xf0] }
 0x161   : > { %v574_v24 = vmul.f32 %v4114_v22, %v553_v60  ;;  %v2728_v25 = vor.u32 %v3243_v47, %v2727_v61  ;;  %v2920_v26 = vor.u32 %v3291_v52, %v2919_v15  ;;  %v2732_v32 = vor.u32 %v3240_v18, %v2729_v19  ;;  %v3234_v10 = vld [vmem:[#allocation9 + $0x3c] sm:$0xf]  ;;  %v2705_v34 = vld [vmem:[#allocation9 + $0x50] sm:$0xf0]  ;;  %v2679_v42 = vld [vmem:[#allocation9 + $0x8] sm:$0xf] }
 0x162   : > { %v2924_v36 = vor.u32 %v3288_v59, %v2921_v29  ;;  %v576_v39 = vmul.f32 %v4114_v22, %v555_v11  ;;  %v3282_v35 = vld [vmem:[#allocation9 + $0x1bc] sm:$0xf]  ;;  %v2897_v41 = vld [vmem:[#allocation9 + $0x1d0] sm:$0xf0]  ;;  %v596_v30 = vadd.f32 %v4121_v20, %v575_v4  ;;  %v528_v37 = vsub.f32 1.5, %v4230_v57 }
 0x163   : > { %1363 = vmatpush.bf16.msrb.mxu2 %v2780_v46  ;;  %1392 = vmatpush.bf16.msrb.mxu3 %v2972_v48  ;;  %v594_v45 = vadd.f32 %v4121_v20, %v573_v23  ;;  %v595_v46 = vadd.f32 %v4123_v28, %v574_v24  ;;  %v2704_v27 = vor.u32 %v3237_v54, %v2703_v21  ;;  %v3231_v57 = vld [vmem:[#allocation9 + $0x1c] sm:$0xf0]  ;;  %v2871_v60 = vld [vmem:[#allocation9 + $0x188] sm:$0xf]  ;;  %v3228_v2 = vld [vmem:[#allocation9 + $0xc] sm:$0xf] }
 0x164   : > { %1306 = vmatpush.bf16.msrb.mxu0 %v2752_v63  ;;  %1335 = vmatpush.bf16.msrb.mxu1 %v2944_v53  ;;  %v2896_v50 = vor.u32 %v3285_v33, %v2895_v56  ;;  %v539_v62 = vmul.f32 %v4174_v0, %v538_v58  ;;  %v2708_v51 = vor.u32 %v3234_v10, %v2705_v34  ;;  %v3279_v63 = vld [vmem:[#allocation9 + $0x19c] sm:$0xf0]  ;;  %v2681_v31 = vld [vmem:[#allocation9 + $0x20] sm:$0xf0]  ;;  %v3276_v53 = vld [vmem:[#allocation9 + $0x18c] sm:$0xf] }
 0x165   : > { %v2900_v44 = vor.u32 %v3282_v35, %v2897_v41  ;;  %v597_v7 = vadd.f32 %v4123_v28, %v576_v39  ;;  %v529_v3 = vmul.f32 %v4184_v38, %v528_v37  ;;  %v4266_v9 = vpack.c.bf16 %v596_v30, %v594_v45  ;;  %v2857_v29 = vld [vmem:[#allocation9 + $0x178] sm:$0xf0]  ;;  %v2831_v56 = vld [vmem:[#allocation9 + $0x130] sm:$0xf]  ;;  %v3268_v10 = vld [vmem:[#allocation9 + $0x144] sm:$0xf0] }
 0x166   : > { %v2680_v58 = vor.u32 %v3231_v57, %v2679_v42  ;;  %v2872_v61 = vor.u32 %v3279_v63, %v2871_v60  ;;  %v543_v11 = vsel %vm4256_vm6, %v4174_v0, %v539_v62  ;;  %v3023_v39 = vld [vmem:[#allocation9 + $0x2b0] sm:$0xf]  ;;  %v3316_v34 = vld [vmem:[#allocation9 + $0x2c4] sm:$0xf0]  ;;  %v2832_v35 = vor.u32 %v3268_v10, %v2831_v56  ;;  %v3265_v30 = vld [vmem:[#allocation9 + $0x134] sm:$0xf] }
 0x167   : > { %1364 = vmatpush.bf16.msrb.mxu2 %v2756_v8  ;;  %1393 = vmatpush.bf16.msrb.mxu3 %v2948_v12  ;;  %v2873_v8 = vld [vmem:[#allocation9 + $0x1a0] sm:$0xf0]  ;;  %v4272_v55 = vpack.c.bf16 %v597_v7, %v595_v46  ;;  %v2684_v12 = vor.u32 %v3228_v2, %v2681_v31  ;;  %v533_v49 = vsel %vm532_vm8, %v4184_v38, %v529_v3  ;;  %v2833_v37 = vld [vmem:[#allocation9 + $0x148] sm:$0xf0]  ;;  %v3313_v45 = vld [vmem:[#allocation9 + $0x2b4] sm:$0xf] }
 0x168   : > { %1307 = vmatpush.bf16.msrb.mxu0 %v2728_v25  ;;  %1336 = vmatpush.bf16.msrb.mxu1 %v2920_v26  ;;  %v2876_v47 = vor.u32 %v3276_v53, %v2873_v8  ;;  %v558_v15 = vmul.f32 %v543_v11, %v4071_v16  ;;  %v559_v52 = vmul.f32 %v543_v11, %v4074_v17  ;;  %v3271_v26 = vld [vmem:[#allocation9 + $0x164] sm:$0xf]  ;;  %v3025_v48 = vld [vmem:[#allocation9 + $0x2c8] sm:$0xf0]  ;;  %v2999_v57 = vld [vmem:[#allocation9 + $0x280] sm:$0xf] }
 0x169   : > { %1199 = vmatmul.bf16.gmra.mxu0 %v4223_v40  ;;  %1228 = vmatmul.bf16.gmra.mxu1 %v4225_v43  ;;  %v556_v0 = vmul.f32 %v533_v49, %v4061_v1  ;;  %v557_v4 = vmul.f32 %v533_v49, %v4064_v13  ;;  %v2855_v13 = vld [vmem:[#allocation9 + $0x160] sm:$0xf]  ;;  %v2860_v54 = vor.u32 %v3271_v26, %v2857_v29  ;;  %v3310_v62 = vld [vmem:[#allocation9 + $0x294] sm:$0xf0]  ;;  %v2809_v60 = vld [vmem:[#allocation9 + $0x118] sm:$0xf0] }
 0x16a   : > { %1257 = vmatmul.bf16.gmra.mxu2 %v4223_v40  ;;  %1286 = vmatmul.bf16.gmra.mxu3 %v4225_v43  ;;  %v579_v23 = vmul.f32 %v4112_v14, %v558_v15  ;;  %v580_v38 = vmul.f32 %v4114_v22, %v559_v52  ;;  %v3024_v41 = vor.u32 %v3316_v34, %v3023_v39  ;;  %v3307_v63 = vld [vmem:[#allocation9 + $0x284] sm:$0xf]  ;;  %v3001_v2 = vld [vmem:[#allocation9 + $0x298] sm:$0xf0]  ;;  %v2783_v8 = vld [vmem:[#allocation9 + $0xd0] sm:$0xf] }
 0x16b   : > { %1365 = vmatpush.bf16.msrb.mxu2 %v2732_v32  ;;  %1394 = vmatpush.bf16.msrb.mxu3 %v2924_v36  ;;  %v577_v18 = vmul.f32 %v4112_v14, %v556_v0  ;;  %v578_v19 = vmul.f32 %v4114_v22, %v557_v4  ;;  %v3274_v14 = vld [vmem:[#allocation9 + $0x174] sm:$0xf0]  ;;  %v3047_v22 = vld [vmem:[#allocation9 + $0x2e0] sm:$0xf]  ;;  %v3319_v32 = vld [vmem:[#allocation9 + $0x2e4] sm:$0xf]  ;;  %v2836_v46 = vor.u32 %v3265_v30, %v2833_v37 }
 0x16c   : > { %1308 = vmatpush.bf16.msrb.mxu0 %v2704_v27  ;;  %1337 = vmatpush.bf16.msrb.mxu1 %v2896_v50  ;;  %v600_v16 = vadd.f32 %v4121_v20, %v579_v23  ;;  %v601_v17 = vadd.f32 %v4123_v28, %v580_v38  ;;  %v3049_v36 = vld [vmem:[#allocation9 + $0x2f8] sm:$0xf0]  ;;  %v2807_v27 = vld [vmem:[#allocation9 + $0x100] sm:$0xf]  ;;  %v3262_v50 = vld [vmem:[#allocation9 + $0x114] sm:$0xf0]  ;;  %v3028_v42 = vor.u32 %v3313_v45, %v3025_v48 }
 0x16d   : > { %v598_v59 = vadd.f32 %v4121_v20, %v577_v18  ;;  %v599_v24 = vadd.f32 %v4123_v28, %v578_v19  ;;  %v2856_v20 = vor.u32 %v3274_v14, %v2855_v13  ;;  %v3322_v28 = vld [vmem:[#allocation9 + $0x2f4] sm:$0xf0]  ;;  %v3052_v33 = vor.u32 %v3319_v32, %v3049_v36  ;;  %v3256_v3 = vld [vmem:[#allocation9 + $0xe4] sm:$0xf0]  ;;  %v3253_v11 = vld [vmem:[#allocation9 + $0xd4] sm:$0xf] }
 0x16e   : > { %v3048_v21 = vor.u32 %v3322_v28, %v3047_v22  ;;  %v3000_v7 = vor.u32 %v3310_v62, %v2999_v57  ;;  %v3004_v53 = vor.u32 %v3307_v63, %v3001_v2  ;;  %v2977_v49 = vld [vmem:[#allocation9 + $0x268] sm:$0xf0]  ;;  %v2784_v15 = vor.u32 %v3256_v3, %v2783_v8  ;;  %v2759_v23 = vld [vmem:[#allocation9 + $0xa0] sm:$0xf]  ;;  %v3250_v38 = vld [vmem:[#allocation9 + $0xb4] sm:$0xf0] }
 0x16f   : > { %1366 = vmatpush.bf16.msrb.mxu2 %v2708_v51  ;;  %1395 = vmatpush.bf16.msrb.mxu3 %v2900_v44  ;;  %v4294_v25 = vpack.c.bf16 %v600_v16, %v598_v59  ;;  %v4296_v1 = vpack.c.bf16 %v601_v17, %v599_v24  ;;  %v3259_v51 = vld [vmem:[#allocation9 + $0x104] sm:$0xf]  ;;  %v2808_v44 = vor.u32 %v3262_v50, %v2807_v27  ;;  %v2951_v18 = vld [vmem:[#allocation9 + $0x220] sm:$0xf]  ;;  %v3298_v16 = vld [vmem:[#allocation9 + $0x234] sm:$0xf0] }
 0x170   : > { %1309 = vmatpush.bf16.msrb.mxu0 %v2680_v58  ;;  %1338 = vmatpush.bf16.msrb.mxu1 %v2872_v61  ;;  %v2812_v31 = vor.u32 %v3259_v51, %v2809_v60  ;;  %v2975_v58 = vld [vmem:[#allocation9 + $0x250] sm:$0xf]  ;;  %v3304_v61 = vld [vmem:[#allocation9 + $0x264] sm:$0xf0]  ;;  %v2760_v19 = vor.u32 %v3250_v38, %v2759_v23  ;;  %v3247_v17 = vld [vmem:[#allocation9 + $0xa4] sm:$0xf]  ;;  %v2952_v24 = vor.u32 %v3298_v16, %v2951_v18 }
 0x171   : > { %v2976_v52 = vor.u32 %v3304_v61, %v2975_v58  ;;  %v2761_v59 = vld [vmem:[#allocation9 + $0xb8] sm:$0xf0]  ;;  %v3295_v14 = vld [vmem:[#allocation9 + $0x224] sm:$0xf]  ;;  %v3244_v26 = vld [vmem:[#allocation9 + $0x84] sm:$0xf0] }
 0x172   : > { %v2764_v13 = vor.u32 %v3247_v17, %v2761_v59  ;;  %v2953_v22 = vld [vmem:[#allocation9 + $0x238] sm:$0xf0]  ;;  %v2927_v29 = vld [vmem:[#allocation9 + $0x1f0] sm:$0xf]  ;;  %v2737_v32 = vld [vmem:[#allocation9 + $0x88] sm:$0xf0] }
 0x173   : > { %1367 = vmatpush.bf16.msrb.mxu2 %v2684_v12  ;;  %1396 = vmatpush.bf16.msrb.mxu3 %v2876_v47  ;;  %v2785_v12 = vld [vmem:[#allocation9 + $0xe8] sm:$0xf0]  ;;  %v3301_v47 = vld [vmem:[#allocation9 + $0x254] sm:$0xf]  ;;  %v2956_v28 = vor.u32 %v3295_v14, %v2953_v22  ;;  %v2711_v39 = vld [vmem:[#allocation9 + $0x40] sm:$0xf] }
 0x174   : > { %1418 = vmatpush.bf16.msra.mxu0 %v2856_v20  ;;  %1447 = vmatpush.bf16.msra.mxu1 %v3048_v21  ;;  %v2788_v0 = vor.u32 %v3253_v11, %v2785_v12  ;;  %v2980_v4 = vor.u32 %v3301_v47, %v2977_v49  ;;  %v2735_v20 = vld [vmem:[#allocation9 + $0x70] sm:$0xf]  ;;  %v3292_v21 = vld [vmem:[#allocation9 + $0x204] sm:$0xf0]  ;;  %v3289_v36 = vld [vmem:[#allocation9 + $0x1f4] sm:$0xf] }
 0x175   : > { %v2736_v56 = vor.u32 %v3244_v26, %v2735_v20  ;;  %v2929_v10 = vld [vmem:[#allocation9 + $0x208] sm:$0xf0]  ;;  %v3238_v34 = vld [vmem:[#allocation9 + $0x54] sm:$0xf0]  ;;  %v2903_v30 = vld [vmem:[#allocation9 + $0x1c0] sm:$0xf] }
 0x176   : > { %v3286_v37 = vld [vmem:[#allocation9 + $0x1d4] sm:$0xf0]  ;;  %v3235_v45 = vld [vmem:[#allocation9 + $0x44] sm:$0xf]  ;;  %v2905_v27 = vld [vmem:[#allocation9 + $0x1d8] sm:$0xf0]  ;;  %v2712_v50 = vor.u32 %v3238_v34, %v2711_v39 }
 0x177   : > { %1476 = vmatpush.bf16.msra.mxu2 %v2860_v54  ;;  %1505 = vmatpush.bf16.msra.mxu3 %v3052_v33  ;;  %v3241_v54 = vld [vmem:[#allocation9 + $0x74] sm:$0xf]  ;;  %v2928_v33 = vor.u32 %v3292_v21, %v2927_v29  ;;  %v3283_v48 = vld [vmem:[#allocation9 + $0x1c4] sm:$0xf]  ;;  %v2687_v51 = vld [vmem:[#allocation9 + $0x10] sm:$0xf] }
 0x178   : > { %1419 = vmatpush.bf16.msra.mxu0 %v2832_v35  ;;  %1448 = vmatpush.bf16.msra.mxu1 %v3024_v41  ;;  %v2740_v35 = vor.u32 %v3241_v54, %v2737_v32  ;;  %v2932_v41 = vor.u32 %v3289_v36, %v2929_v10  ;;  %v2908_v62 = vor.u32 %v3283_v48, %v2905_v27  ;;  %v2879_v60 = vld [vmem:[#allocation9 + $0x190] sm:$0xf]  ;;  %v3280_v2 = vld [vmem:[#allocation9 + $0x1a4] sm:$0xf0]  ;;  %v3277_v3 = vld [vmem:[#allocation9 + $0x194] sm:$0xf] }
 0x179   : > { %1204 = vmatmul.bf16.gmra.mxu0 %v4266_v9  ;;  %1233 = vmatmul.bf16.gmra.mxu1 %v4272_v55  ;;  %v2881_v58 = vld [vmem:[#allocation9 + $0x1a8] sm:$0xf0] }
 0x17a   : > { %1262 = vmatmul.bf16.gmra.mxu2 %v4266_v9  ;;  %1291 = vmatmul.bf16.gmra.mxu3 %v4272_v55  ;;  %v2884_v61 = vor.u32 %v3277_v3, %v2881_v58 }
 0x17b   : > { %1477 = vmatpush.bf16.msra.mxu2 %v2836_v46  ;;  %1506 = vmatpush.bf16.msra.mxu3 %v3028_v42  ;;  %v2713_v46 = vld [vmem:[#allocation9 + $0x58] sm:$0xf0]  ;;  %v2904_v42 = vor.u32 %v3286_v37, %v2903_v30 }
 0x17c   : > { %1420 = vmatpush.bf16.msra.mxu0 %v2808_v44  ;;  %1449 = vmatpush.bf16.msra.mxu1 %v3000_v7  ;;  %v2716_v57 = vor.u32 %v3235_v45, %v2713_v46  ;;  %v3232_v44 = vld [vmem:[#allocation9 + $0x24] sm:$0xf0]  ;;  %v3229_v7 = vld [vmem:[#allocation9 + $0x14] sm:$0xf] }
 0x17d   : > { %v2688_v63 = vor.u32 %v3232_v44, %v2687_v51 }
 0x17f   : > { %1478 = vmatpush.bf16.msra.mxu2 %v2812_v31  ;;  %1507 = vmatpush.bf16.msra.mxu3 %v3004_v53  ;;  %v2689_v31 = vld [vmem:[#allocation9 + $0x28] sm:$0xf0]  ;;  %v2880_v53 = vor.u32 %v3280_v2, %v2879_v60 }
 0x180   : > { %1421 = vmatpush.bf16.msra.mxu0 %v2784_v15  ;;  %1450 = vmatpush.bf16.msra.mxu1 %v2976_v52  ;;  %v2692_v8 = vor.u32 %v3229_v7, %v2689_v31 }
 0x183   : > { %1479 = vmatpush.bf16.msra.mxu2 %v2788_v0  ;;  %1508 = vmatpush.bf16.msra.mxu3 %v2980_v4 }
 0x184   : > { %1422 = vmatpush.bf16.msra.mxu0 %v2760_v19  ;;  %1451 = vmatpush.bf16.msra.mxu1 %v2952_v24 }
 0x187   : > { %1480 = vmatpush.bf16.msra.mxu2 %v2764_v13  ;;  %1509 = vmatpush.bf16.msra.mxu3 %v2956_v28 }
 0x188   : > { %1423 = vmatpush.bf16.msra.mxu0 %v2736_v56  ;;  %1452 = vmatpush.bf16.msra.mxu1 %v2928_v33 }
 0x189   : > { %1209 = vmatmul.bf16.gmra.mxu0 %v4294_v25  ;;  %1238 = vmatmul.bf16.gmra.mxu1 %v4296_v1 }
 0x18a   : > { %1267 = vmatmul.bf16.gmra.mxu2 %v4294_v25  ;;  %1296 = vmatmul.bf16.gmra.mxu3 %v4296_v1 }
 0x18b   : > { %1481 = vmatpush.bf16.msra.mxu2 %v2740_v35  ;;  %1510 = vmatpush.bf16.msra.mxu3 %v2932_v41 }
 0x18c   : > { %1424 = vmatpush.bf16.msra.mxu0 %v2712_v50  ;;  %1453 = vmatpush.bf16.msra.mxu1 %v2904_v42 }
 0x18f   : > { %1482 = vmatpush.bf16.msra.mxu2 %v2716_v57  ;;  %1511 = vmatpush.bf16.msra.mxu3 %v2908_v62 }
 0x190   : > { %1425 = vmatpush.bf16.msra.mxu0 %v2688_v63  ;;  %1454 = vmatpush.bf16.msra.mxu1 %v2880_v53 }
 0x193   : > { %1483 = vmatpush.bf16.msra.mxu2 %v2692_v8  ;;  %1512 = vmatpush.bf16.msra.mxu3 %v2884_v61 }
 0x199   : > { %1310 = vmatmul.bf16.vlgmr.msrb.gmra.mxu0 %v4161_v5  ;;  %1339 = vmatmul.bf16.vlgmr.msrb.gmra.mxu1 %v4163_v6 }
 0x19a   : > { %1368 = vmatmul.bf16.vlgmr.msrb.gmra.mxu2 %v4161_v5  ;;  %1397 = vmatmul.bf16.vlgmr.msrb.gmra.mxu3 %v4163_v6 }
 0x1a9   : > { %1315 = vmatmul.bf16.gmra.mxu0 %v4223_v40  ;;  %1344 = vmatmul.bf16.gmra.mxu1 %v4225_v43 }
 0x1aa   : > { %1373 = vmatmul.bf16.gmra.mxu2 %v4223_v40  ;;  %1402 = vmatmul.bf16.gmra.mxu3 %v4225_v43 }
 0x1b9   : > { %1320 = vmatmul.bf16.gmra.mxu0 %v4266_v9  ;;  %1349 = vmatmul.bf16.gmra.mxu1 %v4272_v55 }
 0x1ba   : > { %1378 = vmatmul.bf16.gmra.mxu2 %v4266_v9  ;;  %1407 = vmatmul.bf16.gmra.mxu3 %v4272_v55 }
 0x1c9   : > { %1325 = vmatmul.bf16.gmra.mxu0 %v4294_v25  ;;  %1354 = vmatmul.bf16.gmra.mxu1 %v4296_v1 }
 0x1ca   : > { %1383 = vmatmul.bf16.gmra.mxu2 %v4294_v25  ;;  %1412 = vmatmul.bf16.gmra.mxu3 %v4296_v1 }
 0x1d6   : > { %v1195_v11 = vpop.f32.mrf.mxu0  ;;  %v1224_v12 = vpop.f32.mrf.mxu1 }
 0x1d7   : > { %v4318_v47 = vadd.f32 %v1224_v12, %v1195_v11 }
 0x1d9   : > { %1426 = vmatmul.bf16.vlgmr.msra.gmra.mxu0 %v4161_v5  ;;  %1455 = vmatmul.bf16.vlgmr.msra.gmra.mxu1 %v4163_v6 }
 0x1da   : > { %1484 = vmatmul.bf16.vlgmr.msra.gmra.mxu2 %v4161_v5  ;;  %1513 = vmatmul.bf16.vlgmr.msra.gmra.mxu3 %v4163_v6 }
 0x1dd   : > { %v1253_v49 = vpop.f32.mrf.mxu2  ;;  %v1282_v15 = vpop.f32.mrf.mxu3 }
 0x1de   : > { %v4324_v52 = vadd.f32 %v1282_v15, %v1253_v49  ;;  %v4326_v0 = vpop.f32.mrf.mxu0  ;;  %v4328_v4 = vpop.f32.mrf.mxu1 }
 0x1e5   : > { %v4330_v23 = vpop.f32.mrf.mxu2  ;;  %v4332_v38 = vpop.f32.mrf.mxu3 }
 0x1e6   : > { %v1200_v18 = vpop.f32.mrf.mxu0  ;;  %v1229_v19 = vpop.f32.mrf.mxu1 }
 0x1e7   : > { %v4334_v16 = vadd.f32 %v1229_v19, %v1200_v18 }
 0x1e9   : > { %1431 = vmatmul.bf16.gmra.mxu0 %v4223_v40  ;;  %1460 = vmatmul.bf16.gmra.mxu1 %v4225_v43 }
 0x1ea   : > { %1489 = vmatmul.bf16.gmra.mxu2 %v4223_v40  ;;  %1518 = vmatmul.bf16.gmra.mxu3 %v4225_v43 }
 0x1ed   : > { %v1258_v5 = vpop.f32.mrf.mxu2  ;;  %v1287_v6 = vpop.f32.mrf.mxu3 }
 0x1ee   : > { %v4340_v17 = vadd.f32 %v1287_v6, %v1258_v5  ;;  %v4342_v59 = vpop.f32.mrf.mxu0  ;;  %v4344_v24 = vpop.f32.mrf.mxu1 }
 0x1f5   : > { %v4346_v13 = vpop.f32.mrf.mxu2  ;;  %v4348_v14 = vpop.f32.mrf.mxu3 }
 0x1f6   : > { %v1205_v22 = vpop.f32.mrf.mxu0  ;;  %v1234_v20 = vpop.f32.mrf.mxu1 }
 0x1f7   : > { %v4350_v28 = vadd.f32 %v1234_v20, %v1205_v22 }
 0x1f9   : > { %1436 = vmatmul.bf16.gmra.mxu0 %v4266_v9  ;;  %1465 = vmatmul.bf16.gmra.mxu1 %v4272_v55 }
 0x1fa   : > { %1494 = vmatmul.bf16.gmra.mxu2 %v4266_v9  ;;  %1523 = vmatmul.bf16.gmra.mxu3 %v4272_v55 }
 0x1fd   : > { %v1263_v40 = vpop.f32.mrf.mxu2  ;;  %v1292_v43 = vpop.f32.mrf.mxu3 }
 0x1fe   : > { %v4356_v26 = vadd.f32 %v1292_v43, %v1263_v40  ;;  %v4358_v29 = vpop.f32.mrf.mxu0  ;;  %v4360_v21 = vpop.f32.mrf.mxu1 }
 0x205   : > { %v4362_v54 = vpop.f32.mrf.mxu2  ;;  %v4364_v32 = vpop.f32.mrf.mxu3 }
 0x206   : > { %v1210_v36 = vpop.f32.mrf.mxu0  ;;  %v1239_v56 = vpop.f32.mrf.mxu1 }
 0x207   : > { %v4366_v33 = vadd.f32 %v1239_v56, %v1210_v36 }
 0x209   : > { %4738 = vst [vmem:[#allocation17_spill] sm:$0xff] %v4366_v33  ;;  %1441 = vmatmul.bf16.gmra.mxu0 %v4294_v25  ;;  %1470 = vmatmul.bf16.gmra.mxu1 %v4296_v1 }
 0x20a   : > { %1499 = vmatmul.bf16.gmra.mxu2 %v4294_v25  ;;  %1528 = vmatmul.bf16.gmra.mxu3 %v4296_v1 }
 0x20d   : > { %v1268_v9 = vpop.f32.mrf.mxu2  ;;  %v1297_v55 = vpop.f32.mrf.mxu3 }
 0x20e   : > { %v4372_v10 = vadd.f32 %v1297_v55, %v1268_v9  ;;  %v4374_v39 = vpop.f32.mrf.mxu0  ;;  %v4376_v34 = vpop.f32.mrf.mxu1 }
 0x20f   : > { %4740 = vst [vmem:[#allocation19_spill] sm:$0xff] %v4376_v34 }
 0x210   : > { %4739 = vst [vmem:[#allocation18_spill] sm:$0xff] %v4372_v10 }
 0x215   : > { %v4378_v35 = vpop.f32.mrf.mxu2  ;;  %v4380_v41 = vpop.f32.mrf.mxu3 }
 0x216   : > { %4741 = vst [vmem:[#allocation20_spill] sm:$0xff] %v4378_v35  ;;  %v1311_v30 = vpop.f32.mrf.mxu0  ;;  %v1340_v37 = vpop.f32.mrf.mxu1 }
 0x217   : > { %4742 = vst [vmem:[#allocation21_spill] sm:$0xff] %v4380_v41  ;;  %v4382_v45 = vadd.f32 %v1340_v37, %v1311_v30 }
 0x21d   : > { %v1369_v46 = vpop.f32.mrf.mxu2  ;;  %v1398_v25 = vpop.f32.mrf.mxu3 }
 0x21e   : > { %v4384_v48 = vadd.f32 %v1398_v25, %v1369_v46  ;;  %v4386_v1 = vpop.f32.mrf.mxu0  ;;  %v4388_v27 = vpop.f32.mrf.mxu1 }
 0x225   : > { %v4390_v50 = vpop.f32.mrf.mxu2  ;;  %v4392_v42 = vpop.f32.mrf.mxu3 }
 0x226   : > { %v1316_v57 = vpop.f32.mrf.mxu0  ;;  %v1345_v62 = vpop.f32.mrf.mxu1 }
 0x22d   : > { %v4394_v51 = vpop.f32.mrf.mxu2  ;;  %v4396_v44 = vpop.f32.mrf.mxu3 }
 0x22e   : > { %v1318_v60 = vpop.f32.mrf.mxu0  ;;  %v1347_v63 = vpop.f32.mrf.mxu1 }
 0x235   : > { %v1376_v2 = vpop.f32.mrf.mxu2  ;;  %v1405_v7 = vpop.f32.mrf.mxu3 }
 0x236   : > { %v1321_v31 = vpop.f32.mrf.mxu0  ;;  %v1350_v53 = vpop.f32.mrf.mxu1 }
 0x237   : > { %v1351_v9 = vadd.f32 %v1350_v53, %v1321_v31 }
 0x23d   : > { %v1379_v8 = vpop.f32.mrf.mxu2  ;;  %v1408_v3 = vpop.f32.mrf.mxu3 }
 0x23e   : > { %v1323_v58 = vpop.f32.mrf.mxu0  ;;  %v1352_v61 = vpop.f32.mrf.mxu1 }
 0x23f   : > { %v1353_v43 = vadd.f32 %v1352_v61, %v1323_v58  ;;  %v1348_v58 = vadd.f32 %v1347_v63, %v1318_v60 }
 0x241   : > { %v1547_v37 = vpack.c.bf16 %v1353_v43, %v1353_v43  ;;  %v1545_v43 = vpack.c.bf16 %v1348_v58, %v1348_v58 }
 0x243   : > { %v1595_v61 = vunpack.c.l.b16 %v1547_v37 }
 0x245   : > { %v1381_v11 = vpop.f32.mrf.mxu2  ;;  %v1410_v12 = vpop.f32.mrf.mxu3 }
 0x246   : > { %v1326_v49 = vpop.f32.mrf.mxu0  ;;  %v1355_v15 = vpop.f32.mrf.mxu1 }
 0x247   : > { %v1356_v18 = vadd.f32 %v1355_v15, %v1326_v49  ;;  %v1546_v15 = vpack.c.bf16 %v1351_v9, %v1351_v9 }
 0x249   : > { %v1548_v20 = vpack.c.bf16 %v1356_v18, %v1356_v18  ;;  %v1411_v18 = vadd.f32 %v1410_v12, %v1381_v11 }
 0x24b   : > { %v1596_v55 = vunpack.c.l.b16 %v1548_v20  ;;  %v1846_v20 = vpack.c.bf16 %v1411_v18, %v1411_v18 }
 0x24d   : > { %v1384_v19 = vpop.f32.mrf.mxu2  ;;  %v1413_v5 = vpop.f32.mrf.mxu3  ;;  %v1894_v63 = vunpack.c.l.b16 %v1846_v20 }
 0x24e   : > { %v1328_v6 = vpop.f32.mrf.mxu0  ;;  %v1357_v22 = vpop.f32.mrf.mxu1  ;;  %v1414_v56 = vadd.f32 %v1413_v5, %v1384_v19  ;;  %v1409_v19 = vadd.f32 %v1408_v3, %v1379_v8  ;;  %v1346_v5 = vadd.f32 %v1345_v62, %v1316_v57  ;;  %v1343_v57 = vadd.f32 %v4388_v27, %v4386_v1 }
 0x24f   : > { %v1358_v40 = vadd.f32 %v1357_v22, %v1328_v6  ;;  %v1594_v22 = vunpack.c.l.b16 %v1546_v15  ;;  %v1593_v62 = vunpack.c.l.b16 %v1545_v43  ;;  %v1404_v8 = vadd.f32 %v4396_v44, %v4394_v51 }
 0x250   : > { %v1847_v41 = vpack.c.bf16 %v1414_v56, %v1414_v56  ;;  %v1544_v60 = vpack.c.bf16 %v1346_v5, %v1346_v5  ;;  %v1543_v37 = vpack.c.bf16 %v1343_v57, %v1343_v57  ;;  %v1542_v1 = vpack.c.bf16 %v4382_v45, %v4382_v45 }
 0x251   : > { %v1549_v36 = vpack.c.bf16 %v1358_v40, %v1358_v40  ;;  %v1600_v56 = vpack.c.b16 %v1595_v61, %v1594_v22  ;;  %v1843_v15 = vpack.c.bf16 %v1404_v8, %v1404_v8  ;;  %v1227_v27 = vadd.f32 %v4328_v4, %v4326_v0 }
 0x252   : > { %v1895_v31 = vunpack.c.l.b16 %v1847_v41  ;;  %v1406_v41 = vadd.f32 %v1405_v7, %v1376_v2  ;;  %v1592_v11 = vunpack.c.l.b16 %v1544_v60  ;;  %v1401_v51 = vadd.f32 %v4392_v42, %v4390_v50 }
 0x253   : > { %v1597_v30 = vunpack.c.l.b16 %v1549_v36  ;;  %v1591_v18 = vunpack.c.l.b16 %v1543_v37  ;;  %v1590_v58 = vunpack.c.l.b16 %v1542_v1  ;;  %v1535_v61 = vpack.c.bf16 %v1227_v27, %v1227_v27 }
 0x254   : > { %v1844_v12 = vpack.c.bf16 %v1406_v41, %v1406_v41  ;;  %v1534_v45 = vpack.c.bf16 %v4318_v47, %v4318_v47  ;;  %v1841_v0 = vpack.c.bf16 %v4384_v48, %v4384_v48  ;;  %v1285_v42 = vadd.f32 %v4332_v38, %v4330_v23 }
 0x255   : > { %v1601_v46 = vpack.c.b16 %v1597_v30, %v1596_v55  ;;  %v1386_v25 = vpop.f32.mrf.mxu2  ;;  %v1415_v10 = vpop.f32.mrf.mxu3  ;;  %v1845_v55 = vpack.c.bf16 %v1409_v19, %v1409_v19  ;;  %v1842_v19 = vpack.c.bf16 %v1401_v51, %v1401_v51  ;;  %v1598_v22 = vpack.c.b16 %v1591_v18, %v1590_v58 }
 0x256   : > { %v1416_v35 = vadd.f32 %v1415_v10, %v1386_v25  ;;  %v1427_v33 = vpop.f32.mrf.mxu0  ;;  %v1456_v49 = vpop.f32.mrf.mxu1  ;;  %v1892_v44 = vunpack.c.l.b16 %v1844_v12  ;;  %v1567_v20 = vunpack.c.l.b16 %v1535_v61  ;;  %v1566_v43 = vunpack.c.l.b16 %v1534_v45 }
 0x257   : > { %v4398_v34 = vadd.f32 %v1456_v49, %v1427_v33  ;;  %1610 = vmatpush.bf16.xpose.msrb.mxu0 %v1601_v46  ;;  %v1893_v3 = vunpack.c.l.b16 %v1845_v55  ;;  %v1599_v49 = vpack.c.b16 %v1593_v62, %v1592_v11  ;;  %v1833_v47 = vpack.c.bf16 %v4324_v52, %v4324_v52 }
 0x258   : > { %v1848_v6 = vpack.c.bf16 %v1416_v35, %v1416_v35  ;;  %v1232_v38 = vadd.f32 %v4344_v24, %v4342_v59  ;;  %v1536_v52 = vpack.c.bf16 %v4334_v16, %v4334_v16  ;;  %v1290_v37 = vadd.f32 %v4348_v14, %v4346_v13 }
 0x259   : > { %v1899_v30 = vpack.c.b16 %v1894_v63, %v1893_v3  ;;  %v1865_v57 = vunpack.c.l.b16 %v1833_v47  ;;  %v1835_v59 = vpack.c.bf16 %v4340_v17, %v4340_v17  ;;  %v1237_v16 = vadd.f32 %v4360_v21, %v4358_v29 }
 0x25a   : > { %v1896_v53 = vunpack.c.l.b16 %v1848_v6  ;;  %v1891_v6 = vunpack.c.l.b16 %v1843_v15  ;;  %v1537_v8 = vpack.c.bf16 %v1232_v38, %v1232_v38  ;;  %v1568_v15 = vunpack.c.l.b16 %v1536_v52 }
 0x25b   : > { %v1836_v1 = vpack.c.bf16 %v1290_v37, %v1290_v37  ;;  %v1867_v58 = vunpack.c.l.b16 %v1835_v59  ;;  %v1539_v13 = vpack.c.bf16 %v1237_v16, %v1237_v16  ;;  %v1538_v17 = vpack.c.bf16 %v4350_v28, %v4350_v28 }
 0x25c   : > { %v1900_v40 = vpack.c.b16 %v1896_v53, %v1895_v31  ;;  %v1898_v31 = vpack.c.b16 %v1892_v44, %v1891_v6  ;;  %v1295_v45 = vadd.f32 %v4364_v32, %v4362_v54  ;;  %v1837_v54 = vpack.c.bf16 %v4356_v26, %v4356_v26 }
 0x25d   : > { %v1485_v36 = vpop.f32.mrf.mxu2  ;;  %v1514_v10 = vpop.f32.mrf.mxu3  ;;  %v1868_v6 = vunpack.c.l.b16 %v1836_v1  ;;  %v1571_v29 = vunpack.c.l.b16 %v1539_v13 }
 0x25e   : > { %v4400_v9 = vadd.f32 %v1514_v10, %v1485_v36  ;;  %1909 = vmatpush.bf16.xpose.msrb.mxu2 %v1900_v40  ;;  %v4402_v33 = vpop.f32.mrf.mxu0  ;;  %v4404_v35 = vpop.f32.mrf.mxu1  ;;  %v1890_v40 = vunpack.c.l.b16 %v1842_v19  ;;  %v1889_v36 = vunpack.c.l.b16 %v1841_v0  ;;  %v1834_v10 = vpack.c.bf16 %v1285_v42, %v1285_v42 }
 0x25f   : > { %1611 = vmatpush.bf16.xpose.msrb.mxu0 %v1600_v56  ;;  %v1574_v56 = vpack.c.b16 %v1567_v20, %v1566_v43  ;;  %v1874_v19 = vpack.c.b16 %v1868_v6, %v1867_v58 }
 0x260   : > { %v1897_v55 = vpack.c.b16 %v1890_v40, %v1889_v36  ;;  %v1866_v23 = vunpack.c.l.b16 %v1834_v10 }
 0x262   : > { %v1873_v62 = vpack.c.b16 %v1866_v23, %v1865_v57 }
 0x265   : > { %v4410_v46 = vpop.f32.mrf.mxu2  ;;  %v4412_v25 = vpop.f32.mrf.mxu3 }
 0x266   : > { %1910 = vmatpush.bf16.xpose.msrb.mxu2 %v1899_v30  ;;  %v4414_v2 = vpop.f32.mrf.mxu0  ;;  %v4416_v7 = vpop.f32.mrf.mxu1 }
 0x267   : > { %1612 = vmatpush.bf16.xpose.msrb.mxu0 %v1599_v49  ;;  %v1569_v49 = vunpack.c.l.b16 %v1537_v8  ;;  %v1462_v23 = vadd.f32 %v4416_v7, %v4414_v2  ;;  %v4743_v7 = vld [vmem:[#allocation19_spill] sm:$0xff] }
 0x269   : > { %v1575_v27 = vpack.c.b16 %v1569_v49, %v1568_v15  ;;  %v1242_v49 = vadd.f32 %v4743_v7, %v4374_v39  ;;  %v1552_v15 = vpack.c.bf16 %v1462_v23, %v1462_v23  ;;  %v1550_v39 = vpack.c.bf16 %v4398_v34, %v4398_v34  ;;  %v4746_v34 = vld [vmem:[#allocation21_spill] sm:$0xff] }
 0x26b   : > { %v1541_v6 = vpack.c.bf16 %v1242_v49, %v1242_v49  ;;  %v1762_v16 = vunpack.c.l.b16 %v1552_v15 }
 0x26d   : > { %v4424_v53 = vpop.f32.mrf.mxu2  ;;  %v4426_v5 = vpop.f32.mrf.mxu3 }
 0x26e   : > { %1911 = vmatpush.bf16.xpose.msrb.mxu2 %v1898_v31  ;;  %v1434_v4 = vpop.f32.mrf.mxu0  ;;  %v1463_v50 = vpop.f32.mrf.mxu1 }
 0x26f   : > { %1613 = vmatpush.bf16.xpose.msrb.mxu0 %v1598_v22  ;;  %v1464_v21 = vadd.f32 %v1463_v50, %v1434_v4 }
 0x271   : > { %v1553_v4 = vpack.c.bf16 %v1464_v21, %v1464_v21 }
 0x275   : > { %v4436_v60 = vpop.f32.mrf.mxu2  ;;  %v4438_v48 = vpop.f32.mrf.mxu3 }
 0x276   : > { %1912 = vmatpush.bf16.xpose.msrb.mxu2 %v1897_v55  ;;  %v1437_v41 = vpop.f32.mrf.mxu0  ;;  %v1466_v63 = vpop.f32.mrf.mxu1  ;;  %1614 = vmatmul.bf16.vlgmr.msrb.gmra.mxu0 %v1574_v56  ;;  %v1570_v56 = vunpack.c.l.b16 %v1538_v17  ;;  %v1838_v55 = vpack.c.bf16 %v1295_v45, %v1295_v45  ;;  %v1522_v1 = vadd.f32 %v4438_v48, %v4436_v60  ;;  %v1517_v60 = vadd.f32 %v4412_v25, %v4410_v46  ;;  %v4745_v17 = vld [vmem:[#allocation20_spill] sm:$0xff] }
 0x277   : > { %v1467_v20 = vadd.f32 %v1466_v63, %v1437_v41  ;;  %v1459_v63 = vadd.f32 %v4404_v35, %v4402_v33  ;;  %v1300_v45 = vadd.f32 %v4746_v34, %v4745_v17 }
 0x278   : > { %v1576_v41 = vpack.c.b16 %v1571_v29, %v1570_v56  ;;  %v1870_v2 = vunpack.c.l.b16 %v1838_v55  ;;  %v1852_v48 = vpack.c.bf16 %v1522_v1, %v1522_v1  ;;  %v1849_v29 = vpack.c.bf16 %v4400_v9, %v4400_v9 }
 0x279   : > { %v1554_v38 = vpack.c.bf16 %v1467_v20, %v1467_v20  ;;  %v1551_v59 = vpack.c.bf16 %v1459_v63, %v1459_v63  ;;  %v1850_v20 = vpack.c.bf16 %v1517_v60, %v1517_v60 }
 0x27a   : > { %v2061_v46 = vunpack.c.l.b16 %v1852_v48 }
 0x27b   : > { %v1764_v26 = vunpack.c.l.b16 %v1554_v38  ;;  %v1761_v13 = vunpack.c.l.b16 %v1551_v59  ;;  %v2058_v38 = vunpack.c.l.b16 %v1849_v29 }
 0x27d   : > { %v1495_v3 = vpop.f32.mrf.mxu2  ;;  %v1524_v11 = vpop.f32.mrf.mxu3  ;;  %1913 = vmatmul.bf16.vlgmr.msrb.gmra.mxu2 %v1873_v62 }
 0x27e   : > { %v1439_v12 = vpop.f32.mrf.mxu0  ;;  %v1468_v30 = vpop.f32.mrf.mxu1 }
 0x27f   : > { %v1469_v14 = vadd.f32 %v1468_v30, %v1439_v12  ;;  %v1525_v12 = vadd.f32 %v1524_v11, %v1495_v3  ;;  %v1520_v3 = vadd.f32 %v4426_v5, %v4424_v53  ;;  %v4744_v53 = vld [vmem:[#allocation17_spill] sm:$0xff] }
 0x280   : > { %v1540_v5 = vpack.c.bf16 %v4744_v53, %v4744_v53 }
 0x281   : > { %v1555_v36 = vpack.c.bf16 %v1469_v14, %v1469_v14  ;;  %v1853_v11 = vpack.c.bf16 %v1525_v12, %v1525_v12 }
 0x283   : > { %v1765_v50 = vunpack.c.l.b16 %v1555_v36  ;;  %v1840_v36 = vpack.c.bf16 %v1300_v45, %v1300_v45 }
 0x285   : > { %v1497_v24 = vpop.f32.mrf.mxu2  ;;  %v1526_v51 = vpop.f32.mrf.mxu3 }
 0x286   : > { %v1442_v44 = vpop.f32.mrf.mxu0  ;;  %v1471_v18 = vpop.f32.mrf.mxu1  ;;  %1619 = vmatmul.bf16.gmra.mxu0 %v1575_v27  ;;  %v1527_v32 = vadd.f32 %v1526_v51, %v1497_v24  ;;  %v1869_v27 = vunpack.c.l.b16 %v1837_v54  ;;  %v1763_v24 = vunpack.c.l.b16 %v1553_v4  ;;  %v1770_v51 = vpack.c.b16 %v1765_v50, %v1764_v26 }
 0x287   : > { %v1472_v61 = vadd.f32 %v1471_v18, %v1442_v44 }
 0x288   : > { %v1854_v33 = vpack.c.bf16 %v1527_v32, %v1527_v32  ;;  %v1875_v58 = vpack.c.b16 %v1870_v2, %v1869_v27  ;;  %v1769_v14 = vpack.c.b16 %v1763_v24, %v1762_v16 }
 0x289   : > { %v1556_v40 = vpack.c.bf16 %v1472_v61, %v1472_v61 }
 0x28a   : > { %v2063_v61 = vunpack.c.l.b16 %v1854_v33 }
 0x28b   : > { %v1766_v28 = vunpack.c.l.b16 %v1556_v40 }
 0x28d   : > { %v1500_v31 = vpop.f32.mrf.mxu2  ;;  %v1529_v22 = vpop.f32.mrf.mxu3  ;;  %1918 = vmatmul.bf16.gmra.mxu2 %v1874_v19 }
 0x28e   : > { %v1444_v0 = vpop.f32.mrf.mxu0  ;;  %v1473_v42 = vpop.f32.mrf.mxu1  ;;  %v1530_v47 = vadd.f32 %v1529_v22, %v1500_v31  ;;  %v1851_v31 = vpack.c.bf16 %v1520_v3, %v1520_v3  ;;  %v2062_v22 = vunpack.c.l.b16 %v1853_v11 }
 0x28f   : > { %v1474_v43 = vadd.f32 %v1473_v42, %v1444_v0  ;;  %v1760_v0 = vunpack.c.l.b16 %v1550_v39  ;;  %v1573_v42 = vunpack.c.l.b16 %v1541_v6 }
 0x290   : > { %v1855_v30 = vpack.c.bf16 %v1530_v47, %v1530_v47  ;;  %v2068_v25 = vpack.c.b16 %v2063_v61, %v2062_v22  ;;  %v2060_v21 = vunpack.c.l.b16 %v1851_v31  ;;  %v4747_v47 = vld [vmem:[#allocation18_spill] sm:$0xff] }
 0x291   : > { %v1557_v10 = vpack.c.bf16 %v1474_v43, %v1474_v43  ;;  %v1768_v40 = vpack.c.b16 %v1761_v13, %v1760_v0  ;;  %v1572_v43 = vunpack.c.l.b16 %v1540_v5  ;;  %v1839_v23 = vpack.c.bf16 %v4747_v47, %v4747_v47 }
 0x292   : > { %v2064_v44 = vunpack.c.l.b16 %v1855_v30  ;;  %v2067_v56 = vpack.c.b16 %v2061_v46, %v2060_v21 }
 0x293   : > { %v1767_v57 = vunpack.c.l.b16 %v1557_v10  ;;  %v2059_v10 = vunpack.c.l.b16 %v1850_v20  ;;  %v1577_v55 = vpack.c.b16 %v1573_v42, %v1572_v43  ;;  %v1871_v54 = vunpack.c.l.b16 %v1839_v23 }
 0x295   : > { %v1771_v62 = vpack.c.b16 %v1767_v57, %v1766_v28  ;;  %v1502_v8 = vpop.f32.mrf.mxu2  ;;  %v1531_v52 = vpop.f32.mrf.mxu3  ;;  %v1872_v28 = vunpack.c.l.b16 %v1840_v36  ;;  %v2066_v57 = vpack.c.b16 %v2059_v10, %v2058_v38 }
 0x296   : > { %v1532_v37 = vadd.f32 %v1531_v52, %v1502_v8  ;;  %1624 = vmatmul.bf16.gmra.mxu0 %v1576_v41 }
 0x297   : > { %1792 = vmatpush.bf16.msrb.mxu1 %v1771_v62  ;;  %v1876_v32 = vpack.c.b16 %v1872_v28, %v1871_v54 }
 0x298   : > { %v1856_v35 = vpack.c.bf16 %v1532_v37, %v1532_v37 }
 0x29a   : > { %v2065_v18 = vunpack.c.l.b16 %v1856_v35 }
 0x29b   : > { %1793 = vmatpush.bf16.msrb.mxu1 %v1770_v51 }
 0x29c   : > { %v2069_v19 = vpack.c.b16 %v2065_v18, %v2064_v44 }
 0x29d   : > { %1923 = vmatmul.bf16.gmra.mxu2 %v1875_v58 }
 0x29e   : > { %2090 = vmatpush.bf16.msrb.mxu3 %v2069_v19 }
 0x29f   : > { %1794 = vmatpush.bf16.msrb.mxu1 %v1769_v14 }
 0x2a2   : > { %2091 = vmatpush.bf16.msrb.mxu3 %v2068_v25 }
 0x2a3   : > { %1795 = vmatpush.bf16.msrb.mxu1 %v1768_v40 }
 0x2a6   : > { %2092 = vmatpush.bf16.msrb.mxu3 %v2067_v56  ;;  %1629 = vmatmul.bf16.gmra.mxu0 %v1577_v55 }
 0x2aa   : > { %2093 = vmatpush.bf16.msrb.mxu3 %v2066_v57 }
 0x2ad   : > { %1928 = vmatmul.bf16.gmra.mxu2 %v1876_v32 }
 0x2f3   : > { %v1615_v9 = vpop.f32.mrf.mxu0 }
 0x2f4   : > { %v1636_v41 = vsel %vm1635_vm9, %v1615_v9, -inf }
 0x2f5   : > { %1637 = vmax.xlane.f32.xlu0 %v1636_v41 }
 0x2fb   : > { %v1617_v63 = vpop.f32.mrf.mxu0 }
 0x2fc   : > { %v1639_v12 = vsel %vm1635_vm9, %v1617_v63, -inf }
 0x300   : > { %v1914_v4 = vpop.f32.mrf.mxu2 }
 0x301   : > { %v1934_v50 = vsel %vm1635_vm9, %v1914_v4, -inf }
 0x302   : > { %1935 = vmax.xlane.f32.xlu1 %v1934_v50 }
 0x303   : > { %v4480_v62 = vpop.f32.mrf.mxu0 }
 0x304   : > { %v1642_v7 = vsel %vm1635_vm9, %v4480_v62, -inf }
 0x308   : > { %v1916_v8 = vpop.f32.mrf.mxu2 }
 0x309   : > { %v1937_v52 = vsel %vm1635_vm9, %v1916_v8, -inf }
 0x30a   : > { %1938 = vmax.xlane.f32.xlu2 %v1937_v52  ;;  %1640 = vmax.xlane.f32.xlu1 %v1639_v12 }
 0x30b   : > { %v4484_v30 = vpop.f32.mrf.mxu0 }
 0x30c   : > { %v1645_v1 = vsel %vm1635_vm9, %v4484_v30, -inf }
 0x310   : > { %v1919_v37 = vpop.f32.mrf.mxu2 }
 0x311   : > { %v1940_v2 = vsel %vm1635_vm9, %v1919_v37, -inf }
 0x312   : > { %1941 = vmax.xlane.f32.xlu2 %v1940_v2  ;;  %1643 = vmax.xlane.f32.xlu1 %v1642_v7 }
 0x313   : > { %v4489_v49 = vpop.f32.mrf.mxu0 }
 0x314   : > { %v1648_v59 = vsel %vm1635_vm9, %v4489_v49, -inf }
 0x318   : > { %v4491_v15 = vpop.f32.mrf.mxu2 }
 0x319   : > { %v1943_v26 = vsel %vm1635_vm9, %v4491_v15, -inf }
 0x31a   : > { %1944 = vmax.xlane.f32.xlu0 %v1943_v26  ;;  %1646 = vmax.xlane.f32.xlu2 %v1645_v1 }
 0x31b   : > { %v4497_v33 = vpop.f32.mrf.mxu0 }
 0x31c   : > { %v1651_v11 = vsel %vm1635_vm9, %v4497_v33, -inf }
 0x320   : > { %v4499_v35 = vpop.f32.mrf.mxu2 }
 0x321   : > { %v1946_v27 = vsel %vm1635_vm9, %v4499_v35, -inf }
 0x322   : > { %1947 = vmax.xlane.f32.xlu0 %v1946_v27  ;;  %1649 = vmax.xlane.f32.xlu2 %v1648_v59 }
 0x323   : > { %v4505_v24 = vpop.f32.mrf.mxu0 }
 0x324   : > { %v1654_v6 = vsel %vm1635_vm9, %v4505_v24, -inf }
 0x328   : > { %v4507_v51 = vpop.f32.mrf.mxu2 }
 0x329   : > { %v1949_v3 = vsel %vm1635_vm9, %v4507_v51, -inf }
 0x32a   : > { %1950 = vmax.xlane.f32.xlu1 %v1949_v3  ;;  %1652 = vmax.xlane.f32.xlu0 %v1651_v11 }
 0x32b   : > { %v4513_v44 = vpop.f32.mrf.mxu0 }
 0x32c   : > { %v1657_v39 = vsel %vm1635_vm9, %v4513_v44, -inf }
 0x330   : > { %v4515_v18 = vpop.f32.mrf.mxu2 }
 0x331   : > { %v1952_v60 = vsel %vm1635_vm9, %v4515_v18, -inf }
 0x332   : > { %1655 = vmax.xlane.f32.xlu0 %v1654_v6  ;;  %1658 = vmax.xlane.f32.xlu1 %v1657_v39 }
 0x338   : > { %v4521_v16 = vpop.f32.mrf.mxu2 }
 0x339   : > { %v1955_v58 = vsel %vm1635_vm9, %v4521_v16, -inf }
 0x33a   : > { %1956 = vmax.xlane.f32.xlu2 %v1955_v58  ;;  %1953 = vmax.xlane.f32.xlu1 %v1952_v60 }
 0x368   : > { %v1638_v48 = vpop.xlane.xlu0 %1637 }
 0x369   : > { %v1660_v61 = vsub.f32 %v1615_v9, %v1638_v48 }
 0x36b   : > { %v1668_v19 = vmul.f32 1.442695, %v1660_v61 }
 0x36d   : > { %3478 = vpow2.f32 %v1668_v19 }
 0x373   : > { %v4527_v13 = vpop.eup %3478 }
 0x374   : > { %v1684_v14 = vsel %vm1635_vm9, %v4527_v13, 0.0 }
 0x375   : > { %v1936_v53 = vpop.xlane.xlu1 %1935  ;;  %1685 = vadd.xlane.f32.xlu1 %v1684_v14 }
 0x376   : > { %v1958_v5 = vsub.f32 %v1914_v4, %v1936_v53 }
 0x378   : > { %v1966_v31 = vmul.f32 1.442695, %v1958_v5 }
 0x37a   : > { %3480 = vpow2.f32 %v1966_v31 }
 0x37d   : > { %v1939_v22 = vpop.xlane.xlu2 %1938  ;;  %v1641_v17 = vpop.xlane.xlu1 %1640 }
 0x37e   : > { %v1959_v34 = vsub.f32 %v1916_v8, %v1939_v22  ;;  %v1661_v45 = vsub.f32 %v1617_v63, %v1641_v17 }
 0x380   : > { %v4531_v0 = vpop.eup %3480  ;;  %v1968_v42 = vmul.f32 1.442695, %v1959_v34  ;;  %v1670_v20 = vmul.f32 1.442695, %v1661_v45 }
 0x381   : > { %v1982_v46 = vsel %vm1635_vm9, %v4531_v0, 0.0 }
 0x382   : > { %3482 = vpow2.f32 %v1968_v42  ;;  %1983 = vadd.xlane.f32.xlu2 %v1982_v46 }
 0x383   : > { %3484 = vpow2.f32 %v1670_v20 }
 0x385   : > { %v1942_v25 = vpop.xlane.xlu2 %1941  ;;  %v1644_v40 = vpop.xlane.xlu1 %1643 }
 0x386   : > { %v1960_v43 = vsub.f32 %v1919_v37, %v1942_v25  ;;  %v1662_v29 = vsub.f32 %v4480_v62, %v1644_v40 }
 0x388   : > { %v4536_v21 = vpop.eup %3482  ;;  %v1970_v36 = vmul.f32 1.442695, %v1960_v43  ;;  %v1672_v10 = vmul.f32 1.442695, %v1662_v29 }
 0x389   : > { %v4538_v56 = vpop.eup %3484  ;;  %v1985_v55 = vsel %vm1635_vm9, %v4536_v21, 0.0 }
 0x38a   : > { %3486 = vpow2.f32 %v1970_v36  ;;  %v1687_v47 = vsel %vm1635_vm9, %v4538_v56, 0.0  ;;  %1986 = vadd.xlane.f32.xlu0 %v1985_v55 }
 0x38b   : > { %3488 = vpow2.f32 %v1672_v10  ;;  %1688 = vadd.xlane.f32.xlu2 %v1687_v47 }
 0x38d   : > { %v1945_v23 = vpop.xlane.xlu0 %1944  ;;  %v1647_v38 = vpop.xlane.xlu2 %1646 }
 0x38e   : > { %v1961_v28 = vsub.f32 %v4491_v15, %v1945_v23  ;;  %v1663_v57 = vsub.f32 %v4484_v30, %v1647_v38 }
 0x390   : > { %v4546_v54 = vpop.eup %3486  ;;  %v1972_v32 = vmul.f32 1.442695, %v1961_v28  ;;  %v1674_v9 = vmul.f32 1.442695, %v1663_v57 }
 0x391   : > { %v4548_v41 = vpop.eup %3488  ;;  %v1988_v63 = vsel %vm1635_vm9, %v4546_v54, 0.0 }
 0x392   : > { %3490 = vpow2.f32 %v1972_v32  ;;  %v1690_v4 = vsel %vm1635_vm9, %v4548_v41, 0.0  ;;  %1989 = vadd.xlane.f32.xlu0 %v1988_v63 }
 0x393   : > { %3492 = vpow2.f32 %v1674_v9  ;;  %1691 = vadd.xlane.f32.xlu2 %v1690_v4 }
 0x395   : > { %v1948_v50 = vpop.xlane.xlu0 %1947  ;;  %v1650_v62 = vpop.xlane.xlu2 %1649 }
 0x396   : > { %v1962_v8 = vsub.f32 %v4499_v35, %v1948_v50  ;;  %v1664_v52 = vsub.f32 %v4489_v49, %v1650_v62 }
 0x398   : > { %v4556_v12 = vpop.eup %3490  ;;  %v1974_v30 = vmul.f32 1.442695, %v1962_v8  ;;  %v1676_v37 = vmul.f32 1.442695, %v1664_v52 }
 0x399   : > { %v4558_v2 = vpop.eup %3492  ;;  %v1991_v7 = vsel %vm1635_vm9, %v4556_v12, 0.0 }
 0x39a   : > { %3494 = vpow2.f32 %v1974_v30  ;;  %v1693_v15 = vsel %vm1635_vm9, %v4558_v2, 0.0  ;;  %1992 = vadd.xlane.f32.xlu1 %v1991_v7 }
 0x39b   : > { %3496 = vpow2.f32 %v1676_v37  ;;  %1694 = vadd.xlane.f32.xlu0 %v1693_v15 }
 0x39d   : > { %v1951_v26 = vpop.xlane.xlu1 %1950  ;;  %v1653_v1 = vpop.xlane.xlu0 %1652 }
 0x39e   : > { %v1963_v49 = vsub.f32 %v4507_v51, %v1951_v26  ;;  %v1665_v35 = vsub.f32 %v4497_v33, %v1653_v1 }
 0x3a0   : > { %v4566_v27 = vpop.eup %3494  ;;  %v1976_v59 = vmul.f32 1.442695, %v1963_v49  ;;  %v1678_v3 = vmul.f32 1.442695, %v1665_v35 }
 0x3a1   : > { %v4568_v11 = vpop.eup %3496  ;;  %v1994_v6 = vsel %vm1635_vm9, %v4566_v27, 0.0 }
 0x3a2   : > { %3498 = vpow2.f32 %v1976_v59  ;;  %v1696_v39 = vsel %vm1635_vm9, %v4568_v11, 0.0  ;;  %1995 = vadd.xlane.f32.xlu1 %v1994_v6 }
 0x3a3   : > { %3500 = vpow2.f32 %v1678_v3  ;;  %1697 = vadd.xlane.f32.xlu0 %v1696_v39 }
 0x3a5   : > { %v1656_v58 = vpop.xlane.xlu0 %1655  ;;  %v1659_v51 = vpop.xlane.xlu1 %1658 }
 0x3a6   : > { %v1666_v33 = vsub.f32 %v4505_v24, %v1656_v58  ;;  %v1667_v45 = vsub.f32 %v4513_v44, %v1659_v51 }
 0x3a8   : > { %v4575_v60 = vpop.eup %3498  ;;  %v1680_v48 = vmul.f32 1.442695, %v1666_v33  ;;  %v1682_v20 = vmul.f32 1.442695, %v1667_v45 }
 0x3a9   : > { %v4577_v61 = vpop.eup %3500  ;;  %v1997_v19 = vsel %vm1635_vm9, %v4575_v60, 0.0 }
 0x3aa   : > { %3502 = vpow2.f32 %v1680_v48  ;;  %1998 = vadd.xlane.f32.xlu2 %v1997_v19  ;;  %v1699_v14 = vsel %vm1635_vm9, %v4577_v61, 0.0 }
 0x3ab   : > { %1700 = vadd.xlane.f32.xlu1 %v1699_v14 }
 0x3ad   : > { %v1957_v53 = vpop.xlane.xlu2 %1956  ;;  %v1954_v5 = vpop.xlane.xlu1 %1953 }
 0x3ae   : > { %v1965_v31 = vsub.f32 %v4521_v16, %v1957_v53  ;;  %v1964_v24 = vsub.f32 %v4515_v18, %v1954_v5 }
 0x3b0   : > { %v4585_v22 = vpop.eup %3502  ;;  %v1980_v17 = vmul.f32 1.442695, %v1965_v31  ;;  %v1978_v34 = vmul.f32 1.442695, %v1964_v24 }
 0x3b1   : > { %v1702_v42 = vsel %vm1635_vm9, %v4585_v22, 0.0 }
 0x3b2   : > { %3504 = vpow2.f32 %v1980_v17 }
 0x3b3   : > { %3506 = vpow2.f32 %v1978_v34  ;;  %1703 = vadd.xlane.f32.xlu1 %v1702_v42 }
 0x3b4   : > { %3508 = vpow2.f32 %v1682_v20 }
 0x3b8   : > { %v4590_v46 = vpop.eup %3504 }
 0x3b9   : > { %v4592_v25 = vpop.eup %3506  ;;  %v2003_v18 = vsel %vm1635_vm9, %v4590_v46, 0.0 }
 0x3ba   : > { %2004 = vadd.xlane.f32.xlu0 %v2003_v18  ;;  %v2000_v16 = vsel %vm1635_vm9, %v4592_v25, 0.0  ;;  %v4598_v44 = vpop.eup %3508 }
 0x3bb   : > { %2001 = vadd.xlane.f32.xlu2 %v2000_v16  ;;  %v1705_v40 = vsel %vm1635_vm9, %v4598_v44, 0.0 }
 0x3c3   : > { %1706 = vadd.xlane.f32.xlu2 %v1705_v40 }
 0x3e8   : > { %v1686_v29 = vpop.xlane.xlu1 %1685 }
 0x3f5   : > { %v1984_v43 = vpop.xlane.xlu2 %1983 }
 0x3f6   : > { %3510 = vrcp.f32 %v1984_v43 }
 0x3f7   : > { %3512 = vrcp.f32 %v1686_v29 }
 0x3fc   : > { %v3511_v10 = vpop.eup %3510 }
 0x3fd   : > { %v1987_v36 = vpop.xlane.xlu0 %1986  ;;  %v3513_v47 = vpop.eup %3512  ;;  %v2014_v23 = vmul.f32 %v3511_v10, %v4531_v0  ;;  %v3346_v10 = vld [vmem:[#allocation11 + $0x74] sm:$0xf0] }
 0x3fe   : > { %v1689_v55 = vpop.xlane.xlu2 %1688  ;;  %3514 = vrcp.f32 %v1987_v36  ;;  %v1716_v38 = vmul.f32 %v3513_v47, %v4527_v13  ;;  %v3151_v36 = vld [vmem:[#allocation11 + $0x70] sm:$0xf] }
 0x3ff   : > { %3516 = vrcp.f32 %v1689_v55  ;;  %v2022_v32 = vpack.c.bf16 %v2014_v23, %v2014_v23  ;;  %v3345_v55 = vld [vmem:[#allocation11 + $0x74] sm:$0xf]  ;;  %v3152_v23 = vor.u32 %v3346_v10, %v3151_v36  ;;  %v3199_v10 = vld [vmem:[#allocation11 + $0xd0] sm:$0xf] }
 0x400   : > { %v1724_v4 = vpack.c.bf16 %v1716_v38, %v1716_v38  ;;  %v3153_v38 = vld [vmem:[#allocation11 + $0x78] sm:$0xf0] }
 0x401   : > { %v2038_v30 = vunpack.c.l.b16 %v2022_v32  ;;  %2377 = vmatpush.bf16.msra.mxu0 %v3152_v23 }
 0x402   : > { %v1740_v7 = vunpack.c.l.b16 %v1724_v4 }
 0x404   : > { %v3515_v28 = vpop.eup %3514 }
 0x405   : > { %v3517_v57 = vpop.eup %3516  ;;  %v2015_v9 = vmul.f32 %v3515_v28, %v4536_v21  ;;  %v1990_v63 = vpop.xlane.xlu0 %1989  ;;  %v3143_v28 = vld [vmem:[#allocation11 + $0x60] sm:$0xf] }
 0x406   : > { %v1717_v50 = vmul.f32 %v3517_v57, %v4538_v56  ;;  %v1692_v62 = vpop.xlane.xlu2 %1691  ;;  %3518 = vrcp.f32 %v1990_v63  ;;  %v3344_v57 = vld [vmem:[#allocation11 + $0x64] sm:$0xf0]  ;;  %v3215_v63 = vld [vmem:[#allocation11 + $0xf0] sm:$0xf] }
 0x407   : > { %v2023_v8 = vpack.c.bf16 %v2015_v9, %v2015_v9  ;;  %3520 = vrcp.f32 %v1692_v62  ;;  %v3343_v9 = vld [vmem:[#allocation11 + $0x64] sm:$0xf] }
 0x408   : > { %v1725_v52 = vpack.c.bf16 %v1717_v50, %v1717_v50 }
 0x409   : > { %v2039_v37 = vunpack.c.l.b16 %v2023_v8  ;;  %v3362_v8 = vld [vmem:[#allocation11 + $0xf4] sm:$0xf0] }
 0x40a   : > { %v1741_v0 = vunpack.c.l.b16 %v1725_v52  ;;  %v3217_v52 = vld [vmem:[#allocation11 + $0xf8] sm:$0xf0] }
 0x40b   : > { %v2046_v15 = vpack.c.b16 %v2039_v37, %v2038_v30 }
 0x40c   : > { %v1748_v13 = vpack.c.b16 %v1741_v0, %v1740_v7  ;;  %v3519_v1 = vpop.eup %3518  ;;  %v3216_v7 = vor.u32 %v3362_v8, %v3215_v63  ;;  %v3121_v63 = vld [vmem:[#allocation11 + $0x38] sm:$0xf0] }
 0x40d   : > { %3057 = vmatmul.msk.bf16.vlgmr.msrb.gmra.mxu3 %vm1635_vm9, %v2046_v15  ;;  %v1993_v26 = vpop.xlane.xlu1 %1992  ;;  %v3521_v56 = vpop.eup %3520  ;;  %v2016_v49 = vmul.f32 %v3519_v1, %v4546_v54  ;;  %v3135_v15 = vld [vmem:[#allocation11 + $0x50] sm:$0xf]  ;;  %v3341_v1 = vld [vmem:[#allocation11 + $0x54] sm:$0xf] }
 0x40e   : > { %v1695_v21 = vpop.xlane.xlu0 %1694  ;;  %3053 = vmatmul.msk.bf16.vlgmr.msrb.gmra.mxu1 %vm1635_vm9, %v1748_v13  ;;  %3522 = vrcp.f32 %v1993_v26  ;;  %v1718_v35 = vmul.f32 %v3521_v56, %v4548_v41  ;;  %v3342_v13 = vld [vmem:[#allocation11 + $0x54] sm:$0xf0] }
 0x40f   : > { %3524 = vrcp.f32 %v1695_v21  ;;  %v2024_v6 = vpack.c.bf16 %v2016_v49, %v2016_v49  ;;  %v3137_v21 = vld [vmem:[#allocation11 + $0x58] sm:$0xf0]  ;;  %2406 = vmatpush.bf16.msra.mxu1 %v3216_v7  ;;  %v3335_v7 = vld [vmem:[#allocation11 + $0x24] sm:$0xf] }
 0x410   : > { %v1726_v51 = vpack.c.bf16 %v1718_v35, %v1718_v35  ;;  %v3136_v35 = vor.u32 %v3342_v13, %v3135_v15  ;;  %v3113_v15 = vld [vmem:[#allocation11 + $0x28] sm:$0xf0]  ;;  %v3183_v13 = vld [vmem:[#allocation11 + $0xb0] sm:$0xf] }
 0x411   : > { %v2040_v53 = vunpack.c.l.b16 %v2024_v6  ;;  %v3140_v6 = vor.u32 %v3341_v1, %v3137_v21  ;;  %v3116_v1 = vor.u32 %v3335_v7, %v3113_v15 }
 0x412   : > { %v1742_v31 = vunpack.c.l.b16 %v1726_v51 }
 0x414   : > { %v3523_v59 = vpop.eup %3522 }
 0x415   : > { %v3525_v3 = vpop.eup %3524  ;;  %v2017_v39 = vmul.f32 %v3523_v59, %v4556_v12  ;;  %v1996_v58 = vpop.xlane.xlu1 %1995 }
 0x416   : > { %v1719_v33 = vmul.f32 %v3525_v3, %v4558_v2  ;;  %v1698_v48 = vpop.xlane.xlu0 %1697  ;;  %3526 = vrcp.f32 %v1996_v58 }
 0x417   : > { %v2025_v19 = vpack.c.bf16 %v2017_v39, %v2017_v39  ;;  %3528 = vrcp.f32 %v1698_v48 }
 0x418   : > { %v1727_v14 = vpack.c.bf16 %v1719_v33, %v1719_v33 }
 0x419   : > { %v2041_v5 = vunpack.c.l.b16 %v2025_v19 }
 0x41a   : > { %v1743_v54 = vunpack.c.l.b16 %v1727_v14 }
 0x41b   : > { %v2047_v24 = vpack.c.b16 %v2041_v5, %v2040_v53 }
 0x41c   : > { %v1749_v41 = vpack.c.b16 %v1743_v54, %v1742_v31  ;;  %v3527_v17 = vpop.eup %3526 }
 0x41d   : > { %v1999_v34 = vpop.xlane.xlu2 %1998  ;;  %3058 = vmatmul.msk.bf16.gmra.mxu3 %vm1635_vm9, %v2047_v24  ;;  %v3529_v12 = vpop.eup %3528  ;;  %v2018_v42 = vmul.f32 %v3527_v17, %v4566_v27  ;;  %v3145_v27 = vld [vmem:[#allocation11 + $0x68] sm:$0xf0] }
 0x41e   : > { %3530 = vrcp.f32 %v1999_v34  ;;  %3054 = vmatmul.msk.bf16.gmra.mxu1 %vm1635_vm9, %v1749_v41  ;;  %v1701_v2 = vpop.xlane.xlu1 %1700  ;;  %v1720_v45 = vmul.f32 %v3529_v12, %v4568_v11  ;;  %v3156_v11 = vor.u32 %v3345_v55, %v3153_v38  ;;  %v3148_v37 = vor.u32 %v3343_v9, %v3145_v27  ;;  %v3358_v55 = vld [vmem:[#allocation11 + $0xd4] sm:$0xf0]  ;;  %v3357_v38 = vld [vmem:[#allocation11 + $0xd4] sm:$0xf] }
 0x41f   : > { %3532 = vrcp.f32 %v1701_v2  ;;  %v2026_v40 = vpack.c.bf16 %v2018_v42, %v2018_v42  ;;  %v3360_v42 = vld [vmem:[#allocation11 + $0xe4] sm:$0xf0]  ;;  %v3200_v23 = vor.u32 %v3358_v55, %v3199_v10  ;;  %v3337_v9 = vld [vmem:[#allocation11 + $0x34] sm:$0xf] }
 0x420   : > { %v1728_v16 = vpack.c.bf16 %v1720_v45, %v1720_v45  ;;  %2435 = vmatpush.bf16.msra.mxu2 %v3156_v11  ;;  %v3207_v45 = vld [vmem:[#allocation11 + $0xe0] sm:$0xf]  ;;  %v3338_v11 = vld [vmem:[#allocation11 + $0x34] sm:$0xf0] }
 0x421   : > { %v2042_v50 = vunpack.c.l.b16 %v2026_v40  ;;  %v3127_v40 = vld [vmem:[#allocation11 + $0x40] sm:$0xf] }
 0x422   : > { %v1744_v4 = vunpack.c.l.b16 %v1728_v16  ;;  %v3209_v16 = vld [vmem:[#allocation11 + $0xe8] sm:$0xf0] }
 0x424   : > { %v3531_v20 = vpop.eup %3530  ;;  %2436 = vmatpush.bf16.msra.mxu2 %v3148_v37  ;;  %v3336_v37 = vld [vmem:[#allocation11 + $0x24] sm:$0xf0] }
 0x425   : > { %v3533_v18 = vpop.eup %3532  ;;  %v2019_v43 = vmul.f32 %v3531_v20, %v4575_v60  ;;  %v3144_v60 = vor.u32 %v3344_v57, %v3143_v28  ;;  %v3359_v20 = vld [vmem:[#allocation11 + $0xe4] sm:$0xf]  ;;  %v3201_v28 = vld [vmem:[#allocation11 + $0xd8] sm:$0xf0] }
 0x426   : > { %v1721_v29 = vmul.f32 %v3533_v18, %v4577_v61  ;;  %v3361_v61 = vld [vmem:[#allocation11 + $0xf4] sm:$0xf]  ;;  %v1704_v59 = vpop.xlane.xlu1 %1703  ;;  %v3208_v18 = vor.u32 %v3360_v42, %v3207_v45  ;;  %v3204_v57 = vor.u32 %v3357_v38, %v3201_v28  ;;  %v3169_v45 = vld [vmem:[#allocation11 + $0x98] sm:$0xf0] }
 0x427   : > { %v2027_v47 = vpack.c.bf16 %v2019_v43, %v2019_v43  ;;  %v3220_v0 = vor.u32 %v3361_v61, %v3217_v52  ;;  %2378 = vmatpush.bf16.msra.mxu0 %v3144_v60  ;;  %v3340_v43 = vld [vmem:[#allocation11 + $0x44] sm:$0xf0]  ;;  %v3355_v60 = vld [vmem:[#allocation11 + $0xc4] sm:$0xf]  ;;  %v3193_v61 = vld [vmem:[#allocation11 + $0xc8] sm:$0xf0] }
 0x428   : > { %v1729_v32 = vpack.c.bf16 %v1721_v29, %v1721_v29  ;;  %2437 = vmatpush.bf16.msra.mxu2 %v3140_v6  ;;  %v3339_v29 = vld [vmem:[#allocation11 + $0x44] sm:$0xf]  ;;  %2407 = vmatpush.bf16.msra.mxu1 %v3208_v18  ;;  %v3128_v36 = vor.u32 %v3340_v43, %v3127_v40  ;;  %v3196_v52 = vor.u32 %v3355_v60, %v3193_v61  ;;  %v3333_v6 = vld [vmem:[#allocation11 + $0x14] sm:$0xf]  ;;  %v3348_v18 = vld [vmem:[#allocation11 + $0x84] sm:$0xf0] }
 0x429   : > { %v2043_v62 = vunpack.c.l.b16 %v2027_v47  ;;  %2464 = vmatpush.bf16.msra.mxu3 %v3220_v0  ;;  %v3161_v40 = vld [vmem:[#allocation11 + $0x88] sm:$0xf0] }
 0x42a   : > { %v1745_v30 = vunpack.c.l.b16 %v1729_v32  ;;  %v3119_v32 = vld [vmem:[#allocation11 + $0x30] sm:$0xf] }
 0x42b   : > { %v2048_v26 = vpack.c.b16 %v2043_v62, %v2042_v50  ;;  %2379 = vmatpush.bf16.msra.mxu0 %v3136_v35  ;;  %v3120_v27 = vor.u32 %v3338_v11, %v3119_v32  ;;  %v3191_v50 = vld [vmem:[#allocation11 + $0xc0] sm:$0xf]  ;;  %v3356_v62 = vld [vmem:[#allocation11 + $0xc4] sm:$0xf0] }
 0x42c   : > { %v1750_v56 = vpack.c.b16 %v1745_v30, %v1744_v4  ;;  %2408 = vmatpush.bf16.msra.mxu1 %v3200_v23  ;;  %v3124_v4 = vor.u32 %v3337_v9, %v3121_v63  ;;  %v3192_v8 = vor.u32 %v3356_v62, %v3191_v50  ;;  %v3111_v30 = vld [vmem:[#allocation11 + $0x20] sm:$0xf] }
 0x42d   : > { %v2005_v49 = vpop.xlane.xlu0 %2004  ;;  %3059 = vmatmul.msk.bf16.gmra.mxu3 %vm1635_vm9, %v2048_v26  ;;  %v3112_v0 = vor.u32 %v3336_v37, %v3111_v30  ;;  %v3354_v26 = vld [vmem:[#allocation11 + $0xb4] sm:$0xf0] }
 0x42e   : > { %3534 = vrcp.f32 %v2005_v49  ;;  %v2002_v3 = vpop.xlane.xlu2 %2001  ;;  %3055 = vmatmul.msk.bf16.gmra.mxu1 %vm1635_vm9, %v1750_v56  ;;  %v3184_v21 = vor.u32 %v3354_v26, %v3183_v13  ;;  %v3353_v56 = vld [vmem:[#allocation11 + $0xb4] sm:$0xf]  ;;  %v3185_v49 = vld [vmem:[#allocation11 + $0xb8] sm:$0xf0] }
 0x42f   : > { %3536 = vrcp.f32 %v2002_v3  ;;  %2380 = vmatpush.bf16.msra.mxu0 %v3128_v36  ;;  %v3188_v35 = vor.u32 %v3353_v56, %v3185_v49  ;;  %v3334_v3 = vld [vmem:[#allocation11 + $0x14] sm:$0xf0] }
 0x430   : > { %3538 = vrcp.f32 %v1704_v59  ;;  %2409 = vmatpush.bf16.msra.mxu1 %v3192_v8  ;;  %v3103_v59 = vld [vmem:[#allocation11 + $0x10] sm:$0xf] }
 0x433   : > { %2381 = vmatpush.bf16.msra.mxu0 %v3120_v27 }
 0x434   : > { %v3535_v39 = vpop.eup %3534  ;;  %2410 = vmatpush.bf16.msra.mxu1 %v3184_v21 }
 0x435   : > { %v3537_v58 = vpop.eup %3536  ;;  %v2021_v51 = vmul.f32 %v3535_v39, %v4590_v46  ;;  %v3104_v39 = vor.u32 %v3334_v3, %v3103_v59 }
 0x436   : > { %v2020_v33 = vmul.f32 %v3537_v58, %v4592_v25  ;;  %v1707_v48 = vpop.xlane.xlu2 %1706  ;;  %v3539_v19 = vpop.eup %3538  ;;  %v3105_v58 = vld [vmem:[#allocation11 + $0x18] sm:$0xf0] }
 0x437   : > { %v2029_v14 = vpack.c.bf16 %v2021_v51, %v2021_v51  ;;  %3540 = vrcp.f32 %v1707_v48  ;;  %v1722_v31 = vmul.f32 %v3539_v19, %v4585_v22  ;;  %v3212_v22 = vor.u32 %v3359_v20, %v3209_v16  ;;  %2382 = vmatpush.bf16.msra.mxu0 %v3112_v0  ;;  %v3352_v48 = vld [vmem:[#allocation11 + $0xa4] sm:$0xf0]  ;;  %v3351_v19 = vld [vmem:[#allocation11 + $0xa4] sm:$0xf]  ;;  %v3159_v20 = vld [vmem:[#allocation11 + $0x80] sm:$0xf] }
 0x438   : > { %v2028_v53 = vpack.c.bf16 %v2020_v33, %v2020_v33  ;;  %v3108_v51 = vor.u32 %v3333_v6, %v3105_v58  ;;  %v3175_v33 = vld [vmem:[#allocation11 + $0xa0] sm:$0xf]  ;;  %v3347_v16 = vld [vmem:[#allocation11 + $0x84] sm:$0xf] }
 0x439   : > { %v2045_v5 = vunpack.c.l.b16 %v2029_v14  ;;  %v1730_v17 = vpack.c.bf16 %v1722_v31, %v1722_v31  ;;  %2465 = vmatpush.bf16.msra.mxu3 %v3212_v22  ;;  %v3176_v14 = vor.u32 %v3352_v48, %v3175_v33  ;;  %v3095_v31 = vld [vmem:[#allocation11] sm:$0xf]  ;;  %v3160_v22 = vor.u32 %v3348_v18, %v3159_v20 }
 0x43a   : > { %v2044_v54 = vunpack.c.l.b16 %v2028_v53  ;;  %v3177_v53 = vld [vmem:[#allocation11 + $0xa8] sm:$0xf0]  ;;  %v3164_v43 = vor.u32 %v3347_v16, %v3161_v40 }
 0x43b   : > { %v1746_v46 = vunpack.c.l.b16 %v1730_v17  ;;  %2383 = vmatpush.bf16.msra.mxu0 %v3104_v39  ;;  %2411 = vmatpush.bf16.msra.mxu1 %v3176_v14  ;;  %v3097_v17 = vld [vmem:[#allocation11 + $0x8] sm:$0xf0] }
 0x43c   : > { %v2049_v24 = vpack.c.b16 %v2045_v5, %v2044_v54  ;;  %v3180_v5 = vor.u32 %v3351_v19, %v3177_v53  ;;  %v3332_v54 = vld [vmem:[#allocation11 + $0x4] sm:$0xf0] }
 0x43d   : > { %v3541_v41 = vpop.eup %3540  ;;  %2466 = vmatpush.bf16.msra.mxu3 %v3204_v57 }
 0x43e   : > { %v1723_v34 = vmul.f32 %v3541_v41, %v4598_v44  ;;  %3060 = vmatmul.msk.bf16.gmra.mxu3 %vm1635_vm9, %v2049_v24  ;;  %v3129_v44 = vld [vmem:[#allocation11 + $0x48] sm:$0xf0]  ;;  %v3331_v24 = vld [vmem:[#allocation11 + $0x4] sm:$0xf]  ;;  %v3096_v41 = vor.u32 %v3332_v54, %v3095_v31 }
 0x43f   : > { %v3132_v47 = vor.u32 %v3339_v29, %v3129_v44 }
 0x440   : > { %v1731_v12 = vpack.c.bf16 %v1723_v34, %v1723_v34  ;;  %v3167_v34 = vld [vmem:[#allocation11 + $0x90] sm:$0xf]  ;;  %2384 = vmatpush.bf16.msra.mxu0 %v3096_v41 }
 0x441   : > { %2438 = vmatpush.bf16.msra.mxu2 %v3132_v47  ;;  %2467 = vmatpush.bf16.msra.mxu3 %v3196_v52 }
 0x442   : > { %v1747_v2 = vunpack.c.l.b16 %v1731_v12  ;;  %v3350_v12 = vld [vmem:[#allocation11 + $0x94] sm:$0xf0] }
 0x444   : > { %v1751_v25 = vpack.c.b16 %v1747_v2, %v1746_v46  ;;  %v3100_v46 = vor.u32 %v3331_v24, %v3097_v17  ;;  %v3168_v2 = vor.u32 %v3350_v12, %v3167_v34 }
 0x445   : > { %2439 = vmatpush.bf16.msra.mxu2 %v3124_v4  ;;  %2468 = vmatpush.bf16.msra.mxu3 %v3188_v35 }
 0x446   : > { %3056 = vmatmul.msk.bf16.gmra.mxu1 %vm1635_vm9, %v1751_v25  ;;  %v3349_v25 = vld [vmem:[#allocation11 + $0x94] sm:$0xf] }
 0x447   : > { %v3172_v42 = vor.u32 %v3349_v25, %v3169_v45  ;;  %2412 = vmatpush.bf16.msra.mxu1 %v3168_v2  ;;  %v2171_v45 = vld [vmem:[%s4724_s5] sm:$0x3] }
 0x448   : > { %v4632_v40 = vperm.slane %v2171_v45, 1 }
 0x449   : > { %2440 = vmatpush.bf16.msra.mxu2 %v3116_v1  ;;  %2469 = vmatpush.bf16.msra.mxu3 %v3180_v5 }
 0x44b   : > { %2413 = vmatpush.bf16.msra.mxu1 %v3160_v22 }
 0x44d   : > { %2441 = vmatpush.bf16.msra.mxu2 %v3108_v51  ;;  %2470 = vmatpush.bf16.msra.mxu3 %v3172_v42  ;;  %v4629_v42 = vperm.slane %v2171_v45, 0  ;;  %v3551_v45 = vld [vmem:[%s3952_s14 + $0x48] sm:$0xff] }
 0x451   : > { %2442 = vmatpush.bf16.msra.mxu2 %v3100_v46  ;;  %2471 = vmatpush.bf16.msra.mxu3 %v3164_v43 }
 0x48b   : > { %v1797_v29 = vpop.f32.mrf.mxu1 }
 0x48c   : > { %v1817_v36 = vpack.c.bf16 %v1797_v29, %v1797_v29  ;;  %v3542_v29 = vld [vmem:[%s3952_s14] sm:$0xff] }
 0x48e   : > { %1825 = vst [vmem:[#allocation2] sm:$0xf] %v1817_v36 }
 0x490   : > { %v2095_v44 = vpop.f32.mrf.mxu3 }
 0x491   : > { %v2115_v10 = vpack.c.bf16 %v2095_v44, %v2095_v44 }
 0x493   : > { %2123 = vst [vmem:[#allocation2 + $0x4] sm:$0xf] %v2115_v10  ;;  %v1799_v55 = vpop.f32.mrf.mxu1 }
 0x494   : > { %v1818_v47 = vpack.c.bf16 %v1799_v55, %v1799_v55 }
 0x495   : > { %v3063_v32 = vld [vmem:[#allocation2] sm:$0xf] }
 0x496   : > { %1826 = vst [vmem:[#allocation2 + $0x8] sm:$0xf] %v1818_v47 }
 0x498   : > { %v2097_v23 = vpop.f32.mrf.mxu3 }
 0x499   : > { %v2116_v38 = vpack.c.bf16 %v2097_v23, %v2097_v23 }
 0x49a   : > { %v3323_v4 = vld [vmem:[#allocation2 + $0x4] sm:$0xf] }
 0x49b   : > { %2124 = vst [vmem:[#allocation2 + $0xc] sm:$0xf] %v2116_v38  ;;  %v1802_v28 = vpop.f32.mrf.mxu1 }
 0x49c   : > { %v1819_v57 = vpack.c.bf16 %v1802_v28, %v1802_v28  ;;  %v3543_v28 = vld [vmem:[%s3952_s14 + $0x8] sm:$0xff] }
 0x49d   : > { %v3324_v11 = vld [vmem:[#allocation2 + $0x4] sm:$0xf0] }
 0x49e   : > { %1827 = vst [vmem:[#allocation2 + $0x10] sm:$0xf] %v1819_v57  ;;  %v3064_v9 = vor.u32 %v3324_v11, %v3063_v32 }
 0x4a0   : > { %2385 = vmatmul.bf16.vlgmr.msra.gmra.mxu0 %v3064_v9  ;;  %2443 = vmatmul.bf16.vlgmr.msra.gmra.mxu2 %v3064_v9  ;;  %v2100_v27 = vpop.f32.mrf.mxu3  ;;  %v3544_v9 = vld [vmem:[%s3952_s14 + $0x10] sm:$0xff] }
 0x4a1   : > { %v2117_v63 = vpack.c.bf16 %v2100_v27, %v2100_v27 }
 0x4a2   : > { %v3065_v50 = vld [vmem:[#allocation2 + $0x8] sm:$0xf0] }
 0x4a3   : > { %2125 = vst [vmem:[#allocation2 + $0x14] sm:$0xf] %v2117_v63  ;;  %v1804_v62 = vpop.f32.mrf.mxu1  ;;  %v3068_v60 = vor.u32 %v3323_v4, %v3065_v50 }
 0x4a4   : > { %v1820_v8 = vpack.c.bf16 %v1804_v62, %v1804_v62 }
 0x4a5   : > { %2414 = vmatmul.bf16.vlgmr.msra.gmra.mxu1 %v3068_v60  ;;  %2472 = vmatmul.bf16.vlgmr.msra.gmra.mxu3 %v3068_v60  ;;  %v3071_v7 = vld [vmem:[#allocation2 + $0x10] sm:$0xf] }
 0x4a6   : > { %1828 = vst [vmem:[#allocation2 + $0x18] sm:$0xf] %v1820_v8 }
 0x4a8   : > { %v2102_v61 = vpop.f32.mrf.mxu3 }
 0x4a9   : > { %v2118_v52 = vpack.c.bf16 %v2102_v61, %v2102_v61  ;;  %v3545_v61 = vld [vmem:[%s3952_s14 + $0x18] sm:$0xff] }
 0x4aa   : > { %v3325_v1 = vld [vmem:[#allocation2 + $0x14] sm:$0xf] }
 0x4ab   : > { %2126 = vst [vmem:[#allocation2 + $0x1c] sm:$0xf] %v2118_v52  ;;  %v1807_v30 = vpop.f32.mrf.mxu1 }
 0x4ac   : > { %v1821_v37 = vpack.c.bf16 %v1807_v30, %v1807_v30 }
 0x4ad   : > { %v3326_v0 = vld [vmem:[#allocation2 + $0x14] sm:$0xf0] }
 0x4ae   : > { %1829 = vst [vmem:[#allocation2 + $0x20] sm:$0xf] %v1821_v37  ;;  %v3072_v15 = vor.u32 %v3326_v0, %v3071_v7  ;;  %v3546_v7 = vld [vmem:[%s3952_s14 + $0x20] sm:$0xff] }
 0x4b0   : > { %2390 = vmatmul.bf16.gmra.mxu0 %v3072_v15  ;;  %2448 = vmatmul.bf16.gmra.mxu2 %v3072_v15  ;;  %v2105_v13 = vpop.f32.mrf.mxu3 }
 0x4b1   : > { %v2119_v26 = vpack.c.bf16 %v2105_v13, %v2105_v13 }
 0x4b2   : > { %v3073_v21 = vld [vmem:[#allocation2 + $0x18] sm:$0xf0] }
 0x4b3   : > { %2127 = vst [vmem:[#allocation2 + $0x24] sm:$0xf] %v2119_v26  ;;  %v1809_v56 = vpop.f32.mrf.mxu1  ;;  %v3076_v49 = vor.u32 %v3325_v1, %v3073_v21 }
 0x4b4   : > { %v1822_v35 = vpack.c.bf16 %v1809_v56, %v1809_v56 }
 0x4b5   : > { %2419 = vmatmul.bf16.gmra.mxu1 %v3076_v49  ;;  %2477 = vmatmul.bf16.gmra.mxu3 %v3076_v49  ;;  %v3079_v6 = vld [vmem:[#allocation2 + $0x20] sm:$0xf]  ;;  %v3547_v49 = vld [vmem:[%s3952_s14 + $0x28] sm:$0xff] }
 0x4b6   : > { %1830 = vst [vmem:[#allocation2 + $0x28] sm:$0xf] %v1822_v35 }
 0x4b8   : > { %v2107_v59 = vpop.f32.mrf.mxu3 }
 0x4b9   : > { %v2120_v3 = vpack.c.bf16 %v2107_v59, %v2107_v59 }
 0x4ba   : > { %v3327_v48 = vld [vmem:[#allocation2 + $0x24] sm:$0xf] }
 0x4bb   : > { %2128 = vst [vmem:[#allocation2 + $0x2c] sm:$0xf] %v2120_v3 }
 0x4bd   : > { %v3328_v39 = vld [vmem:[#allocation2 + $0x24] sm:$0xf0] }
 0x4be   : > { %v3080_v58 = vor.u32 %v3328_v39, %v3079_v6  ;;  %v3548_v6 = vld [vmem:[%s3952_s14 + $0x30] sm:$0xff] }
 0x4c0   : > { %2395 = vmatmul.bf16.gmra.mxu0 %v3080_v58  ;;  %2453 = vmatmul.bf16.gmra.mxu2 %v3080_v58 }
 0x4c1   : > { %v2110_v51 = vpop.f32.mrf.mxu3 }
 0x4c2   : > { %v2121_v33 = vpack.c.bf16 %v2110_v51, %v2110_v51  ;;  %v3081_v19 = vld [vmem:[#allocation2 + $0x28] sm:$0xf0] }
 0x4c3   : > { %v1812_v14 = vpop.f32.mrf.mxu1  ;;  %v3084_v53 = vor.u32 %v3327_v48, %v3081_v19 }
 0x4c4   : > { %2129 = vst [vmem:[#allocation2 + $0x34] sm:$0xf] %v2121_v33  ;;  %v1823_v5 = vpack.c.bf16 %v1812_v14, %v1812_v14 }
 0x4c5   : > { %2424 = vmatmul.bf16.gmra.mxu1 %v3084_v53  ;;  %2482 = vmatmul.bf16.gmra.mxu3 %v3084_v53  ;;  %v3549_v53 = vld [vmem:[%s3952_s14 + $0x38] sm:$0xff] }
 0x4c6   : > { %1831 = vst [vmem:[#allocation2 + $0x30] sm:$0xf] %v1823_v5 }
 0x4c9   : > { %v2112_v31 = vpop.f32.mrf.mxu3 }
 0x4ca   : > { %v2122_v54 = vpack.c.bf16 %v2112_v31, %v2112_v31 }
 0x4cb   : > { %v1814_v24 = vpop.f32.mrf.mxu1  ;;  %v3329_v17 = vld [vmem:[#allocation2 + $0x34] sm:$0xf] }
 0x4cc   : > { %2130 = vst [vmem:[#allocation2 + $0x3c] sm:$0xf] %v2122_v54  ;;  %v1824_v41 = vpack.c.bf16 %v1814_v24, %v1814_v24  ;;  %v3550_v24 = vld [vmem:[%s3952_s14 + $0x40] sm:$0xff] }
 0x4cd   : > { %v3087_v46 = vld [vmem:[#allocation2 + $0x30] sm:$0xf] }
 0x4ce   : > { %1832 = vst [vmem:[#allocation2 + $0x38] sm:$0xf] %v1824_v41 }
 0x4d3   : > { %v3089_v34 = vld [vmem:[#allocation2 + $0x38] sm:$0xf0] }
 0x4d4   : > { %v3092_v12 = vor.u32 %v3329_v17, %v3089_v34 }
 0x4d5   : > { %v3330_v2 = vld [vmem:[#allocation2 + $0x34] sm:$0xf0] }
 0x4d6   : > { %2429 = vmatmul.bf16.gmra.mxu1 %v3092_v12  ;;  %2487 = vmatmul.bf16.gmra.mxu3 %v3092_v12  ;;  %v3088_v25 = vor.u32 %v3330_v2, %v3087_v46 }
 0x4d8   : > { %2400 = vmatmul.bf16.gmra.mxu0 %v3088_v25  ;;  %2458 = vmatmul.bf16.gmra.mxu2 %v3088_v25 }
 0x51d   : > { %v2386_v20 = vpop.f32.mrf.mxu0 }
 0x51e   : > { %v2387_v18 = vadd.f32 %v2386_v20, %v4629_v42 }
 0x522   : > { %v2415_v16 = vpop.f32.mrf.mxu1 }
 0x523   : > { %v2416_v22 = vadd.f32 %v2415_v16, %v2387_v18  ;;  %v2444_v43 = vpop.f32.mrf.mxu2 }
 0x524   : > { %v2445_v10 = vadd.f32 %v2444_v43, %v4632_v40 }
 0x525   : > { %v2493_v36 = vadd.f32 %v3542_v29, %v2416_v22  ;;  %v2388_v44 = vpop.f32.mrf.mxu0  ;;  %v3552_v22 = vld [vmem:[%s3952_s14 + $0x50] sm:$0xff] }
 0x526   : > { %v2389_v47 = vadd.f32 %v2388_v44, %v4629_v42 }
 0x527   : > { %2509 = vst [vmem:[%s4637_s11] sm:$0xff] %v2493_v36 }
 0x528   : > { %v2473_v55 = vpop.f32.mrf.mxu3 }
 0x529   : > { %v2474_v23 = vadd.f32 %v2473_v55, %v2445_v10  ;;  %v3553_v10 = vld [vmem:[%s3952_s14 + $0x58] sm:$0xff] }
 0x52a   : > { %v2417_v38 = vpop.f32.mrf.mxu1 }
 0x52b   : > { %v2494_v57 = vadd.f32 %v3543_v28, %v2474_v23  ;;  %v2418_v32 = vadd.f32 %v2417_v38, %v2389_v47  ;;  %v2446_v11 = vpop.f32.mrf.mxu2 }
 0x52c   : > { %v2447_v4 = vadd.f32 %v2446_v11, %v4632_v40 }
 0x52d   : > { %2510 = vst [vmem:[%s4637_s11 + $0x8] sm:$0xff] %v2494_v57  ;;  %v2495_v27 = vadd.f32 %v3544_v9, %v2418_v32  ;;  %v2391_v63 = vpop.f32.mrf.mxu0  ;;  %v3554_v57 = vld [vmem:[%s3952_s14 + $0x60] sm:$0xff] }
 0x52e   : > { %v2392_v62 = vadd.f32 %v2391_v63, %v4629_v42 }
 0x52f   : > { %2511 = vst [vmem:[%s4637_s11 + $0x10] sm:$0xff] %v2495_v27 }
 0x530   : > { %v2475_v50 = vpop.f32.mrf.mxu3 }
 0x531   : > { %v2476_v60 = vadd.f32 %v2475_v50, %v2447_v4 }
 0x532   : > { %v2420_v8 = vpop.f32.mrf.mxu1 }
 0x533   : > { %v2496_v52 = vadd.f32 %v3545_v61, %v2476_v60  ;;  %v2421_v30 = vadd.f32 %v2420_v8, %v2392_v62  ;;  %v2449_v37 = vpop.f32.mrf.mxu2  ;;  %v3555_v60 = vld [vmem:[%s3952_s14 + $0x68] sm:$0xff] }
 0x534   : > { %v2450_v13 = vadd.f32 %v2449_v37, %v4632_v40 }
 0x535   : > { %2512 = vst [vmem:[%s4637_s11 + $0x18] sm:$0xff] %v2496_v52  ;;  %v2497_v0 = vadd.f32 %v3546_v7, %v2421_v30  ;;  %v2393_v15 = vpop.f32.mrf.mxu0  ;;  %v3556_v52 = vld [vmem:[%s3952_s14 + $0x70] sm:$0xff] }
 0x536   : > { %v2394_v1 = vadd.f32 %v2393_v15, %v4629_v42  ;;  %v3557_v15 = vld [vmem:[%s3952_s14 + $0x78] sm:$0xff] }
 0x537   : > { %2513 = vst [vmem:[%s4637_s11 + $0x20] sm:$0xff] %v2497_v0 }
 0x538   : > { %v2478_v26 = vpop.f32.mrf.mxu3 }
 0x539   : > { %v2479_v21 = vadd.f32 %v2478_v26, %v2450_v13 }
 0x53a   : > { %v2422_v56 = vpop.f32.mrf.mxu1 }
 0x53b   : > { %v2498_v35 = vadd.f32 %v3547_v49, %v2479_v21  ;;  %v2423_v59 = vadd.f32 %v2422_v56, %v2394_v1  ;;  %v2451_v3 = vpop.f32.mrf.mxu2 }
 0x53c   : > { %v2452_v51 = vadd.f32 %v2451_v3, %v4632_v40 }
 0x53d   : > { %2514 = vst [vmem:[%s4637_s11 + $0x28] sm:$0xff] %v2498_v35  ;;  %v2499_v39 = vadd.f32 %v3548_v6, %v2423_v59  ;;  %v2396_v58 = vpop.f32.mrf.mxu0 }
 0x53e   : > { %v2397_v48 = vadd.f32 %v2396_v58, %v4629_v42 }
 0x53f   : > { %2515 = vst [vmem:[%s4637_s11 + $0x30] sm:$0xff] %v2499_v39 }
 0x540   : > { %v2480_v33 = vpop.f32.mrf.mxu3 }
 0x541   : > { %v2481_v19 = vadd.f32 %v2480_v33, %v2452_v51 }
 0x542   : > { %v2425_v14 = vpop.f32.mrf.mxu1 }
 0x543   : > { %v2500_v5 = vadd.f32 %v3549_v53, %v2481_v19  ;;  %v2426_v31 = vadd.f32 %v2425_v14, %v2397_v48  ;;  %v2454_v54 = vpop.f32.mrf.mxu2 }
 0x544   : > { %v2455_v34 = vadd.f32 %v2454_v54, %v4632_v40 }
 0x545   : > { %2516 = vst [vmem:[%s4637_s11 + $0x38] sm:$0xff] %v2500_v5  ;;  %v2501_v41 = vadd.f32 %v3550_v24, %v2426_v31  ;;  %v2398_v17 = vpop.f32.mrf.mxu0 }
 0x546   : > { %v2399_v46 = vadd.f32 %v2398_v17, %v4629_v42 }
 0x547   : > { %2517 = vst [vmem:[%s4637_s11 + $0x40] sm:$0xff] %v2501_v41 }
 0x548   : > { %v2483_v12 = vpop.f32.mrf.mxu3 }
 0x549   : > { %v2484_v2 = vadd.f32 %v2483_v12, %v2455_v34 }
 0x54a   : > { %v2427_v25 = vpop.f32.mrf.mxu1 }
 0x54b   : > { %v2502_v20 = vadd.f32 %v3551_v45, %v2484_v2  ;;  %v2428_v18 = vadd.f32 %v2427_v25, %v2399_v46  ;;  %v2456_v16 = vpop.f32.mrf.mxu2 }
 0x54c   : > { %v2457_v29 = vadd.f32 %v2456_v16, %v4632_v40 }
 0x54d   : > { %2518 = vst [vmem:[%s4637_s11 + $0x48] sm:$0xff] %v2502_v20  ;;  %v2503_v43 = vadd.f32 %v3552_v22, %v2428_v18 }
 0x54f   : > { %2519 = vst [vmem:[%s4637_s11 + $0x50] sm:$0xff] %v2503_v43 }
 0x550   : > { %v2485_v36 = vpop.f32.mrf.mxu3 }
 0x551   : > { %v2486_v44 = vadd.f32 %v2485_v36, %v2457_v29 }
 0x553   : > { %v2504_v55 = vadd.f32 %v3553_v10, %v2486_v44  ;;  %v2430_v47 = vpop.f32.mrf.mxu1 }
 0x555   : > { %2520 = vst [vmem:[%s4637_s11 + $0x58] sm:$0xff] %v2504_v55  ;;  %v2401_v23 = vpop.f32.mrf.mxu0 }
 0x556   : > { %v2402_v38 = vadd.f32 %v2401_v23, %v4629_v42 }
 0x558   : > { %v2431_v28 = vadd.f32 %v2430_v47, %v2402_v38 }
 0x559   : > { %v2488_v11 = vpop.f32.mrf.mxu3 }
 0x55a   : > { %v2505_v32 = vadd.f32 %v3554_v57, %v2431_v28 }
 0x55b   : > { %v2459_v9 = vpop.f32.mrf.mxu2  ;;  %v2432_v62 = vpop.f32.mrf.mxu1 }
 0x55c   : > { %2521 = vst [vmem:[%s4637_s11 + $0x60] sm:$0xff] %v2505_v32  ;;  %v2460_v27 = vadd.f32 %v2459_v9, %v4632_v40 }
 0x55d   : > { %v2403_v63 = vpop.f32.mrf.mxu0 }
 0x55e   : > { %v2489_v4 = vadd.f32 %v2488_v11, %v2460_v27  ;;  %v2404_v50 = vadd.f32 %v2403_v63, %v4629_v42 }
 0x560   : > { %v2506_v8 = vadd.f32 %v3555_v60, %v2489_v4  ;;  %v2433_v61 = vadd.f32 %v2432_v62, %v2404_v50 }
 0x561   : > { %v2490_v7 = vpop.f32.mrf.mxu3 }
 0x562   : > { %2522 = vst [vmem:[%s4637_s11 + $0x68] sm:$0xff] %v2506_v8  ;;  %v2507_v30 = vadd.f32 %v3556_v52, %v2433_v61 }
 0x563   : > { %v2461_v37 = vpop.f32.mrf.mxu2 }
 0x564   : > { %2523 = vst [vmem:[%s4637_s11 + $0x70] sm:$0xff] %v2507_v30  ;;  %v2462_v42 = vadd.f32 %v2461_v37, %v4632_v40 }
 0x566   : > { %v2491_v0 = vadd.f32 %v2490_v7, %v2462_v42 }
 0x568   : > { %v2508_v13 = vadd.f32 %v3557_v15, %v2491_v0 }
 0x56a   : > { %2524 = vst [vmem:[%s4637_s11 + $0x78] sm:$0xff] %v2508_v13 }
 0x56b   : > { %3735 = shalt.err (!%p3732_p11)
}
 0x56c   : > { %s3795_s29 = smov 256   ;;  %s3796_s14 = smov 16  }
 0x56d   : > { %3382 = dma.vmem_to_hbm [thread:$0]  (%p3919_p5), %s2539_s25, 2048, %s2541_s7, %s2526_s9, %s3795_s29, %s3795_s29, %s3796_s14  }
 0x56e PF: > { %s2555_s11 = sand.u32 1, %s3770_s21   ;;  %p4748_p12 = scmp.ge.s32.totalorder %s3782_s24, 2 }
 0x56f   : > { %s2556_s13 = scalar_lea.sflag [#allocation5], %s2555_s11 }
 0x570   : > { %p3402_p13 = pnand %p4748_p12, %p3867_p6 }
 0x572   : > { %p3403_p0 = pneg %p3402_p13 }
 0x574   : > { %3765 = dma.done.wait (%p3403_p0), %s2556_s13, 2048  }
 0x575   : > { %3767 = vsyncadd (%p3403_p0), %s2556_s13, 4294965248  ;;  %p21_p3 = scmp.ge.s32.totalorder %s3906_s16, 4   ;;  %s4749_s21 = smov %s3774_s22 }
 0x576   : > { %s4750_s22 = smov %s3778_s23  ;;  %s4751_s23 = smov %s3915_s19 }
 0x577   : > { %s4752_s24 = smov %s3906_s16  ;;  %23 = sbr.rel (!%p21_p3) target bundleno = 7 (0x7), region = 105 }
 0x57c   :  { %2562 = vsyncpa [#allocation4], 1 }
 0x57d   :  { %2564 = vsyncpa [#allocation4 + $0x1], 1 }
 0x57e   :  { %2565 = vsyncpa [#allocation7], 1 }
 0x57f   :  { %2566 = vsyncpa [#allocation10], 1 }
 0x580   :  { %2567 = vsyncpa [#allocation5], 1 }
 0x581   :  { %2569 = vsyncpa [#allocation5 + $0x1], 1 }

// kernel: tpu_custom_call.1
= control target key start
LH: loop header
LB: loop body
LE: loop exit
PB: predicated region body
PF: predicated region fallthrough
CT: control target
= control target key end

     0   :  { %11 = vsyncpa [#allocation4], 0  ;;  %s4719_s0 = inlined_call_operand.hbm [shape: f32[2,64,256], index: 0, kind: input, shape index: {}]   ;;  %s4720_s1 = inlined_call_operand.hbm [shape: f32[1,256], index: 1, kind: input, shape index: {}]   ;;  %s4721_s2 = inlined_call_operand.hbm [shape: f32[1,256], index: 2, kind: input, shape index: {}]   ;;  %s4722_s3 = inlined_call_operand.hbm [shape: bf16[256,768], index: 3, kind: input, shape index: {}]   ;;  %s4723_s4 = inlined_call_operand.hbm [shape: bf16[256,256], index: 4, kind: input, shape index: {}]   ;;  %s4724_s5 = inlined_call_operand.vmem [shape: f32[1,256], index: 5, kind: input, shape index: {}]   ;;  %s4725_s6 = inlined_call_operand.hbm [shape: f32[2,64,256], index: 6, kind: output, shape index: {}]  }
   0x1   :  { %13 = vsyncpa [#allocation4 + $0x1], 0 }
   0x2   :  { %14 = vsyncpa [#allocation7], 0 }
   0x3   :  { %15 = vsyncpa [#allocation10], 0 }
   0x4   :  { %16 = vsyncpa [#allocation5], 0 }
   0x5   :  { %18 = vsyncpa [#allocation5 + $0x1], 0  ;;  %s3832_s21 = smov 0   ;;  %s3834_s22 = smov 0  }
   0x6   :  { %s3836_s23 = smov 0   ;;  %s3838_s24 = smov 0  }
   0x7 LB: > { %s3853_s25 = sadd.s32 4294967295, %s3782_s24   ;;  %s2652_s26 = sadd.s32 4294967294, %s3782_s24   ;;  %s3782_s24 = sphi %s3838_s24, %s4752_s24   ;;  %s3778_s23 = sphi %s3836_s23, %s4751_s23   ;;  %s3774_s22 = sphi %s3834_s22, %s4750_s22   ;;  %s3770_s21 = sphi %s3832_s21, %s4749_s21  }
   0x8   : > { %p44_p0 = scmp.ne.s32.totalorder %s3774_s22, %s3770_s21  ;;  %p45_p1 = scmp.eq.s32.totalorder %s3853_s25, 0 }
   0x9   : > { %p173_p2 = scmp.eq.s32.totalorder %s3853_s25, 1  ;;  %p179_p3 = scmp.eq.s32.totalorder %s2652_s26, 1 }
   0xa   : > { %p3862_p4 = por %p45_p1, %p44_p0  ;;  %p2653_p5 = scmp.ge.s32.totalorder %s3782_s24, 1 }
   0xb   : > { %p3867_p6 = por %p179_p3, %p44_p0  ;;  %p186_p7 = scmp.lt.s32.totalorder %s3782_s24, 3 }
   0xc   : > { %s198_s7 = sshll.u32 %s4720_s1, 4  ;;  %s3784_s9 = smov [#allocation6]   ;;  %s199_s7 = int_to_ptr.hbm [resolvable:$true] %s198_s7 }
   0xd   : > { %p3875_p8 = pnand %p2653_p5, %p186_p7  ;;  %s200_s10 = sshll.u32 %s3784_s9, 4  ;;  %s201_s10 = int_to_ptr.vmem [resolvable:$true] %s200_s10 }
   0xe   : > { %s221_s13 = sshll.u32 %s4722_s3, 4  ;;  %s3785_s15 = smov [#allocation9]   ;;  %s222_s13 = int_to_ptr.hbm [resolvable:$true] %s221_s13 }
   0xf   : > { %p3384_p10 = pneg %p3875_p8  ;;  %s223_s16 = sshll.u32 %s3785_s15, 4  ;;  %s224_s16 = int_to_ptr.vmem [resolvable:$true] %s223_s16 }
  0x10   : > { %s3786_s17 = smov 384   ;;  %s3787_s18 = smov 24  }
  0x11   : > { %p3887_p11 = pnand %p3384_p10, %p45_p1  ;;  %s210_s26 = sshll.u32 %s4721_s2, 4  ;;  %s211_s26 = int_to_ptr.hbm [resolvable:$true] %s210_s26 }
  0x12   : > { %s3788_s29 = smov [#allocation8]   ;;  %s3789_s11 = smov [#allocation11]  }
  0x13   : > { %3387 = dma.hbm_to_vmem [thread:$0]  (!%p3887_p11), %s199_s7, 32, %s201_s10, [#allocation7]  }
  0x14   : > { %3393 = dma.hbm_to_vmem [thread:$0]  (!%p3887_p11), %s222_s13, 12288, %s224_s16, [#allocation10], %s3786_s17, %s3786_s17, %s3787_s18  }
  0x15   : > { %s212_s30 = sshll.u32 %s3788_s29, 4  ;;  %s235_s10 = sshll.u32 %s4723_s4, 4  ;;  %s213_s30 = int_to_ptr.vmem [resolvable:$true] %s212_s30  ;;  %s236_s10 = int_to_ptr.hbm [resolvable:$true] %s235_s10 }
  0x16   : > { %3390 = dma.hbm_to_vmem [thread:$0]  (!%p3887_p11), %s211_s26, 32, %s213_s30, [#allocation7]  }
  0x17   : > { %s237_s12 = sshll.u32 %s3789_s11, 4  ;;  %s3790_s13 = smov 128   ;;  %s238_s12 = int_to_ptr.vmem [resolvable:$true] %s237_s12 }
  0x18   : > { %s3791_s15 = smov 8   ;;  %s3906_s16 = sadd.s32 1, %s3782_s24  }
  0x19   : > { %3396 = dma.hbm_to_vmem [thread:$0]  (!%p3887_p11), %s236_s10, 4096, %s238_s12, [#allocation10], %s3790_s13, %s3790_s13, %s3791_s15  }
  0x1a   : > { %s28_s17 = ssub.s32 %s3782_s24, %s3906_s16  ;;  %s31_s18 = sadd.s32 1, %s3778_s23 }
  0x1b   : > { %p29_p12 = scmp.eq.s32.totalorder %s28_s17, 0  ;;  %p38_p13 = scmp.ne.s32.totalorder %s3778_s23, %s3774_s22 }
  0x1c   : > { %p39_p0 = scmp.eq.s32.totalorder %s3782_s24, 0  ;;  %p3409_p7 = scmp.lt.s32.totalorder %s3782_s24, 2 }
  0x1d   : > { %s3915_s19 = scalar_select %p29_p12, %s3778_s23, %s31_s18  }
  0x1e   : > { %p40_p3 = por %p39_p0, %p38_p13  ;;  %p3919_p5 = por %p173_p2, %p38_p13 }
  0x1f   : > { %s254_s26 = sand.u32 1, %s3778_s23   ;;  %s3226_s29 = sshll.u32 %s3782_s24, 7 }
  0x20   : > { %s2659_s14 = sshll.u32 %s254_s26, 7  ;;  %s263_s9 = scalar_lea.hbm %s4719_s0, %s3226_s29 }
  0x21   : > { %s258_s10 = scalar_lea.vmem [#allocation3], %s2659_s14  ;;  %s264_s12 = sshll.u32 %s263_s9, 4  ;;  %s265_s12 = int_to_ptr.hbm [resolvable:$true] %s264_s12 }
  0x22   : > { %s266_s11 = sshll.u32 %s258_s10, 4  ;;  %p3929_p10 = pnand %p3409_p7, %p40_p3  ;;  %s267_s11 = int_to_ptr.vmem [resolvable:$true] %s266_s11 }
  0x23   : > { %s255_s15 = scalar_lea.sflag [#allocation4], %s254_s26  ;;  %s3678_s17 = sshra.s32 %s265_s12, 4  ;;  %s3679_s17 = int_to_ptr.hbm [resolvable:$true] %s3678_s17 }
  0x24   : > { %s3680_s18 = scalar_lea.hbm %s3679_s17, 128  ;;  %p3682_p11 = pneg %p3929_p10 }
  0x25   : > { %p3681_p2 = scmp.ne.s32.totalorder %s3679_s17, %s3680_s18  ;;  %s3685_s30 = scalar_lea.hbm %s4719_s0, 256 }
  0x26   : > { %p3686_p0 = scmp.lt.s32.totalorder %s3679_s17, %s4719_s0  ;;  %p3687_p3 = scmp.lt.s32.totalorder %s3685_s30, %s3680_s18 }
  0x27   : > { %p3683_p12 = pnand %p3682_p11, %p3681_p2 }
  0x28   : > { %p3688_p7 = por %p3687_p3, %p3686_p0 }
  0x29   : > { %p3684_p13 = pneg %p3683_p12 }
  0x2b   : > { %p3689_p9 = pnand %p3688_p7, %p3684_p13 }
  0x2d   : > { %3692 = shalt.err (!%p3689_p9)
}
  0x2e   : > { %s3792_s26 = smov 256   ;;  %s3793_s10 = smov 16  }
  0x2f   : > { %3400 = dma.hbm_to_vmem [thread:$0]  (!%p3929_p10), %s265_s12, 2048, %s267_s11, %s255_s15, %s3792_s26, %s3792_s26, %s3793_s10  }
  0x30   : > { %278 = sbr.rel (%p3875_p8) target bundleno = 1390 (0x56e), region = 44 }
  0x35   : > { %s3946_s29 = sand.u32 1, %s3774_s22  }
  0x36   : > { %s2663_s17 = sshll.u32 %s3946_s29, 7  ;;  %s281_s18 = scalar_lea.sflag [#allocation4], %s3946_s29 }
  0x37   : > { %s3952_s14 = scalar_lea.vmem [#allocation3], %s2663_s17 }
  0x38   : > { %3753 = dma.done.wait (%p3862_p4), %s281_s18, 2048  }
  0x39   : > { %3755 = vsyncadd (%p3862_p4), %s281_s18, 4294965248 }
  0x3a   : > { %3757 = dma.done.wait (%p45_p1), [#allocation7], 64  }
  0x3b   : > { %3759 = vsyncadd (%p45_p1), [#allocation7], 4294967232 }
  0x3c   : > { %3761 = dma.done.wait (%p45_p1), [#allocation10], 16384  }
  0x3d   : > { %3763 = vsyncadd (%p45_p1), [#allocation10], 4294950912  ;;  %v3967_v0 = vld [vmem:[%s3952_s14 + $0x40] sm:$0xff]  ;;  %v3970_v1 = vld [vmem:[%s3952_s14 + $0x48] sm:$0xff]  ;;  %v3794_v24 = vmov 256.0   ;;  %s4637_s11 = scalar_lea.vmem [#allocation12], %s2663_s17 }
  0x3e   : > { %v339_v2 = vld [vmem:[%s3952_s14 + $0x20] sm:$0xff]  ;;  %v365_v3 = vadd.f32 %v3970_v1, %v3967_v0  ;;  %v340_v4 = vld [vmem:[%s3952_s14 + $0x28] sm:$0xff]  ;;  %v345_v9 = vld [vmem:[%s3952_s14 + $0x50] sm:$0xff]  ;;  %3460 = vrcp.f32 %v3794_v24  ;;  %s3363_s12 = sshll.u32 %s3853_s25, 7  ;;  %s2538_s25 = sshll.u32 %s4637_s11, 4  ;;  %s2539_s25 = int_to_ptr.vmem [resolvable:$true] %s2538_s25 }
  0x3f   : > { %v335_v5 = vld [vmem:[%s3952_s14] sm:$0xff]  ;;  %v336_v6 = vld [vmem:[%s3952_s14 + $0x8] sm:$0xff]  ;;  %v359_v7 = vadd.f32 %v340_v4, %v339_v2  ;;  %v346_v10 = vld [vmem:[%s3952_s14 + $0x58] sm:$0xff]  ;;  %s2537_s30 = scalar_lea.hbm %s4725_s6, %s3363_s12  ;;  %s2526_s9 = scalar_lea.sflag [#allocation5], %s3946_s29 }
  0x40   : > { %v353_v8 = vadd.f32 %v336_v6, %v335_v5  ;;  %366 = vadd.xlane.f32.xlu2 %v365_v3  ;;  %v341_v11 = vld [vmem:[%s3952_s14 + $0x30] sm:$0xff]  ;;  %v342_v12 = vld [vmem:[%s3952_s14 + $0x38] sm:$0xff]  ;;  %v368_v15 = vadd.f32 %v346_v10, %v345_v9  ;;  %v3985_v18 = vld [vmem:[%s3952_s14 + $0x60] sm:$0xff]  ;;  %s2540_s7 = sshll.u32 %s2537_s30, 4  ;;  %s3728_s27 = scalar_lea.hbm %s4725_s6, 256  ;;  %s2541_s7 = int_to_ptr.hbm [resolvable:$true] %s2540_s7 }
  0x41   : > { %360 = vadd.xlane.f32.xlu1 %v359_v7  ;;  %v337_v13 = vld [vmem:[%s3952_s14 + $0x10] sm:$0xff]  ;;  %v338_v14 = vld [vmem:[%s3952_s14 + $0x18] sm:$0xff]  ;;  %v362_v16 = vadd.f32 %v342_v12, %v341_v11  ;;  %v3988_v19 = vld [vmem:[%s3952_s14 + $0x68] sm:$0xff]  ;;  %s3722_s26 = sshra.s32 %s2541_s7, 4  ;;  %s3723_s26 = int_to_ptr.hbm [resolvable:$true] %s3722_s26 }
  0x42   : > { %354 = vadd.xlane.f32.xlu0 %v353_v8  ;;  %v356_v17 = vadd.f32 %v338_v14, %v337_v13  ;;  %v3991_v20 = vld [vmem:[%s3952_s14 + $0x70] sm:$0xff]  ;;  %v3994_v21 = vld [vmem:[%s3952_s14 + $0x78] sm:$0xff]  ;;  %v371_v22 = vadd.f32 %v3988_v19, %v3985_v18  ;;  %s3724_s10 = scalar_lea.hbm %s3723_s26, 128  ;;  %p3729_p9 = scmp.lt.s32.totalorder %s3723_s26, %s4725_s6 }
  0x43   : > { %v374_v23 = vadd.f32 %v3994_v21, %v3991_v20  ;;  %p3725_p1 = scmp.ne.s32.totalorder %s3723_s26, %s3724_s10  ;;  %p3730_p10 = scmp.lt.s32.totalorder %s3728_s27, %s3724_s10 }
  0x44   : > { %v3461_v25 = vpop.eup %3460 }
  0x45   : > { %v378_v26 = vmul.f32 256.0, %v3461_v25  ;;  %vm382_vm0 = vweird.f32 %v3461_v25  ;;  %p3726_p4 = pnand %p3725_p1, %p3919_p5  ;;  %p3731_p2 = por %p3730_p10, %p3729_p9 }
  0x47   : > { %v379_v27 = vsub.f32 1.0, %v378_v26  ;;  %v3272_v26 = vld [vmem:[#allocation9 + $0x164] sm:$0xf0]  ;;  %p3727_p8 = pneg %p3726_p4 }
  0x48   : > { %369 = vadd.xlane.f32.xlu2 %v368_v15 }
  0x49   : > { %363 = vadd.xlane.f32.xlu1 %v362_v16  ;;  %v380_v28 = vmul.f32 %v3461_v25, %v379_v27  ;;  %v3031_v27 = vld [vmem:[#allocation9 + $0x2d0] sm:$0xf]  ;;  %p3732_p11 = pnand %p3731_p2, %p3727_p8 }
  0x4a   : > { %357 = vadd.xlane.f32.xlu0 %v356_v17 }
  0x4b   : > { %v381_v29 = vadd.f32 %v3461_v25, %v380_v28  ;;  %v3320_v28 = vld [vmem:[#allocation9 + $0x2e4] sm:$0xf0] }
  0x4d   : > { %v4000_v30 = vsel %vm382_vm0, %v3461_v25, %v381_v29  ;;  %v2839_v25 = vld [vmem:[#allocation9 + $0x150] sm:$0xf]  ;;  %v3269_v29 = vld [vmem:[#allocation9 + $0x154] sm:$0xf] }
  0x51   : > { %375 = vadd.xlane.f32.xlu1 %v374_v23 }
  0x52   : > { %372 = vadd.xlane.f32.xlu0 %v371_v22 }
  0xb3   : > { %v367_v31 = vpop.xlane.xlu2 %366 }
  0xb4   : > { %v361_v32 = vpop.xlane.xlu1 %360  ;;  %v388_v52 = vmul.f32 %v4000_v30, %v367_v31  ;;  %v3032_v31 = vor.u32 %v3320_v28, %v3031_v27  ;;  %v3248_v27 = vld [vmem:[#allocation9 + $0xa4] sm:$0xf0] }
  0xb5   : > { %v355_v33 = vpop.xlane.xlu0 %354  ;;  %v386_v34 = vmul.f32 %v4000_v30, %v361_v32 }
  0xb6   : > { %v384_v35 = vmul.f32 %v4000_v30, %v355_v33  ;;  %v4049_v3 = vsub.f32 %v3967_v0, %v388_v52  ;;  %v3317_v33 = vld [vmem:[#allocation9 + $0x2d4] sm:$0xf]  ;;  %1215 = vmatpush.bf16.msra.mxu1 %v3032_v31  ;;  %v2745_v31 = vld [vmem:[#allocation9 + $0xa8] sm:$0xf0] }
  0xb7   : > { %v4004_v36 = vsub.f32 %v339_v2, %v386_v34  ;;  %v4006_v37 = vsub.f32 %v340_v4, %v386_v34  ;;  %v4052_v4 = vsub.f32 %v3970_v1, %v388_v52  ;;  %v3033_v34 = vld [vmem:[#allocation9 + $0x2e8] sm:$0xf0]  ;;  %v2791_v52 = vld [vmem:[#allocation9 + $0xf0] sm:$0xf] }
  0xb8   : > { %v4008_v38 = vsub.f32 %v335_v5, %v384_v35  ;;  %v4010_v39 = vsub.f32 %v336_v6, %v384_v35  ;;  %v3036_v35 = vor.u32 %v3317_v33, %v3033_v34  ;;  %v3293_v34 = vld [vmem:[#allocation9 + $0x214] sm:$0xf] }
  0xb9   : > { %v412_v40 = vmul.f32 %v4004_v36, %v4004_v36  ;;  %v413_v41 = vmul.f32 %v4006_v37, %v4006_v37  ;;  %v417_v0 = vmul.f32 %v4052_v4, %v4052_v4 }
  0xba   : > { %v408_v42 = vmul.f32 %v4008_v38, %v4008_v38  ;;  %v409_v43 = vmul.f32 %v4010_v39, %v4010_v39  ;;  %1273 = vmatpush.bf16.msra.mxu3 %v3036_v35  ;;  %v2937_v35 = vld [vmem:[#allocation9 + $0x228] sm:$0xf0] }
  0xbb   : > { %v370_v44 = vpop.xlane.xlu2 %369  ;;  %v430_v45 = vadd.f32 %v413_v41, %v412_v40  ;;  %v2815_v40 = vld [vmem:[#allocation9 + $0x120] sm:$0xf]  ;;  %v3266_v41 = vld [vmem:[#allocation9 + $0x134] sm:$0xf0] }
  0xbc   : > { %v424_v46 = vadd.f32 %v409_v43, %v408_v42  ;;  %v389_v47 = vmul.f32 %v4000_v30, %v370_v44  ;;  %v364_v48 = vpop.xlane.xlu1 %363  ;;  %v3007_v42 = vld [vmem:[#allocation9 + $0x2a0] sm:$0xf]  ;;  %v2816_v43 = vor.u32 %v3266_v41, %v2815_v40  ;;  %v3314_v44 = vld [vmem:[#allocation9 + $0x2b4] sm:$0xf0]  ;;  %v2940_v40 = vor.u32 %v3293_v34, %v2937_v35 }
  0xbd   : > { %v358_v49 = vpop.xlane.xlu0 %357  ;;  %v387_v50 = vmul.f32 %v4000_v30, %v364_v48  ;;  %431 = vadd.xlane.f32.xlu1 %v430_v45  ;;  %v3263_v45 = vld [vmem:[#allocation9 + $0x124] sm:$0xf] }
  0xbe   : > { %v385_v51 = vmul.f32 %v4000_v30, %v358_v49  ;;  %425 = vadd.xlane.f32.xlu2 %v424_v46  ;;  %v4024_v53 = vsub.f32 %v345_v9, %v389_v47  ;;  %v4026_v54 = vsub.f32 %v346_v10, %v389_v47  ;;  %v2817_v46 = vld [vmem:[#allocation9 + $0x138] sm:$0xf0]  ;;  %v3008_v47 = vor.u32 %v3314_v44, %v3007_v42  ;;  %v3311_v49 = vld [vmem:[#allocation9 + $0x2a4] sm:$0xf] }
  0xbf   : > { %v4028_v55 = vsub.f32 %v341_v11, %v387_v50  ;;  %v4030_v56 = vsub.f32 %v342_v12, %v387_v50  ;;  %v416_v12 = vmul.f32 %v4049_v3, %v4049_v3  ;;  %v2820_v48 = vor.u32 %v3263_v45, %v2817_v46  ;;  %v3009_v50 = vld [vmem:[#allocation9 + $0x2b8] sm:$0xf0]  ;;  %v2719_v45 = vld [vmem:[#allocation9 + $0x60] sm:$0xf]  ;;  %v3242_v46 = vld [vmem:[#allocation9 + $0x74] sm:$0xf0] }
  0xc0   : > { %v4032_v57 = vsub.f32 %v337_v13, %v385_v51  ;;  %v4034_v58 = vsub.f32 %v338_v14, %v385_v51  ;;  %v418_v59 = vmul.f32 %v4024_v53, %v4024_v53  ;;  %v419_v60 = vmul.f32 %v4026_v54, %v4026_v54  ;;  %1216 = vmatpush.bf16.msra.mxu1 %v3008_v47  ;;  %v2911_v47 = vld [vmem:[#allocation9 + $0x1e0] sm:$0xf] }
  0xc1   : > { %v414_v61 = vmul.f32 %v4028_v55, %v4028_v55  ;;  %v415_v62 = vmul.f32 %v4030_v56, %v4030_v56  ;;  %v436_v22 = vadd.f32 %v417_v0, %v416_v12  ;;  %v3012_v51 = vor.u32 %v3311_v49, %v3009_v50  ;;  %v2959_v12 = vld [vmem:[#allocation9 + $0x240] sm:$0xf]  ;;  %v3290_v49 = vld [vmem:[#allocation9 + $0x1f4] sm:$0xf0]  ;;  %v3239_v50 = vld [vmem:[#allocation9 + $0x64] sm:$0xf] }
  0xc2   : > { %v410_v63 = vmul.f32 %v4032_v57, %v4032_v57  ;;  %v411_v2 = vmul.f32 %v4034_v58, %v4034_v58  ;;  %v439_v5 = vadd.f32 %v419_v60, %v418_v59  ;;  %v3260_v59 = vld [vmem:[#allocation9 + $0x104] sm:$0xf0]  ;;  %v2983_v60 = vld [vmem:[#allocation9 + $0x270] sm:$0xf] }
  0xc3   : > { %v433_v6 = vadd.f32 %v415_v62, %v414_v61  ;;  %1274 = vmatpush.bf16.msra.mxu3 %v3012_v51  ;;  %v2792_v61 = vor.u32 %v3260_v59, %v2791_v52  ;;  %v3308_v62 = vld [vmem:[#allocation9 + $0x284] sm:$0xf0]  ;;  %v2721_v51 = vld [vmem:[#allocation9 + $0x78] sm:$0xf0]  ;;  %v2912_v59 = vor.u32 %v3290_v49, %v2911_v47 }
  0xc4   : > { %v427_v7 = vadd.f32 %v411_v2, %v410_v63  ;;  %v376_v9 = vpop.xlane.xlu1 %375  ;;  %v3257_v63 = vld [vmem:[#allocation9 + $0xf4] sm:$0xf]  ;;  %v2793_v2 = vld [vmem:[#allocation9 + $0x108] sm:$0xf0] }
  0xc5   : > { %v373_v8 = vpop.xlane.xlu0 %372  ;;  %440 = vadd.xlane.f32.xlu1 %v439_v5  ;;  %v391_v11 = vmul.f32 %v4000_v30, %v376_v9  ;;  %v2984_v5 = vor.u32 %v3308_v62, %v2983_v60  ;;  %v2724_v60 = vor.u32 %v3239_v50, %v2721_v51 }
  0xc6   : > { %v390_v10 = vmul.f32 %v4000_v30, %v373_v8  ;;  %434 = vadd.xlane.f32.xlu2 %v433_v6  ;;  %428 = vadd.xlane.f32.xlu0 %v427_v7  ;;  %v2796_v6 = vor.u32 %v3257_v63, %v2793_v2  ;;  %v3305_v7 = vld [vmem:[#allocation9 + $0x274] sm:$0xf]  ;;  %v2985_v8 = vld [vmem:[#allocation9 + $0x288] sm:$0xf0]  ;;  %v2913_v63 = vld [vmem:[#allocation9 + $0x1f8] sm:$0xf0] }
  0xc7   : > { %v4071_v16 = vsub.f32 %v3991_v20, %v391_v11  ;;  %v4074_v17 = vsub.f32 %v3994_v21, %v391_v11  ;;  %v2840_v20 = vor.u32 %v3272_v26, %v2839_v25  ;;  %v2841_v21 = vld [vmem:[#allocation9 + $0x168] sm:$0xf0]  ;;  %v2988_v9 = vor.u32 %v3305_v7, %v2985_v8  ;;  %1217 = vmatpush.bf16.msra.mxu1 %v2984_v5  ;;  %v3254_v11 = vld [vmem:[#allocation9 + $0xd4] sm:$0xf0]  ;;  %v2743_v26 = vld [vmem:[#allocation9 + $0x90] sm:$0xf] }
  0xc8   : > { %v4061_v1 = vsub.f32 %v3985_v18, %v390_v10  ;;  %v4064_v13 = vsub.f32 %v3988_v19, %v390_v10  ;;  %v2844_v32 = vor.u32 %v3269_v29, %v2841_v21  ;;  %v2767_v10 = vld [vmem:[#allocation9 + $0xc0] sm:$0xf]  ;;  %v2744_v28 = vor.u32 %v3248_v27, %v2743_v26  ;;  %v3296_v29 = vld [vmem:[#allocation9 + $0x224] sm:$0xf0]  ;;  %v3245_v21 = vld [vmem:[#allocation9 + $0x94] sm:$0xf] }
  0xc9   : > { %v422_v18 = vmul.f32 %v4071_v16, %v4071_v16  ;;  %v423_v19 = vmul.f32 %v4074_v17, %v4074_v17  ;;  %1186 = vmatpush.bf16.msra.mxu0 %v2840_v20  ;;  %1275 = vmatpush.bf16.msra.mxu3 %v2988_v9  ;;  %v2768_v0 = vor.u32 %v3254_v11, %v2767_v10  ;;  %v2935_v20 = vld [vmem:[#allocation9 + $0x210] sm:$0xf]  ;;  %v3284_v9 = vld [vmem:[#allocation9 + $0x1c4] sm:$0xf0]  ;;  %v3233_v10 = vld [vmem:[#allocation9 + $0x34] sm:$0xf] }
  0xca   : > { %v420_v14 = vmul.f32 %v4061_v1, %v4061_v1  ;;  %v421_v15 = vmul.f32 %v4064_v13, %v4064_v13  ;;  %1244 = vmatpush.bf16.msra.mxu2 %v2844_v32  ;;  %v2936_v32 = vor.u32 %v3296_v29, %v2935_v20  ;;  %v2748_v33 = vor.u32 %v3245_v21, %v2745_v31  ;;  %v2695_v5 = vld [vmem:[#allocation9 + $0x30] sm:$0xf]  ;;  %v2697_v11 = vld [vmem:[#allocation9 + $0x48] sm:$0xf0]  ;;  %v2863_v26 = vld [vmem:[#allocation9 + $0x180] sm:$0xf] }
  0xcb   : > { %v445_v24 = vadd.f32 %v423_v19, %v422_v18  ;;  %v3299_v19 = vld [vmem:[#allocation9 + $0x244] sm:$0xf]  ;;  %v2887_v7 = vld [vmem:[#allocation9 + $0x1b0] sm:$0xf]  ;;  %v2673_v21 = vld [vmem:[#allocation9 + $0x18] sm:$0xf0] }
  0xcc   : > { %v442_v23 = vadd.f32 %v421_v15, %v420_v14  ;;  %v3302_v14 = vld [vmem:[#allocation9 + $0x254] sm:$0xf0]  ;;  %v3251_v15 = vld [vmem:[#allocation9 + $0xc4] sm:$0xf] }
  0xcd   : > { %1187 = vmatpush.bf16.msra.mxu0 %v2816_v43  ;;  %v3227_v29 = vld [vmem:[#allocation9 + $0x4] sm:$0xf] }
  0xce   : > { %443 = vadd.xlane.f32.xlu2 %v442_v23  ;;  %437 = vadd.xlane.f32.xlu0 %v436_v22  ;;  %v2769_v22 = vld [vmem:[#allocation9 + $0xd8] sm:$0xf0]  ;;  %v2960_v23 = vor.u32 %v3302_v14, %v2959_v12  ;;  %v2888_v12 = vor.u32 %v3284_v9, %v2887_v7  ;;  %v3281_v14 = vld [vmem:[#allocation9 + $0x1b4] sm:$0xf] }
  0xcf   : > { %1245 = vmatpush.bf16.msra.mxu2 %v2820_v48  ;;  %v2772_v18 = vor.u32 %v3251_v15, %v2769_v22  ;;  %v2720_v48 = vor.u32 %v3242_v46, %v2719_v45  ;;  %v2889_v15 = vld [vmem:[#allocation9 + $0x1c8] sm:$0xf0]  ;;  %v351_v7 = vld [vmem:[#allocation6] sm:$0x3] }
  0xd0   : > { %1218 = vmatpush.bf16.msra.mxu1 %v2960_v23  ;;  %v2892_v23 = vor.u32 %v3281_v14, %v2889_v15  ;;  %v4112_v14 = vperm.slane %v351_v7, 0 }
  0xd1   : > { %1188 = vmatpush.bf16.msra.mxu0 %v2792_v61  ;;  %v3287_v61 = vld [vmem:[#allocation9 + $0x1e4] sm:$0xf] }
  0xd2   : > { %v2916_v2 = vor.u32 %v3287_v61, %v2913_v63 }
  0xd3   : > { %1246 = vmatpush.bf16.msra.mxu2 %v2796_v6  ;;  %v3236_v6 = vld [vmem:[#allocation9 + $0x44] sm:$0xf0] }
  0xd4   : > { %1219 = vmatpush.bf16.msra.mxu1 %v2936_v32  ;;  %v2696_v8 = vor.u32 %v3236_v6, %v2695_v5 }
  0xd5   : > { %1189 = vmatpush.bf16.msra.mxu0 %v2768_v0  ;;  %v2700_v0 = vor.u32 %v3233_v10, %v2697_v11 }
  0xd6   : > { %446 = vadd.xlane.f32.xlu0 %v445_v24  ;;  %v2961_v24 = vld [vmem:[#allocation9 + $0x258] sm:$0xf0] }
  0xd7   : > { %v2964_v25 = vor.u32 %v3299_v19, %v2961_v24  ;;  %1247 = vmatpush.bf16.msra.mxu2 %v2772_v18  ;;  %v2671_v24 = vld [vmem:[#allocation9] sm:$0xf] }
  0xd8   : > { %1220 = vmatpush.bf16.msra.mxu1 %v2912_v59 }
  0xd9   : > { %1276 = vmatpush.bf16.msra.mxu3 %v2964_v25  ;;  %1190 = vmatpush.bf16.msra.mxu0 %v2744_v28  ;;  %v3230_v25 = vld [vmem:[#allocation9 + $0x14] sm:$0xf0] }
  0xda   : > { %v2672_v20 = vor.u32 %v3230_v25, %v2671_v24  ;;  %v3278_v28 = vld [vmem:[#allocation9 + $0x194] sm:$0xf0] }
  0xdb   : > { %1248 = vmatpush.bf16.msra.mxu2 %v2748_v33  ;;  %v2864_v32 = vor.u32 %v3278_v28, %v2863_v26  ;;  %v2676_v33 = vor.u32 %v3227_v29, %v2673_v21 }
  0xdc   : > { %1221 = vmatpush.bf16.msra.mxu1 %v2888_v12 }
  0xdd   : > { %1277 = vmatpush.bf16.msra.mxu3 %v2940_v40  ;;  %1191 = vmatpush.bf16.msra.mxu0 %v2720_v48 }
  0xdf   : > { %1249 = vmatpush.bf16.msra.mxu2 %v2724_v60 }
  0xe0   : > { %1222 = vmatpush.bf16.msra.mxu1 %v2864_v32 }
  0xe1   : > { %1278 = vmatpush.bf16.msra.mxu3 %v2916_v2  ;;  %1192 = vmatpush.bf16.msra.mxu0 %v2696_v8 }
  0xe3   : > { %1250 = vmatpush.bf16.msra.mxu2 %v2700_v0  ;;  %v352_v0 = vld [vmem:[#allocation8] sm:$0x3] }
  0xe4   : > { %v4123_v28 = vperm.slane %v352_v0, 1 }
  0xe5   : > { %1279 = vmatpush.bf16.msra.mxu3 %v2892_v23  ;;  %1193 = vmatpush.bf16.msra.mxu0 %v2672_v20  ;;  %v4121_v20 = vperm.slane %v352_v0, 0 }
  0xe7   : > { %1251 = vmatpush.bf16.msra.mxu2 %v2676_v33 }
 0x130   : > { %v432_v41 = vpop.xlane.xlu1 %431 }
 0x131   : > { %v426_v42 = vpop.xlane.xlu2 %425  ;;  %v450_v43 = vmul.f32 %v432_v41, %v4000_v30  ;;  %v3275_v41 = vld [vmem:[#allocation9 + $0x184] sm:$0xf] }
 0x132   : > { %v448_v44 = vmul.f32 %v426_v42, %v4000_v30  ;;  %v2865_v42 = vld [vmem:[#allocation9 + $0x198] sm:$0xf0] }
 0x133   : > { %v4084_v62 = vadd.f32 1e-05, %v450_v43  ;;  %v2868_v46 = vor.u32 %v3275_v41, %v2865_v42 }
 0x134   : > { %v4082_v52 = vadd.f32 1e-05, %v448_v44 }
 0x135   : > { %1280 = vmatpush.bf16.msra.mxu3 %v2868_v46  ;;  %vm490_vm9 = vweird.f32 %v4084_v62 }
 0x136   : > { %3462 = vrsqrt.f32 %v4082_v52  ;;  %vm470_vm2 = vweird.f32 %v4082_v52 }
 0x137   : > { %3464 = vrsqrt.f32 %v4084_v62 }
 0x138   : > { %v441_v35 = vpop.xlane.xlu1 %440 }
 0x139   : > { %v435_v22 = vpop.xlane.xlu2 %434  ;;  %v429_v19 = vpop.xlane.xlu0 %428  ;;  %v453_v45 = vmul.f32 %v441_v35, %v4000_v30 }
 0x13a   : > { %v451_v18 = vmul.f32 %v435_v22, %v4000_v30  ;;  %v449_v27 = vmul.f32 %v429_v19, %v4000_v30  ;;  %v4114_v22 = vperm.slane %v351_v7, 1 }
 0x13b   : > { %v4099_v59 = vadd.f32 1e-05, %v453_v45 }
 0x13c   : > { %v4090_v31 = vadd.f32 1e-05, %v451_v18  ;;  %v3463_v34 = vpop.eup %3462  ;;  %v457_v40 = vadd.f32 1e-05, %v449_v27 }
 0x13d   : > { %v465_v43 = vmul.f32 %v3463_v34, %v4082_v52  ;;  %v4095_v47 = vpop.eup %3464  ;;  %vm471_vm1 = vweird.f32 %v3463_v34  ;;  %vm520_vm13 = vweird.f32 %v4099_v59 }
 0x13e   : > { %3466 = vrsqrt.f32 %v4090_v31  ;;  %v485_v50 = vmul.f32 %v4095_v47, %v4084_v62  ;;  %vm472_vm3 = vmor %vm470_vm2, %vm471_vm1  ;;  %vm480_vm5 = vweird.f32 %v457_v40  ;;  %vm500_vm6 = vweird.f32 %v4090_v31 }
 0x13f   : > { %v466_v44 = vmul.f32 %v3463_v34, %v465_v43  ;;  %3468 = vrsqrt.f32 %v457_v40  ;;  %vm491_vm10 = vweird.f32 %v4095_v47 }
 0x140   : > { %v486_v8 = vmul.f32 %v4095_v47, %v485_v50  ;;  %3470 = vrsqrt.f32 %v4099_v59  ;;  %vm492_vm12 = vmor %vm490_vm9, %vm491_vm10  ;;  %vm1635_vm9 = vcmask 523264  }
 0x141   : > { %v467_v48 = vmul.f32 0.5, %v466_v44  ;;  %v438_v49 = vpop.xlane.xlu0 %437  ;;  %v444_v26 = vpop.xlane.xlu2 %443 }
 0x142   : > { %v452_v60 = vmul.f32 %v438_v49, %v4000_v30  ;;  %v487_v52 = vmul.f32 0.5, %v486_v8 }
 0x143   : > { %v468_v51 = vsub.f32 1.5, %v467_v48 }
 0x144   : > { %v4102_v61 = vpop.eup %3466  ;;  %v4110_v10 = vadd.f32 1e-05, %v452_v60  ;;  %v488_v32 = vsub.f32 1.5, %v487_v52 }
 0x145   : > { %v3469_v63 = vpop.eup %3468  ;;  %v469_v2 = vmul.f32 %v3463_v34, %v468_v51  ;;  %v495_v5 = vmul.f32 %v4102_v61, %v4090_v31  ;;  %vm501_vm8 = vweird.f32 %v4102_v61 }
 0x146   : > { %v475_v6 = vmul.f32 %v3469_v63, %v457_v40  ;;  %3472 = vrsqrt.f32 %v4110_v10  ;;  %vm481_vm4 = vweird.f32 %v3469_v63  ;;  %v4119_v27 = vpop.eup %3470  ;;  %vm502_vm11 = vmor %vm500_vm6, %vm501_vm8  ;;  %vm510_vm15 = vweird.f32 %v4110_v10 }
 0x147   : > { %v496_v9 = vmul.f32 %v4102_v61, %v495_v5  ;;  %v473_v12 = vsel %vm472_vm3, %v3463_v34, %v469_v2  ;;  %vm482_vm7 = vmor %vm480_vm5, %vm481_vm4  ;;  %v515_v35 = vmul.f32 %v4119_v27, %v4099_v59  ;;  %vm521_vm14 = vweird.f32 %v4119_v27  ;;  %v3288_v59 = vld [vmem:[#allocation9 + $0x1ec] sm:$0xf] }
 0x148   : > { %v476_v11 = vmul.f32 %v3469_v63, %v475_v6  ;;  %v544_v19 = vmul.f32 %v473_v12, %v4008_v38  ;;  %v545_v24 = vmul.f32 %v473_v12, %v4010_v39  ;;  %v454_v38 = vmul.f32 %v444_v26, %v4000_v30  ;;  %v3039_v12 = vld [vmem:[#allocation9 + $0x2d8] sm:$0xf]  ;;  %v3041_v26 = vld [vmem:[#allocation9 + $0x2f0] sm:$0xf0]  ;;  %vm4200_vm1 = vmor %vm520_vm13, %vm521_vm14 }
 0x149   : > { %v497_v23 = vmul.f32 0.5, %v496_v9  ;;  %v447_v18 = vpop.xlane.xlu0 %446  ;;  %v516_v62 = vmul.f32 %v4119_v27, %v515_v35 }
 0x14a   : > { %v477_v15 = vmul.f32 0.5, %v476_v11  ;;  %v455_v21 = vmul.f32 %v447_v18, %v4000_v30  ;;  %v565_v39 = vmul.f32 %v4112_v14, %v544_v19  ;;  %v566_v34 = vmul.f32 %v4114_v22, %v545_v24  ;;  %v3273_v11 = vld [vmem:[#allocation9 + $0x16c] sm:$0xf0]  ;;  %v3270_v18 = vld [vmem:[#allocation9 + $0x15c] sm:$0xf] }
 0x14b   : > { %v498_v33 = vsub.f32 1.5, %v497_v23  ;;  %v4146_v49 = vadd.f32 1e-05, %v454_v38  ;;  %v517_v31 = vmul.f32 0.5, %v516_v62  ;;  %v3321_v23 = vld [vmem:[#allocation9 + $0x2ec] sm:$0xf0] }
 0x14c   : > { %v478_v25 = vsub.f32 1.5, %v477_v15  ;;  %v4132_v42 = vpop.eup %3472  ;;  %v4137_v44 = vadd.f32 1e-05, %v455_v21  ;;  %v587_v50 = vadd.f32 %v4123_v28, %v566_v34  ;;  %v2849_v19 = vld [vmem:[#allocation9 + $0x170] sm:$0xf0]  ;;  %v3040_v24 = vor.u32 %v3321_v23, %v3039_v12 }
 0x14d   : > { %v505_v30 = vmul.f32 %v4132_v42, %v4110_v10  ;;  %v499_v45 = vmul.f32 %v4102_v61, %v498_v33  ;;  %v3015_v33 = vld [vmem:[#allocation9 + $0x2a8] sm:$0xf]  ;;  %v2852_v34 = vor.u32 %v3270_v18, %v2849_v19  ;;  %vm511_vm0 = vweird.f32 %v4132_v42  ;;  %v2993_v23 = vld [vmem:[#allocation9 + $0x290] sm:$0xf0] }
 0x14e   : > { %v479_v29 = vmul.f32 %v3469_v63, %v478_v25  ;;  %3474 = vrsqrt.f32 %v4137_v44  ;;  %v3318_v25 = vld [vmem:[#allocation9 + $0x2dc] sm:$0xf]  ;;  %1331 = vmatpush.bf16.msrb.mxu1 %v3040_v24  ;;  %vm4211_vm2 = vmor %vm510_vm15, %vm511_vm0  ;;  %v2775_v24 = vld [vmem:[#allocation9 + $0xc8] sm:$0xf]  ;;  %vm540_vm3 = vweird.f32 %v4137_v44  ;;  %vm530_vm5 = vweird.f32 %v4146_v49 }
 0x14f   : > { %v503_v2 = vsel %vm502_vm11, %v4102_v61, %v499_v45  ;;  %3476 = vrsqrt.f32 %v4146_v49  ;;  %v2847_v61 = vld [vmem:[#allocation9 + $0x158] sm:$0xf]  ;;  %v3044_v35 = vor.u32 %v3318_v25, %v3041_v26  ;;  %1360 = vmatpush.bf16.msrb.mxu2 %v2852_v34  ;;  %v3255_v25 = vld [vmem:[#allocation9 + $0xdc] sm:$0xf0]  ;;  %v3300_v34 = vld [vmem:[#allocation9 + $0x24c] sm:$0xf] }
 0x150   : > { %v483_v41 = vsel %vm482_vm7, %v3469_v63, %v479_v29  ;;  %v506_v63 = vmul.f32 %v4132_v42, %v505_v30  ;;  %v550_v9 = vmul.f32 %v503_v2, %v4028_v55  ;;  %v551_v15 = vmul.f32 %v503_v2, %v4030_v56  ;;  %v2823_v29 = vld [vmem:[#allocation9 + $0x128] sm:$0xf]  ;;  %v3267_v56 = vld [vmem:[#allocation9 + $0x13c] sm:$0xf0]  ;;  %v2825_v30 = vld [vmem:[#allocation9 + $0x140] sm:$0xf0] }
 0x151   : > { %v546_v40 = vmul.f32 %v483_v41, %v4032_v57  ;;  %v547_v43 = vmul.f32 %v483_v41, %v4034_v58  ;;  %v489_v57 = vmul.f32 %v4095_v47, %v488_v32  ;;  %v586_v58 = vadd.f32 %v4121_v20, %v565_v39  ;;  %1389 = vmatpush.bf16.msrb.mxu3 %v3044_v35  ;;  %v2969_v35 = vld [vmem:[#allocation9 + $0x260] sm:$0xf0] }
 0x152   : > { %v4167_v8 = vmul.f32 0.5, %v506_v63  ;;  %v2848_v52 = vor.u32 %v3273_v11, %v2847_v61  ;;  %v518_v32 = vsub.f32 1.5, %v517_v31  ;;  %v571_v39 = vmul.f32 %v4112_v14, %v550_v9  ;;  %v2991_v63 = vld [vmem:[#allocation9 + $0x278] sm:$0xf]  ;;  %v3258_v9 = vld [vmem:[#allocation9 + $0xfc] sm:$0xf] }
 0x153   : > { %v567_v46 = vmul.f32 %v4112_v14, %v546_v40  ;;  %v568_v48 = vmul.f32 %v4114_v22, %v547_v43  ;;  %v493_v7 = vsel %vm492_vm12, %v4095_v47, %v489_v57  ;;  %v2824_v41 = vor.u32 %v3267_v56, %v2823_v29  ;;  %v3315_v40 = vld [vmem:[#allocation9 + $0x2bc] sm:$0xf0]  ;;  %v3264_v43 = vld [vmem:[#allocation9 + $0x12c] sm:$0xf]  ;;  %v2801_v61 = vld [vmem:[#allocation9 + $0x110] sm:$0xf0] }
 0x154   : > { %v4174_v0 = vpop.eup %3474  ;;  %v548_v47 = vmul.f32 %v493_v7, %v4004_v36  ;;  %v549_v21 = vmul.f32 %v493_v7, %v4006_v37  ;;  %v508_v36 = vsub.f32 1.5, %v4167_v8  ;;  %1302 = vmatpush.bf16.msrb.mxu0 %v2848_v52  ;;  %v572_v45 = vmul.f32 %v4114_v22, %v551_v15  ;;  %v3312_v57 = vld [vmem:[#allocation9 + $0x2ac] sm:$0xf]  ;;  %v3309_v8 = vld [vmem:[#allocation9 + $0x28c] sm:$0xf0] }
 0x155   : > { %v588_v51 = vadd.f32 %v4121_v20, %v567_v46  ;;  %v589_v60 = vadd.f32 %v4123_v28, %v568_v48  ;;  %v535_v55 = vmul.f32 %v4174_v0, %v4137_v44  ;;  %v4184_v38 = vpop.eup %3476  ;;  %v3016_v48 = vor.u32 %v3315_v40, %v3015_v33  ;;  %v3306_v52 = vld [vmem:[#allocation9 + $0x27c] sm:$0xf]  ;;  %v3252_v56 = vld [vmem:[#allocation9 + $0xcc] sm:$0xf] }
 0x156   : > { %v569_v37 = vmul.f32 %v4112_v14, %v548_v47  ;;  %v2828_v62 = vor.u32 %v3264_v43, %v2825_v30  ;;  %v570_v2 = vmul.f32 %v4114_v22, %v549_v21  ;;  %v525_v7 = vmul.f32 %v4184_v38, %v4146_v49 }
 0x157   : > { %v4161_v5 = vpack.c.bf16 %v588_v51, %v586_v58  ;;  %v4163_v6 = vpack.c.bf16 %v589_v60, %v587_v50  ;;  %v536_v46 = vmul.f32 %v4174_v0, %v535_v55  ;;  %v3017_v58 = vld [vmem:[#allocation9 + $0x2c0] sm:$0xf0]  ;;  %v2799_v50 = vld [vmem:[#allocation9 + $0xf8] sm:$0xf]  ;;  %v3261_v60 = vld [vmem:[#allocation9 + $0x10c] sm:$0xf0]  ;;  %v519_v11 = vmul.f32 %v4119_v27, %v518_v32  ;;  %1332 = vmatpush.bf16.msrb.mxu1 %v3016_v48 }
 0x158   : > { %v3020_v51 = vor.u32 %v3312_v57, %v3017_v58  ;;  %1303 = vmatpush.bf16.msrb.mxu0 %v2824_v41  ;;  %v2800_v31 = vor.u32 %v3261_v60, %v2799_v50  ;;  %v592_v47 = vadd.f32 %v4121_v20, %v571_v39  ;;  %v2992_v15 = vor.u32 %v3309_v8, %v2991_v63  ;;  %v2967_v32 = vld [vmem:[#allocation9 + $0x248] sm:$0xf]  ;;  %v2777_v39 = vld [vmem:[#allocation9 + $0xe0] sm:$0xf0] }
 0x159   : > { %1194 = vmatmul.bf16.vlgmr.msra.gmra.mxu0 %v4161_v5  ;;  %1223 = vmatmul.bf16.vlgmr.msra.gmra.mxu1 %v4163_v6  ;;  %v593_v18 = vadd.f32 %v4123_v28, %v572_v45  ;;  %v509_v19 = vmul.f32 %v4132_v42, %v508_v36  ;;  %v4215_v55 = vmul.f32 0.5, %v536_v46  ;;  %v590_v26 = vadd.f32 %v4121_v20, %v569_v37  ;;  %v3303_v36 = vld [vmem:[#allocation9 + $0x25c] sm:$0xf0] }
 0x15a   : > { %1252 = vmatmul.bf16.vlgmr.msra.gmra.mxu2 %v4161_v5  ;;  %1281 = vmatmul.bf16.vlgmr.msra.gmra.mxu3 %v4163_v6  ;;  %v2804_v29 = vor.u32 %v3258_v9, %v2801_v61  ;;  %v2996_v21 = vor.u32 %v3306_v52, %v2993_v23  ;;  %v591_v33 = vadd.f32 %v4123_v28, %v570_v2  ;;  %v3297_v2 = vld [vmem:[#allocation9 + $0x22c] sm:$0xf0]  ;;  %v2945_v9 = vld [vmem:[#allocation9 + $0x230] sm:$0xf0]  ;;  %v2727_v61 = vld [vmem:[#allocation9 + $0x68] sm:$0xf]  ;;  %vm541_vm4 = vweird.f32 %v4174_v0 }
 0x15b   : > { %1361 = vmatpush.bf16.msrb.mxu2 %v2828_v62  ;;  %1390 = vmatpush.bf16.msrb.mxu3 %v3020_v51  ;;  %v526_v10 = vmul.f32 %v4184_v38, %v525_v7  ;;  %v523_v41 = vsel %vm4200_vm1, %v4119_v27, %v519_v11  ;;  %v4223_v40 = vpack.c.bf16 %v592_v47, %v590_v26  ;;  %v538_v58 = vsub.f32 1.5, %v4215_v55  ;;  %v3249_v62 = vld [vmem:[#allocation9 + $0xac] sm:$0xf0]  ;;  %v2943_v51 = vld [vmem:[#allocation9 + $0x218] sm:$0xf]  ;;  %vm4256_vm6 = vmor %vm540_vm3, %vm541_vm4 }
 0x15c   : > { %1304 = vmatpush.bf16.msrb.mxu0 %v2800_v31  ;;  %1333 = vmatpush.bf16.msrb.mxu1 %v2992_v15  ;;  %v4225_v43 = vpack.c.bf16 %v593_v18, %v591_v33  ;;  %v513_v30 = vsel %vm4211_vm2, %v4132_v42, %v509_v19  ;;  %v2776_v37 = vor.u32 %v3255_v25, %v2775_v24  ;;  %v2751_v42 = vld [vmem:[#allocation9 + $0x98] sm:$0xf]  ;;  %v3246_v7 = vld [vmem:[#allocation9 + $0x9c] sm:$0xf]  ;;  %v2753_v31 = vld [vmem:[#allocation9 + $0xb0] sm:$0xf0]  ;;  %vm531_vm7 = vweird.f32 %v4184_v38 }
 0x15d   : > { %v2968_v45 = vor.u32 %v3303_v36, %v2967_v32  ;;  %v2780_v46 = vor.u32 %v3252_v56, %v2777_v39  ;;  %v2972_v48 = vor.u32 %v3300_v34, %v2969_v35  ;;  %v4230_v57 = vmul.f32 0.5, %v526_v10  ;;  %v3243_v47 = vld [vmem:[#allocation9 + $0x7c] sm:$0xf0]  ;;  %v2919_v15 = vld [vmem:[#allocation9 + $0x1e8] sm:$0xf]  ;;  %vm532_vm8 = vmor %vm530_vm5, %vm531_vm7 }
 0x15e   : > { %v554_v27 = vmul.f32 %v523_v41, %v4024_v53  ;;  %v552_v50 = vmul.f32 %v513_v30, %v4049_v3  ;;  %v553_v60 = vmul.f32 %v513_v30, %v4052_v4  ;;  %v2752_v63 = vor.u32 %v3249_v62, %v2751_v42  ;;  %v3294_v3 = vld [vmem:[#allocation9 + $0x21c] sm:$0xf]  ;;  %v3291_v52 = vld [vmem:[#allocation9 + $0x1fc] sm:$0xf0]  ;;  %v3240_v18 = vld [vmem:[#allocation9 + $0x6c] sm:$0xf] }
 0x15f   : > { %1362 = vmatpush.bf16.msrb.mxu2 %v2804_v29  ;;  %1391 = vmatpush.bf16.msrb.mxu3 %v2996_v21  ;;  %v2944_v53 = vor.u32 %v3297_v2, %v2943_v51  ;;  %v2756_v8 = vor.u32 %v3246_v7, %v2753_v31  ;;  %v555_v11 = vmul.f32 %v523_v41, %v4026_v54  ;;  %v2729_v19 = vld [vmem:[#allocation9 + $0x80] sm:$0xf0]  ;;  %v2703_v21 = vld [vmem:[#allocation9 + $0x38] sm:$0xf]  ;;  %v3237_v54 = vld [vmem:[#allocation9 + $0x4c] sm:$0xf0] }
 0x160   : > { %1305 = vmatpush.bf16.msrb.mxu0 %v2776_v37  ;;  %1334 = vmatpush.bf16.msrb.mxu1 %v2968_v45  ;;  %v2948_v12 = vor.u32 %v3294_v3, %v2945_v9  ;;  %v575_v4 = vmul.f32 %v4112_v14, %v554_v27  ;;  %v573_v23 = vmul.f32 %v4112_v14, %v552_v50  ;;  %v2921_v29 = vld [vmem:[#allocation9 + $0x200] sm:$0xf0]  ;;  %v2895_v56 = vld [vmem:[#allocation9 + $0x1b8] sm:$0xf]  ;;  %v3285_v33 = vld [vmem:[#allocation9 + $0x1cc] sm:$0xf0] }
 0x161   : > { %v574_v24 = vmul.f32 %v4114_v22, %v553_v60  ;;  %v2728_v25 = vor.u32 %v3243_v47, %v2727_v61  ;;  %v2920_v26 = vor.u32 %v3291_v52, %v2919_v15  ;;  %v2732_v32 = vor.u32 %v3240_v18, %v2729_v19  ;;  %v3234_v10 = vld [vmem:[#allocation9 + $0x3c] sm:$0xf]  ;;  %v2705_v34 = vld [vmem:[#allocation9 + $0x50] sm:$0xf0]  ;;  %v2679_v42 = vld [vmem:[#allocation9 + $0x8] sm:$0xf] }
 0x162   : > { %v2924_v36 = vor.u32 %v3288_v59, %v2921_v29  ;;  %v576_v39 = vmul.f32 %v4114_v22, %v555_v11  ;;  %v3282_v35 = vld [vmem:[#allocation9 + $0x1bc] sm:$0xf]  ;;  %v2897_v41 = vld [vmem:[#allocation9 + $0x1d0] sm:$0xf0]  ;;  %v596_v30 = vadd.f32 %v4121_v20, %v575_v4  ;;  %v528_v37 = vsub.f32 1.5, %v4230_v57 }
 0x163   : > { %1363 = vmatpush.bf16.msrb.mxu2 %v2780_v46  ;;  %1392 = vmatpush.bf16.msrb.mxu3 %v2972_v48  ;;  %v594_v45 = vadd.f32 %v4121_v20, %v573_v23  ;;  %v595_v46 = vadd.f32 %v4123_v28, %v574_v24  ;;  %v2704_v27 = vor.u32 %v3237_v54, %v2703_v21  ;;  %v3231_v57 = vld [vmem:[#allocation9 + $0x1c] sm:$0xf0]  ;;  %v2871_v60 = vld [vmem:[#allocation9 + $0x188] sm:$0xf]  ;;  %v3228_v2 = vld [vmem:[#allocation9 + $0xc] sm:$0xf] }
 0x164   : > { %1306 = vmatpush.bf16.msrb.mxu0 %v2752_v63  ;;  %1335 = vmatpush.bf16.msrb.mxu1 %v2944_v53  ;;  %v2896_v50 = vor.u32 %v3285_v33, %v2895_v56  ;;  %v539_v62 = vmul.f32 %v4174_v0, %v538_v58  ;;  %v2708_v51 = vor.u32 %v3234_v10, %v2705_v34  ;;  %v3279_v63 = vld [vmem:[#allocation9 + $0x19c] sm:$0xf0]  ;;  %v2681_v31 = vld [vmem:[#allocation9 + $0x20] sm:$0xf0]  ;;  %v3276_v53 = vld [vmem:[#allocation9 + $0x18c] sm:$0xf] }
 0x165   : > { %v2900_v44 = vor.u32 %v3282_v35, %v2897_v41  ;;  %v597_v7 = vadd.f32 %v4123_v28, %v576_v39  ;;  %v529_v3 = vmul.f32 %v4184_v38, %v528_v37  ;;  %v4266_v9 = vpack.c.bf16 %v596_v30, %v594_v45  ;;  %v2857_v29 = vld [vmem:[#allocation9 + $0x178] sm:$0xf0]  ;;  %v2831_v56 = vld [vmem:[#allocation9 + $0x130] sm:$0xf]  ;;  %v3268_v10 = vld [vmem:[#allocation9 + $0x144] sm:$0xf0] }
 0x166   : > { %v2680_v58 = vor.u32 %v3231_v57, %v2679_v42  ;;  %v2872_v61 = vor.u32 %v3279_v63, %v2871_v60  ;;  %v543_v11 = vsel %vm4256_vm6, %v4174_v0, %v539_v62  ;;  %v3023_v39 = vld [vmem:[#allocation9 + $0x2b0] sm:$0xf]  ;;  %v3316_v34 = vld [vmem:[#allocation9 + $0x2c4] sm:$0xf0]  ;;  %v2832_v35 = vor.u32 %v3268_v10, %v2831_v56  ;;  %v3265_v30 = vld [vmem:[#allocation9 + $0x134] sm:$0xf] }
 0x167   : > { %1364 = vmatpush.bf16.msrb.mxu2 %v2756_v8  ;;  %1393 = vmatpush.bf16.msrb.mxu3 %v2948_v12  ;;  %v2873_v8 = vld [vmem:[#allocation9 + $0x1a0] sm:$0xf0]  ;;  %v4272_v55 = vpack.c.bf16 %v597_v7, %v595_v46  ;;  %v2684_v12 = vor.u32 %v3228_v2, %v2681_v31  ;;  %v533_v49 = vsel %vm532_vm8, %v4184_v38, %v529_v3  ;;  %v2833_v37 = vld [vmem:[#allocation9 + $0x148] sm:$0xf0]  ;;  %v3313_v45 = vld [vmem:[#allocation9 + $0x2b4] sm:$0xf] }
 0x168   : > { %1307 = vmatpush.bf16.msrb.mxu0 %v2728_v25  ;;  %1336 = vmatpush.bf16.msrb.mxu1 %v2920_v26  ;;  %v2876_v47 = vor.u32 %v3276_v53, %v2873_v8  ;;  %v558_v15 = vmul.f32 %v543_v11, %v4071_v16  ;;  %v559_v52 = vmul.f32 %v543_v11, %v4074_v17  ;;  %v3271_v26 = vld [vmem:[#allocation9 + $0x164] sm:$0xf]  ;;  %v3025_v48 = vld [vmem:[#allocation9 + $0x2c8] sm:$0xf0]  ;;  %v2999_v57 = vld [vmem:[#allocation9 + $0x280] sm:$0xf] }
 0x169   : > { %1199 = vmatmul.bf16.gmra.mxu0 %v4223_v40  ;;  %1228 = vmatmul.bf16.gmra.mxu1 %v4225_v43  ;;  %v556_v0 = vmul.f32 %v533_v49, %v4061_v1  ;;  %v557_v4 = vmul.f32 %v533_v49, %v4064_v13  ;;  %v2855_v13 = vld [vmem:[#allocation9 + $0x160] sm:$0xf]  ;;  %v2860_v54 = vor.u32 %v3271_v26, %v2857_v29  ;;  %v3310_v62 = vld [vmem:[#allocation9 + $0x294] sm:$0xf0]  ;;  %v2809_v60 = vld [vmem:[#allocation9 + $0x118] sm:$0xf0] }
 0x16a   : > { %1257 = vmatmul.bf16.gmra.mxu2 %v4223_v40  ;;  %1286 = vmatmul.bf16.gmra.mxu3 %v4225_v43  ;;  %v579_v23 = vmul.f32 %v4112_v14, %v558_v15  ;;  %v580_v38 = vmul.f32 %v4114_v22, %v559_v52  ;;  %v3024_v41 = vor.u32 %v3316_v34, %v3023_v39  ;;  %v3307_v63 = vld [vmem:[#allocation9 + $0x284] sm:$0xf]  ;;  %v3001_v2 = vld [vmem:[#allocation9 + $0x298] sm:$0xf0]  ;;  %v2783_v8 = vld [vmem:[#allocation9 + $0xd0] sm:$0xf] }
 0x16b   : > { %1365 = vmatpush.bf16.msrb.mxu2 %v2732_v32  ;;  %1394 = vmatpush.bf16.msrb.mxu3 %v2924_v36  ;;  %v577_v18 = vmul.f32 %v4112_v14, %v556_v0  ;;  %v578_v19 = vmul.f32 %v4114_v22, %v557_v4  ;;  %v3274_v14 = vld [vmem:[#allocation9 + $0x174] sm:$0xf0]  ;;  %v3047_v22 = vld [vmem:[#allocation9 + $0x2e0] sm:$0xf]  ;;  %v3319_v32 = vld [vmem:[#allocation9 + $0x2e4] sm:$0xf]  ;;  %v2836_v46 = vor.u32 %v3265_v30, %v2833_v37 }
 0x16c   : > { %1308 = vmatpush.bf16.msrb.mxu0 %v2704_v27  ;;  %1337 = vmatpush.bf16.msrb.mxu1 %v2896_v50  ;;  %v600_v16 = vadd.f32 %v4121_v20, %v579_v23  ;;  %v601_v17 = vadd.f32 %v4123_v28, %v580_v38  ;;  %v3049_v36 = vld [vmem:[#allocation9 + $0x2f8] sm:$0xf0]  ;;  %v2807_v27 = vld [vmem:[#allocation9 + $0x100] sm:$0xf]  ;;  %v3262_v50 = vld [vmem:[#allocation9 + $0x114] sm:$0xf0]  ;;  %v3028_v42 = vor.u32 %v3313_v45, %v3025_v48 }
 0x16d   : > { %v598_v59 = vadd.f32 %v4121_v20, %v577_v18  ;;  %v599_v24 = vadd.f32 %v4123_v28, %v578_v19  ;;  %v2856_v20 = vor.u32 %v3274_v14, %v2855_v13  ;;  %v3322_v28 = vld [vmem:[#allocation9 + $0x2f4] sm:$0xf0]  ;;  %v3052_v33 = vor.u32 %v3319_v32, %v3049_v36  ;;  %v3256_v3 = vld [vmem:[#allocation9 + $0xe4] sm:$0xf0]  ;;  %v3253_v11 = vld [vmem:[#allocation9 + $0xd4] sm:$0xf] }
 0x16e   : > { %v3048_v21 = vor.u32 %v3322_v28, %v3047_v22  ;;  %v3000_v7 = vor.u32 %v3310_v62, %v2999_v57  ;;  %v3004_v53 = vor.u32 %v3307_v63, %v3001_v2  ;;  %v2977_v49 = vld [vmem:[#allocation9 + $0x268] sm:$0xf0]  ;;  %v2784_v15 = vor.u32 %v3256_v3, %v2783_v8  ;;  %v2759_v23 = vld [vmem:[#allocation9 + $0xa0] sm:$0xf]  ;;  %v3250_v38 = vld [vmem:[#allocation9 + $0xb4] sm:$0xf0] }
 0x16f   : > { %1366 = vmatpush.bf16.msrb.mxu2 %v2708_v51  ;;  %1395 = vmatpush.bf16.msrb.mxu3 %v2900_v44  ;;  %v4294_v25 = vpack.c.bf16 %v600_v16, %v598_v59  ;;  %v4296_v1 = vpack.c.bf16 %v601_v17, %v599_v24  ;;  %v3259_v51 = vld [vmem:[#allocation9 + $0x104] sm:$0xf]  ;;  %v2808_v44 = vor.u32 %v3262_v50, %v2807_v27  ;;  %v2951_v18 = vld [vmem:[#allocation9 + $0x220] sm:$0xf]  ;;  %v3298_v16 = vld [vmem:[#allocation9 + $0x234] sm:$0xf0] }
 0x170   : > { %1309 = vmatpush.bf16.msrb.mxu0 %v2680_v58  ;;  %1338 = vmatpush.bf16.msrb.mxu1 %v2872_v61  ;;  %v2812_v31 = vor.u32 %v3259_v51, %v2809_v60  ;;  %v2975_v58 = vld [vmem:[#allocation9 + $0x250] sm:$0xf]  ;;  %v3304_v61 = vld [vmem:[#allocation9 + $0x264] sm:$0xf0]  ;;  %v2760_v19 = vor.u32 %v3250_v38, %v2759_v23  ;;  %v3247_v17 = vld [vmem:[#allocation9 + $0xa4] sm:$0xf]  ;;  %v2952_v24 = vor.u32 %v3298_v16, %v2951_v18 }
 0x171   : > { %v2976_v52 = vor.u32 %v3304_v61, %v2975_v58  ;;  %v2761_v59 = vld [vmem:[#allocation9 + $0xb8] sm:$0xf0]  ;;  %v3295_v14 = vld [vmem:[#allocation9 + $0x224] sm:$0xf]  ;;  %v3244_v26 = vld [vmem:[#allocation9 + $0x84] sm:$0xf0] }
 0x172   : > { %v2764_v13 = vor.u32 %v3247_v17, %v2761_v59  ;;  %v2953_v22 = vld [vmem:[#allocation9 + $0x238] sm:$0xf0]  ;;  %v2927_v29 = vld [vmem:[#allocation9 + $0x1f0] sm:$0xf]  ;;  %v2737_v32 = vld [vmem:[#allocation9 + $0x88] sm:$0xf0] }
 0x173   : > { %1367 = vmatpush.bf16.msrb.mxu2 %v2684_v12  ;;  %1396 = vmatpush.bf16.msrb.mxu3 %v2876_v47  ;;  %v2785_v12 = vld [vmem:[#allocation9 + $0xe8] sm:$0xf0]  ;;  %v3301_v47 = vld [vmem:[#allocation9 + $0x254] sm:$0xf]  ;;  %v2956_v28 = vor.u32 %v3295_v14, %v2953_v22  ;;  %v2711_v39 = vld [vmem:[#allocation9 + $0x40] sm:$0xf] }
 0x174   : > { %1418 = vmatpush.bf16.msra.mxu0 %v2856_v20  ;;  %1447 = vmatpush.bf16.msra.mxu1 %v3048_v21  ;;  %v2788_v0 = vor.u32 %v3253_v11, %v2785_v12  ;;  %v2980_v4 = vor.u32 %v3301_v47, %v2977_v49  ;;  %v2735_v20 = vld [vmem:[#allocation9 + $0x70] sm:$0xf]  ;;  %v3292_v21 = vld [vmem:[#allocation9 + $0x204] sm:$0xf0]  ;;  %v3289_v36 = vld [vmem:[#allocation9 + $0x1f4] sm:$0xf] }
 0x175   : > { %v2736_v56 = vor.u32 %v3244_v26, %v2735_v20  ;;  %v2929_v10 = vld [vmem:[#allocation9 + $0x208] sm:$0xf0]  ;;  %v3238_v34 = vld [vmem:[#allocation9 + $0x54] sm:$0xf0]  ;;  %v2903_v30 = vld [vmem:[#allocation9 + $0x1c0] sm:$0xf] }
 0x176   : > { %v3286_v37 = vld [vmem:[#allocation9 + $0x1d4] sm:$0xf0]  ;;  %v3235_v45 = vld [vmem:[#allocation9 + $0x44] sm:$0xf]  ;;  %v2905_v27 = vld [vmem:[#allocation9 + $0x1d8] sm:$0xf0]  ;;  %v2712_v50 = vor.u32 %v3238_v34, %v2711_v39 }
 0x177   : > { %1476 = vmatpush.bf16.msra.mxu2 %v2860_v54  ;;  %1505 = vmatpush.bf16.msra.mxu3 %v3052_v33  ;;  %v3241_v54 = vld [vmem:[#allocation9 + $0x74] sm:$0xf]  ;;  %v2928_v33 = vor.u32 %v3292_v21, %v2927_v29  ;;  %v3283_v48 = vld [vmem:[#allocation9 + $0x1c4] sm:$0xf]  ;;  %v2687_v51 = vld [vmem:[#allocation9 + $0x10] sm:$0xf] }
 0x178   : > { %1419 = vmatpush.bf16.msra.mxu0 %v2832_v35  ;;  %1448 = vmatpush.bf16.msra.mxu1 %v3024_v41  ;;  %v2740_v35 = vor.u32 %v3241_v54, %v2737_v32  ;;  %v2932_v41 = vor.u32 %v3289_v36, %v2929_v10  ;;  %v2908_v62 = vor.u32 %v3283_v48, %v2905_v27  ;;  %v2879_v60 = vld [vmem:[#allocation9 + $0x190] sm:$0xf]  ;;  %v3280_v2 = vld [vmem:[#allocation9 + $0x1a4] sm:$0xf0]  ;;  %v3277_v3 = vld [vmem:[#allocation9 + $0x194] sm:$0xf] }
 0x179   : > { %1204 = vmatmul.bf16.gmra.mxu0 %v4266_v9  ;;  %1233 = vmatmul.bf16.gmra.mxu1 %v4272_v55  ;;  %v2881_v58 = vld [vmem:[#allocation9 + $0x1a8] sm:$0xf0] }
 0x17a   : > { %1262 = vmatmul.bf16.gmra.mxu2 %v4266_v9  ;;  %1291 = vmatmul.bf16.gmra.mxu3 %v4272_v55  ;;  %v2884_v61 = vor.u32 %v3277_v3, %v2881_v58 }
 0x17b   : > { %1477 = vmatpush.bf16.msra.mxu2 %v2836_v46  ;;  %1506 = vmatpush.bf16.msra.mxu3 %v3028_v42  ;;  %v2713_v46 = vld [vmem:[#allocation9 + $0x58] sm:$0xf0]  ;;  %v2904_v42 = vor.u32 %v3286_v37, %v2903_v30 }
 0x17c   : > { %1420 = vmatpush.bf16.msra.mxu0 %v2808_v44  ;;  %1449 = vmatpush.bf16.msra.mxu1 %v3000_v7  ;;  %v2716_v57 = vor.u32 %v3235_v45, %v2713_v46  ;;  %v3232_v44 = vld [vmem:[#allocation9 + $0x24] sm:$0xf0]  ;;  %v3229_v7 = vld [vmem:[#allocation9 + $0x14] sm:$0xf] }
 0x17d   : > { %v2688_v63 = vor.u32 %v3232_v44, %v2687_v51 }
 0x17f   : > { %1478 = vmatpush.bf16.msra.mxu2 %v2812_v31  ;;  %1507 = vmatpush.bf16.msra.mxu3 %v3004_v53  ;;  %v2689_v31 = vld [vmem:[#allocation9 + $0x28] sm:$0xf0]  ;;  %v2880_v53 = vor.u32 %v3280_v2, %v2879_v60 }
 0x180   : > { %1421 = vmatpush.bf16.msra.mxu0 %v2784_v15  ;;  %1450 = vmatpush.bf16.msra.mxu1 %v2976_v52  ;;  %v2692_v8 = vor.u32 %v3229_v7, %v2689_v31 }
 0x183   : > { %1479 = vmatpush.bf16.msra.mxu2 %v2788_v0  ;;  %1508 = vmatpush.bf16.msra.mxu3 %v2980_v4 }
 0x184   : > { %1422 = vmatpush.bf16.msra.mxu0 %v2760_v19  ;;  %1451 = vmatpush.bf16.msra.mxu1 %v2952_v24 }
 0x187   : > { %1480 = vmatpush.bf16.msra.mxu2 %v2764_v13  ;;  %1509 = vmatpush.bf16.msra.mxu3 %v2956_v28 }
 0x188   : > { %1423 = vmatpush.bf16.msra.mxu0 %v2736_v56  ;;  %1452 = vmatpush.bf16.msra.mxu1 %v2928_v33 }
 0x189   : > { %1209 = vmatmul.bf16.gmra.mxu0 %v4294_v25  ;;  %1238 = vmatmul.bf16.gmra.mxu1 %v4296_v1 }
 0x18a   : > { %1267 = vmatmul.bf16.gmra.mxu2 %v4294_v25  ;;  %1296 = vmatmul.bf16.gmra.mxu3 %v4296_v1 }
 0x18b   : > { %1481 = vmatpush.bf16.msra.mxu2 %v2740_v35  ;;  %1510 = vmatpush.bf16.msra.mxu3 %v2932_v41 }
 0x18c   : > { %1424 = vmatpush.bf16.msra.mxu0 %v2712_v50  ;;  %1453 = vmatpush.bf16.msra.mxu1 %v2904_v42 }
 0x18f   : > { %1482 = vmatpush.bf16.msra.mxu2 %v2716_v57  ;;  %1511 = vmatpush.bf16.msra.mxu3 %v2908_v62 }
 0x190   : > { %1425 = vmatpush.bf16.msra.mxu0 %v2688_v63  ;;  %1454 = vmatpush.bf16.msra.mxu1 %v2880_v53 }
 0x193   : > { %1483 = vmatpush.bf16.msra.mxu2 %v2692_v8  ;;  %1512 = vmatpush.bf16.msra.mxu3 %v2884_v61 }
 0x199   : > { %1310 = vmatmul.bf16.vlgmr.msrb.gmra.mxu0 %v4161_v5  ;;  %1339 = vmatmul.bf16.vlgmr.msrb.gmra.mxu1 %v4163_v6 }
 0x19a   : > { %1368 = vmatmul.bf16.vlgmr.msrb.gmra.mxu2 %v4161_v5  ;;  %1397 = vmatmul.bf16.vlgmr.msrb.gmra.mxu3 %v4163_v6 }
 0x1a9   : > { %1315 = vmatmul.bf16.gmra.mxu0 %v4223_v40  ;;  %1344 = vmatmul.bf16.gmra.mxu1 %v4225_v43 }
 0x1aa   : > { %1373 = vmatmul.bf16.gmra.mxu2 %v4223_v40  ;;  %1402 = vmatmul.bf16.gmra.mxu3 %v4225_v43 }
 0x1b9   : > { %1320 = vmatmul.bf16.gmra.mxu0 %v4266_v9  ;;  %1349 = vmatmul.bf16.gmra.mxu1 %v4272_v55 }
 0x1ba   : > { %1378 = vmatmul.bf16.gmra.mxu2 %v4266_v9  ;;  %1407 = vmatmul.bf16.gmra.mxu3 %v4272_v55 }
 0x1c9   : > { %1325 = vmatmul.bf16.gmra.mxu0 %v4294_v25  ;;  %1354 = vmatmul.bf16.gmra.mxu1 %v4296_v1 }
 0x1ca   : > { %1383 = vmatmul.bf16.gmra.mxu2 %v4294_v25  ;;  %1412 = vmatmul.bf16.gmra.mxu3 %v4296_v1 }
 0x1d6   : > { %v1195_v11 = vpop.f32.mrf.mxu0  ;;  %v1224_v12 = vpop.f32.mrf.mxu1 }
 0x1d7   : > { %v4318_v47 = vadd.f32 %v1224_v12, %v1195_v11 }
 0x1d9   : > { %1426 = vmatmul.bf16.vlgmr.msra.gmra.mxu0 %v4161_v5  ;;  %1455 = vmatmul.bf16.vlgmr.msra.gmra.mxu1 %v4163_v6 }
 0x1da   : > { %1484 = vmatmul.bf16.vlgmr.msra.gmra.mxu2 %v4161_v5  ;;  %1513 = vmatmul.bf16.vlgmr.msra.gmra.mxu3 %v4163_v6 }
 0x1dd   : > { %v1253_v49 = vpop.f32.mrf.mxu2  ;;  %v1282_v15 = vpop.f32.mrf.mxu3 }
 0x1de   : > { %v4324_v52 = vadd.f32 %v1282_v15, %v1253_v49  ;;  %v4326_v0 = vpop.f32.mrf.mxu0  ;;  %v4328_v4 = vpop.f32.mrf.mxu1 }
 0x1e5   : > { %v4330_v23 = vpop.f32.mrf.mxu2  ;;  %v4332_v38 = vpop.f32.mrf.mxu3 }
 0x1e6   : > { %v1200_v18 = vpop.f32.mrf.mxu0  ;;  %v1229_v19 = vpop.f32.mrf.mxu1 }
 0x1e7   : > { %v4334_v16 = vadd.f32 %v1229_v19, %v1200_v18 }
 0x1e9   : > { %1431 = vmatmul.bf16.gmra.mxu0 %v4223_v40  ;;  %1460 = vmatmul.bf16.gmra.mxu1 %v4225_v43 }
 0x1ea   : > { %1489 = vmatmul.bf16.gmra.mxu2 %v4223_v40  ;;  %1518 = vmatmul.bf16.gmra.mxu3 %v4225_v43 }
 0x1ed   : > { %v1258_v5 = vpop.f32.mrf.mxu2  ;;  %v1287_v6 = vpop.f32.mrf.mxu3 }
 0x1ee   : > { %v4340_v17 = vadd.f32 %v1287_v6, %v1258_v5  ;;  %v4342_v59 = vpop.f32.mrf.mxu0  ;;  %v4344_v24 = vpop.f32.mrf.mxu1 }
 0x1f5   : > { %v4346_v13 = vpop.f32.mrf.mxu2  ;;  %v4348_v14 = vpop.f32.mrf.mxu3 }
 0x1f6   : > { %v1205_v22 = vpop.f32.mrf.mxu0  ;;  %v1234_v20 = vpop.f32.mrf.mxu1 }
 0x1f7   : > { %v4350_v28 = vadd.f32 %v1234_v20, %v1205_v22 }
 0x1f9   : > { %1436 = vmatmul.bf16.gmra.mxu0 %v4266_v9  ;;  %1465 = vmatmul.bf16.gmra.mxu1 %v4272_v55 }
 0x1fa   : > { %1494 = vmatmul.bf16.gmra.mxu2 %v4266_v9  ;;  %1523 = vmatmul.bf16.gmra.mxu3 %v4272_v55 }
 0x1fd   : > { %v1263_v40 = vpop.f32.mrf.mxu2  ;;  %v1292_v43 = vpop.f32.mrf.mxu3 }
 0x1fe   : > { %v4356_v26 = vadd.f32 %v1292_v43, %v1263_v40  ;;  %v4358_v29 = vpop.f32.mrf.mxu0  ;;  %v4360_v21 = vpop.f32.mrf.mxu1 }
 0x205   : > { %v4362_v54 = vpop.f32.mrf.mxu2  ;;  %v4364_v32 = vpop.f32.mrf.mxu3 }
 0x206   : > { %v1210_v36 = vpop.f32.mrf.mxu0  ;;  %v1239_v56 = vpop.f32.mrf.mxu1 }
 0x207   : > { %v4366_v33 = vadd.f32 %v1239_v56, %v1210_v36 }
 0x209   : > { %4738 = vst [vmem:[#allocation17_spill] sm:$0xff] %v4366_v33  ;;  %1441 = vmatmul.bf16.gmra.mxu0 %v4294_v25  ;;  %1470 = vmatmul.bf16.gmra.mxu1 %v4296_v1 }
 0x20a   : > { %1499 = vmatmul.bf16.gmra.mxu2 %v4294_v25  ;;  %1528 = vmatmul.bf16.gmra.mxu3 %v4296_v1 }
 0x20d   : > { %v1268_v9 = vpop.f32.mrf.mxu2  ;;  %v1297_v55 = vpop.f32.mrf.mxu3 }
 0x20e   : > { %v4372_v10 = vadd.f32 %v1297_v55, %v1268_v9  ;;  %v4374_v39 = vpop.f32.mrf.mxu0  ;;  %v4376_v34 = vpop.f32.mrf.mxu1 }
 0x20f   : > { %4740 = vst [vmem:[#allocation19_spill] sm:$0xff] %v4376_v34 }
 0x210   : > { %4739 = vst [vmem:[#allocation18_spill] sm:$0xff] %v4372_v10 }
 0x215   : > { %v4378_v35 = vpop.f32.mrf.mxu2  ;;  %v4380_v41 = vpop.f32.mrf.mxu3 }
 0x216   : > { %4741 = vst [vmem:[#allocation20_spill] sm:$0xff] %v4378_v35  ;;  %v1311_v30 = vpop.f32.mrf.mxu0  ;;  %v1340_v37 = vpop.f32.mrf.mxu1 }
 0x217   : > { %4742 = vst [vmem:[#allocation21_spill] sm:$0xff] %v4380_v41  ;;  %v4382_v45 = vadd.f32 %v1340_v37, %v1311_v30 }
 0x21d   : > { %v1369_v46 = vpop.f32.mrf.mxu2  ;;  %v1398_v25 = vpop.f32.mrf.mxu3 }
 0x21e   : > { %v4384_v48 = vadd.f32 %v1398_v25, %v1369_v46  ;;  %v4386_v1 = vpop.f32.mrf.mxu0  ;;  %v4388_v27 = vpop.f32.mrf.mxu1 }
 0x225   : > { %v4390_v50 = vpop.f32.mrf.mxu2  ;;  %v4392_v42 = vpop.f32.mrf.mxu3 }
 0x226   : > { %v1316_v57 = vpop.f32.mrf.mxu0  ;;  %v1345_v62 = vpop.f32.mrf.mxu1 }
 0x22d   : > { %v4394_v51 = vpop.f32.mrf.mxu2  ;;  %v4396_v44 = vpop.f32.mrf.mxu3 }
 0x22e   : > { %v1318_v60 = vpop.f32.mrf.mxu0  ;;  %v1347_v63 = vpop.f32.mrf.mxu1 }
 0x235   : > { %v1376_v2 = vpop.f32.mrf.mxu2  ;;  %v1405_v7 = vpop.f32.mrf.mxu3 }
 0x236   : > { %v1321_v31 = vpop.f32.mrf.mxu0  ;;  %v1350_v53 = vpop.f32.mrf.mxu1 }
 0x237   : > { %v1351_v9 = vadd.f32 %v1350_v53, %v1321_v31 }
 0x23d   : > { %v1379_v8 = vpop.f32.mrf.mxu2  ;;  %v1408_v3 = vpop.f32.mrf.mxu3 }
 0x23e   : > { %v1323_v58 = vpop.f32.mrf.mxu0  ;;  %v1352_v61 = vpop.f32.mrf.mxu1 }
 0x23f   : > { %v1353_v43 = vadd.f32 %v1352_v61, %v1323_v58  ;;  %v1348_v58 = vadd.f32 %v1347_v63, %v1318_v60 }
 0x241   : > { %v1547_v37 = vpack.c.bf16 %v1353_v43, %v1353_v43  ;;  %v1545_v43 = vpack.c.bf16 %v1348_v58, %v1348_v58 }
 0x243   : > { %v1595_v61 = vunpack.c.l.b16 %v1547_v37 }
 0x245   : > { %v1381_v11 = vpop.f32.mrf.mxu2  ;;  %v1410_v12 = vpop.f32.mrf.mxu3 }
 0x246   : > { %v1326_v49 = vpop.f32.mrf.mxu0  ;;  %v1355_v15 = vpop.f32.mrf.mxu1 }
 0x247   : > { %v1356_v18 = vadd.f32 %v1355_v15, %v1326_v49  ;;  %v1546_v15 = vpack.c.bf16 %v1351_v9, %v1351_v9 }
 0x249   : > { %v1548_v20 = vpack.c.bf16 %v1356_v18, %v1356_v18  ;;  %v1411_v18 = vadd.f32 %v1410_v12, %v1381_v11 }
 0x24b   : > { %v1596_v55 = vunpack.c.l.b16 %v1548_v20  ;;  %v1846_v20 = vpack.c.bf16 %v1411_v18, %v1411_v18 }
 0x24d   : > { %v1384_v19 = vpop.f32.mrf.mxu2  ;;  %v1413_v5 = vpop.f32.mrf.mxu3  ;;  %v1894_v63 = vunpack.c.l.b16 %v1846_v20 }
 0x24e   : > { %v1328_v6 = vpop.f32.mrf.mxu0  ;;  %v1357_v22 = vpop.f32.mrf.mxu1  ;;  %v1414_v56 = vadd.f32 %v1413_v5, %v1384_v19  ;;  %v1409_v19 = vadd.f32 %v1408_v3, %v1379_v8  ;;  %v1346_v5 = vadd.f32 %v1345_v62, %v1316_v57  ;;  %v1343_v57 = vadd.f32 %v4388_v27, %v4386_v1 }
 0x24f   : > { %v1358_v40 = vadd.f32 %v1357_v22, %v1328_v6  ;;  %v1594_v22 = vunpack.c.l.b16 %v1546_v15  ;;  %v1593_v62 = vunpack.c.l.b16 %v1545_v43  ;;  %v1404_v8 = vadd.f32 %v4396_v44, %v4394_v51 }
 0x250   : > { %v1847_v41 = vpack.c.bf16 %v1414_v56, %v1414_v56  ;;  %v1544_v60 = vpack.c.bf16 %v1346_v5, %v1346_v5  ;;  %v1543_v37 = vpack.c.bf16 %v1343_v57, %v1343_v57  ;;  %v1542_v1 = vpack.c.bf16 %v4382_v45, %v4382_v45 }
 0x251   : > { %v1549_v36 = vpack.c.bf16 %v1358_v40, %v1358_v40  ;;  %v1600_v56 = vpack.c.b16 %v1595_v61, %v1594_v22  ;;  %v1843_v15 = vpack.c.bf16 %v1404_v8, %v1404_v8  ;;  %v1227_v27 = vadd.f32 %v4328_v4, %v4326_v0 }
 0x252   : > { %v1895_v31 = vunpack.c.l.b16 %v1847_v41  ;;  %v1406_v41 = vadd.f32 %v1405_v7, %v1376_v2  ;;  %v1592_v11 = vunpack.c.l.b16 %v1544_v60  ;;  %v1401_v51 = vadd.f32 %v4392_v42, %v4390_v50 }
 0x253   : > { %v1597_v30 = vunpack.c.l.b16 %v1549_v36  ;;  %v1591_v18 = vunpack.c.l.b16 %v1543_v37  ;;  %v1590_v58 = vunpack.c.l.b16 %v1542_v1  ;;  %v1535_v61 = vpack.c.bf16 %v1227_v27, %v1227_v27 }
 0x254   : > { %v1844_v12 = vpack.c.bf16 %v1406_v41, %v1406_v41  ;;  %v1534_v45 = vpack.c.bf16 %v4318_v47, %v4318_v47  ;;  %v1841_v0 = vpack.c.bf16 %v4384_v48, %v4384_v48  ;;  %v1285_v42 = vadd.f32 %v4332_v38, %v4330_v23 }
 0x255   : > { %v1601_v46 = vpack.c.b16 %v1597_v30, %v1596_v55  ;;  %v1386_v25 = vpop.f32.mrf.mxu2  ;;  %v1415_v10 = vpop.f32.mrf.mxu3  ;;  %v1845_v55 = vpack.c.bf16 %v1409_v19, %v1409_v19  ;;  %v1842_v19 = vpack.c.bf16 %v1401_v51, %v1401_v51  ;;  %v1598_v22 = vpack.c.b16 %v1591_v18, %v1590_v58 }
 0x256   : > { %v1416_v35 = vadd.f32 %v1415_v10, %v1386_v25  ;;  %v1427_v33 = vpop.f32.mrf.mxu0  ;;  %v1456_v49 = vpop.f32.mrf.mxu1  ;;  %v1892_v44 = vunpack.c.l.b16 %v1844_v12  ;;  %v1567_v20 = vunpack.c.l.b16 %v1535_v61  ;;  %v1566_v43 = vunpack.c.l.b16 %v1534_v45 }
 0x257   : > { %v4398_v34 = vadd.f32 %v1456_v49, %v1427_v33  ;;  %1610 = vmatpush.bf16.xpose.msrb.mxu0 %v1601_v46  ;;  %v1893_v3 = vunpack.c.l.b16 %v1845_v55  ;;  %v1599_v49 = vpack.c.b16 %v1593_v62, %v1592_v11  ;;  %v1833_v47 = vpack.c.bf16 %v4324_v52, %v4324_v52 }
 0x258   : > { %v1848_v6 = vpack.c.bf16 %v1416_v35, %v1416_v35  ;;  %v1232_v38 = vadd.f32 %v4344_v24, %v4342_v59  ;;  %v1536_v52 = vpack.c.bf16 %v4334_v16, %v4334_v16  ;;  %v1290_v37 = vadd.f32 %v4348_v14, %v4346_v13 }
 0x259   : > { %v1899_v30 = vpack.c.b16 %v1894_v63, %v1893_v3  ;;  %v1865_v57 = vunpack.c.l.b16 %v1833_v47  ;;  %v1835_v59 = vpack.c.bf16 %v4340_v17, %v4340_v17  ;;  %v1237_v16 = vadd.f32 %v4360_v21, %v4358_v29 }
 0x25a   : > { %v1896_v53 = vunpack.c.l.b16 %v1848_v6  ;;  %v1891_v6 = vunpack.c.l.b16 %v1843_v15  ;;  %v1537_v8 = vpack.c.bf16 %v1232_v38, %v1232_v38  ;;  %v1568_v15 = vunpack.c.l.b16 %v1536_v52 }
 0x25b   : > { %v1836_v1 = vpack.c.bf16 %v1290_v37, %v1290_v37  ;;  %v1867_v58 = vunpack.c.l.b16 %v1835_v59  ;;  %v1539_v13 = vpack.c.bf16 %v1237_v16, %v1237_v16  ;;  %v1538_v17 = vpack.c.bf16 %v4350_v28, %v4350_v28 }
 0x25c   : > { %v1900_v40 = vpack.c.b16 %v1896_v53, %v1895_v31  ;;  %v1898_v31 = vpack.c.b16 %v1892_v44, %v1891_v6  ;;  %v1295_v45 = vadd.f32 %v4364_v32, %v4362_v54  ;;  %v1837_v54 = vpack.c.bf16 %v4356_v26, %v4356_v26 }
 0x25d   : > { %v1485_v36 = vpop.f32.mrf.mxu2  ;;  %v1514_v10 = vpop.f32.mrf.mxu3  ;;  %v1868_v6 = vunpack.c.l.b16 %v1836_v1  ;;  %v1571_v29 = vunpack.c.l.b16 %v1539_v13 }
 0x25e   : > { %v4400_v9 = vadd.f32 %v1514_v10, %v1485_v36  ;;  %1909 = vmatpush.bf16.xpose.msrb.mxu2 %v1900_v40  ;;  %v4402_v33 = vpop.f32.mrf.mxu0  ;;  %v4404_v35 = vpop.f32.mrf.mxu1  ;;  %v1890_v40 = vunpack.c.l.b16 %v1842_v19  ;;  %v1889_v36 = vunpack.c.l.b16 %v1841_v0  ;;  %v1834_v10 = vpack.c.bf16 %v1285_v42, %v1285_v42 }
 0x25f   : > { %1611 = vmatpush.bf16.xpose.msrb.mxu0 %v1600_v56  ;;  %v1574_v56 = vpack.c.b16 %v1567_v20, %v1566_v43  ;;  %v1874_v19 = vpack.c.b16 %v1868_v6, %v1867_v58 }
 0x260   : > { %v1897_v55 = vpack.c.b16 %v1890_v40, %v1889_v36  ;;  %v1866_v23 = vunpack.c.l.b16 %v1834_v10 }
 0x262   : > { %v1873_v62 = vpack.c.b16 %v1866_v23, %v1865_v57 }
 0x265   : > { %v4410_v46 = vpop.f32.mrf.mxu2  ;;  %v4412_v25 = vpop.f32.mrf.mxu3 }
 0x266   : > { %1910 = vmatpush.bf16.xpose.msrb.mxu2 %v1899_v30  ;;  %v4414_v2 = vpop.f32.mrf.mxu0  ;;  %v4416_v7 = vpop.f32.mrf.mxu1 }
 0x267   : > { %1612 = vmatpush.bf16.xpose.msrb.mxu0 %v1599_v49  ;;  %v1569_v49 = vunpack.c.l.b16 %v1537_v8  ;;  %v1462_v23 = vadd.f32 %v4416_v7, %v4414_v2  ;;  %v4743_v7 = vld [vmem:[#allocation19_spill] sm:$0xff] }
 0x269   : > { %v1575_v27 = vpack.c.b16 %v1569_v49, %v1568_v15  ;;  %v1242_v49 = vadd.f32 %v4743_v7, %v4374_v39  ;;  %v1552_v15 = vpack.c.bf16 %v1462_v23, %v1462_v23  ;;  %v1550_v39 = vpack.c.bf16 %v4398_v34, %v4398_v34  ;;  %v4746_v34 = vld [vmem:[#allocation21_spill] sm:$0xff] }
 0x26b   : > { %v1541_v6 = vpack.c.bf16 %v1242_v49, %v1242_v49  ;;  %v1762_v16 = vunpack.c.l.b16 %v1552_v15 }
 0x26d   : > { %v4424_v53 = vpop.f32.mrf.mxu2  ;;  %v4426_v5 = vpop.f32.mrf.mxu3 }
 0x26e   : > { %1911 = vmatpush.bf16.xpose.msrb.mxu2 %v1898_v31  ;;  %v1434_v4 = vpop.f32.mrf.mxu0  ;;  %v1463_v50 = vpop.f32.mrf.mxu1 }
 0x26f   : > { %1613 = vmatpush.bf16.xpose.msrb.mxu0 %v1598_v22  ;;  %v1464_v21 = vadd.f32 %v1463_v50, %v1434_v4 }
 0x271   : > { %v1553_v4 = vpack.c.bf16 %v1464_v21, %v1464_v21 }
 0x275   : > { %v4436_v60 = vpop.f32.mrf.mxu2  ;;  %v4438_v48 = vpop.f32.mrf.mxu3 }
 0x276   : > { %1912 = vmatpush.bf16.xpose.msrb.mxu2 %v1897_v55  ;;  %v1437_v41 = vpop.f32.mrf.mxu0  ;;  %v1466_v63 = vpop.f32.mrf.mxu1  ;;  %1614 = vmatmul.bf16.vlgmr.msrb.gmra.mxu0 %v1574_v56  ;;  %v1570_v56 = vunpack.c.l.b16 %v1538_v17  ;;  %v1838_v55 = vpack.c.bf16 %v1295_v45, %v1295_v45  ;;  %v1522_v1 = vadd.f32 %v4438_v48, %v4436_v60  ;;  %v1517_v60 = vadd.f32 %v4412_v25, %v4410_v46  ;;  %v4745_v17 = vld [vmem:[#allocation20_spill] sm:$0xff] }
 0x277   : > { %v1467_v20 = vadd.f32 %v1466_v63, %v1437_v41  ;;  %v1459_v63 = vadd.f32 %v4404_v35, %v4402_v33  ;;  %v1300_v45 = vadd.f32 %v4746_v34, %v4745_v17 }
 0x278   : > { %v1576_v41 = vpack.c.b16 %v1571_v29, %v1570_v56  ;;  %v1870_v2 = vunpack.c.l.b16 %v1838_v55  ;;  %v1852_v48 = vpack.c.bf16 %v1522_v1, %v1522_v1  ;;  %v1849_v29 = vpack.c.bf16 %v4400_v9, %v4400_v9 }
 0x279   : > { %v1554_v38 = vpack.c.bf16 %v1467_v20, %v1467_v20  ;;  %v1551_v59 = vpack.c.bf16 %v1459_v63, %v1459_v63  ;;  %v1850_v20 = vpack.c.bf16 %v1517_v60, %v1517_v60 }
 0x27a   : > { %v2061_v46 = vunpack.c.l.b16 %v1852_v48 }
 0x27b   : > { %v1764_v26 = vunpack.c.l.b16 %v1554_v38  ;;  %v1761_v13 = vunpack.c.l.b16 %v1551_v59  ;;  %v2058_v38 = vunpack.c.l.b16 %v1849_v29 }
 0x27d   : > { %v1495_v3 = vpop.f32.mrf.mxu2  ;;  %v1524_v11 = vpop.f32.mrf.mxu3  ;;  %1913 = vmatmul.bf16.vlgmr.msrb.gmra.mxu2 %v1873_v62 }
 0x27e   : > { %v1439_v12 = vpop.f32.mrf.mxu0  ;;  %v1468_v30 = vpop.f32.mrf.mxu1 }
 0x27f   : > { %v1469_v14 = vadd.f32 %v1468_v30, %v1439_v12  ;;  %v1525_v12 = vadd.f32 %v1524_v11, %v1495_v3  ;;  %v1520_v3 = vadd.f32 %v4426_v5, %v4424_v53  ;;  %v4744_v53 = vld [vmem:[#allocation17_spill] sm:$0xff] }
 0x280   : > { %v1540_v5 = vpack.c.bf16 %v4744_v53, %v4744_v53 }
 0x281   : > { %v1555_v36 = vpack.c.bf16 %v1469_v14, %v1469_v14  ;;  %v1853_v11 = vpack.c.bf16 %v1525_v12, %v1525_v12 }
 0x283   : > { %v1765_v50 = vunpack.c.l.b16 %v1555_v36  ;;  %v1840_v36 = vpack.c.bf16 %v1300_v45, %v1300_v45 }
 0x285   : > { %v1497_v24 = vpop.f32.mrf.mxu2  ;;  %v1526_v51 = vpop.f32.mrf.mxu3 }
 0x286   : > { %v1442_v44 = vpop.f32.mrf.mxu0  ;;  %v1471_v18 = vpop.f32.mrf.mxu1  ;;  %1619 = vmatmul.bf16.gmra.mxu0 %v1575_v27  ;;  %v1527_v32 = vadd.f32 %v1526_v51, %v1497_v24  ;;  %v1869_v27 = vunpack.c.l.b16 %v1837_v54  ;;  %v1763_v24 = vunpack.c.l.b16 %v1553_v4  ;;  %v1770_v51 = vpack.c.b16 %v1765_v50, %v1764_v26 }
 0x287   : > { %v1472_v61 = vadd.f32 %v1471_v18, %v1442_v44 }
 0x288   : > { %v1854_v33 = vpack.c.bf16 %v1527_v32, %v1527_v32  ;;  %v1875_v58 = vpack.c.b16 %v1870_v2, %v1869_v27  ;;  %v1769_v14 = vpack.c.b16 %v1763_v24, %v1762_v16 }
 0x289   : > { %v1556_v40 = vpack.c.bf16 %v1472_v61, %v1472_v61 }
 0x28a   : > { %v2063_v61 = vunpack.c.l.b16 %v1854_v33 }
 0x28b   : > { %v1766_v28 = vunpack.c.l.b16 %v1556_v40 }
 0x28d   : > { %v1500_v31 = vpop.f32.mrf.mxu2  ;;  %v1529_v22 = vpop.f32.mrf.mxu3  ;;  %1918 = vmatmul.bf16.gmra.mxu2 %v1874_v19 }
 0x28e   : > { %v1444_v0 = vpop.f32.mrf.mxu0  ;;  %v1473_v42 = vpop.f32.mrf.mxu1  ;;  %v1530_v47 = vadd.f32 %v1529_v22, %v1500_v31  ;;  %v1851_v31 = vpack.c.bf16 %v1520_v3, %v1520_v3  ;;  %v2062_v22 = vunpack.c.l.b16 %v1853_v11 }
 0x28f   : > { %v1474_v43 = vadd.f32 %v1473_v42, %v1444_v0  ;;  %v1760_v0 = vunpack.c.l.b16 %v1550_v39  ;;  %v1573_v42 = vunpack.c.l.b16 %v1541_v6 }
 0x290   : > { %v1855_v30 = vpack.c.bf16 %v1530_v47, %v1530_v47  ;;  %v2068_v25 = vpack.c.b16 %v2063_v61, %v2062_v22  ;;  %v2060_v21 = vunpack.c.l.b16 %v1851_v31  ;;  %v4747_v47 = vld [vmem:[#allocation18_spill] sm:$0xff] }
 0x291   : > { %v1557_v10 = vpack.c.bf16 %v1474_v43, %v1474_v43  ;;  %v1768_v40 = vpack.c.b16 %v1761_v13, %v1760_v0  ;;  %v1572_v43 = vunpack.c.l.b16 %v1540_v5  ;;  %v1839_v23 = vpack.c.bf16 %v4747_v47, %v4747_v47 }
 0x292   : > { %v2064_v44 = vunpack.c.l.b16 %v1855_v30  ;;  %v2067_v56 = vpack.c.b16 %v2061_v46, %v2060_v21 }
 0x293   : > { %v1767_v57 = vunpack.c.l.b16 %v1557_v10  ;;  %v2059_v10 = vunpack.c.l.b16 %v1850_v20  ;;  %v1577_v55 = vpack.c.b16 %v1573_v42, %v1572_v43  ;;  %v1871_v54 = vunpack.c.l.b16 %v1839_v23 }
 0x295   : > { %v1771_v62 = vpack.c.b16 %v1767_v57, %v1766_v28  ;;  %v1502_v8 = vpop.f32.mrf.mxu2  ;;  %v1531_v52 = vpop.f32.mrf.mxu3  ;;  %v1872_v28 = vunpack.c.l.b16 %v1840_v36  ;;  %v2066_v57 = vpack.c.b16 %v2059_v10, %v2058_v38 }
 0x296   : > { %v1532_v37 = vadd.f32 %v1531_v52, %v1502_v8  ;;  %1624 = vmatmul.bf16.gmra.mxu0 %v1576_v41 }
 0x297   : > { %1792 = vmatpush.bf16.msrb.mxu1 %v1771_v62  ;;  %v1876_v32 = vpack.c.b16 %v1872_v28, %v1871_v54 }
 0x298   : > { %v1856_v35 = vpack.c.bf16 %v1532_v37, %v1532_v37 }
 0x29a   : > { %v2065_v18 = vunpack.c.l.b16 %v1856_v35 }
 0x29b   : > { %1793 = vmatpush.bf16.msrb.mxu1 %v1770_v51 }
 0x29c   : > { %v2069_v19 = vpack.c.b16 %v2065_v18, %v2064_v44 }
 0x29d   : > { %1923 = vmatmul.bf16.gmra.mxu2 %v1875_v58 }
 0x29e   : > { %2090 = vmatpush.bf16.msrb.mxu3 %v2069_v19 }
 0x29f   : > { %1794 = vmatpush.bf16.msrb.mxu1 %v1769_v14 }
 0x2a2   : > { %2091 = vmatpush.bf16.msrb.mxu3 %v2068_v25 }
 0x2a3   : > { %1795 = vmatpush.bf16.msrb.mxu1 %v1768_v40 }
 0x2a6   : > { %2092 = vmatpush.bf16.msrb.mxu3 %v2067_v56  ;;  %1629 = vmatmul.bf16.gmra.mxu0 %v1577_v55 }
 0x2aa   : > { %2093 = vmatpush.bf16.msrb.mxu3 %v2066_v57 }
 0x2ad   : > { %1928 = vmatmul.bf16.gmra.mxu2 %v1876_v32 }
 0x2f3   : > { %v1615_v9 = vpop.f32.mrf.mxu0 }
 0x2f4   : > { %v1636_v41 = vsel %vm1635_vm9, %v1615_v9, -inf }
 0x2f5   : > { %1637 = vmax.xlane.f32.xlu0 %v1636_v41 }
 0x2fb   : > { %v1617_v63 = vpop.f32.mrf.mxu0 }
 0x2fc   : > { %v1639_v12 = vsel %vm1635_vm9, %v1617_v63, -inf }
 0x300   : > { %v1914_v4 = vpop.f32.mrf.mxu2 }
 0x301   : > { %v1934_v50 = vsel %vm1635_vm9, %v1914_v4, -inf }
 0x302   : > { %1935 = vmax.xlane.f32.xlu1 %v1934_v50 }
 0x303   : > { %v4480_v62 = vpop.f32.mrf.mxu0 }
 0x304   : > { %v1642_v7 = vsel %vm1635_vm9, %v4480_v62, -inf }
 0x308   : > { %v1916_v8 = vpop.f32.mrf.mxu2 }
 0x309   : > { %v1937_v52 = vsel %vm1635_vm9, %v1916_v8, -inf }
 0x30a   : > { %1938 = vmax.xlane.f32.xlu2 %v1937_v52  ;;  %1640 = vmax.xlane.f32.xlu1 %v1639_v12 }
 0x30b   : > { %v4484_v30 = vpop.f32.mrf.mxu0 }
 0x30c   : > { %v1645_v1 = vsel %vm1635_vm9, %v4484_v30, -inf }
 0x310   : > { %v1919_v37 = vpop.f32.mrf.mxu2 }
 0x311   : > { %v1940_v2 = vsel %vm1635_vm9, %v1919_v37, -inf }
 0x312   : > { %1941 = vmax.xlane.f32.xlu2 %v1940_v2  ;;  %1643 = vmax.xlane.f32.xlu1 %v1642_v7 }
 0x313   : > { %v4489_v49 = vpop.f32.mrf.mxu0 }
 0x314   : > { %v1648_v59 = vsel %vm1635_vm9, %v4489_v49, -inf }
 0x318   : > { %v4491_v15 = vpop.f32.mrf.mxu2 }
 0x319   : > { %v1943_v26 = vsel %vm1635_vm9, %v4491_v15, -inf }
 0x31a   : > { %1944 = vmax.xlane.f32.xlu0 %v1943_v26  ;;  %1646 = vmax.xlane.f32.xlu2 %v1645_v1 }
 0x31b   : > { %v4497_v33 = vpop.f32.mrf.mxu0 }
 0x31c   : > { %v1651_v11 = vsel %vm1635_vm9, %v4497_v33, -inf }
 0x320   : > { %v4499_v35 = vpop.f32.mrf.mxu2 }
 0x321   : > { %v1946_v27 = vsel %vm1635_vm9, %v4499_v35, -inf }
 0x322   : > { %1947 = vmax.xlane.f32.xlu0 %v1946_v27  ;;  %1649 = vmax.xlane.f32.xlu2 %v1648_v59 }
 0x323   : > { %v4505_v24 = vpop.f32.mrf.mxu0 }
 0x324   : > { %v1654_v6 = vsel %vm1635_vm9, %v4505_v24, -inf }
 0x328   : > { %v4507_v51 = vpop.f32.mrf.mxu2 }
 0x329   : > { %v1949_v3 = vsel %vm1635_vm9, %v4507_v51, -inf }
 0x32a   : > { %1950 = vmax.xlane.f32.xlu1 %v1949_v3  ;;  %1652 = vmax.xlane.f32.xlu0 %v1651_v11 }
 0x32b   : > { %v4513_v44 = vpop.f32.mrf.mxu0 }
 0x32c   : > { %v1657_v39 = vsel %vm1635_vm9, %v4513_v44, -inf }
 0x330   : > { %v4515_v18 = vpop.f32.mrf.mxu2 }
 0x331   : > { %v1952_v60 = vsel %vm1635_vm9, %v4515_v18, -inf }
 0x332   : > { %1655 = vmax.xlane.f32.xlu0 %v1654_v6  ;;  %1658 = vmax.xlane.f32.xlu1 %v1657_v39 }
 0x338   : > { %v4521_v16 = vpop.f32.mrf.mxu2 }
 0x339   : > { %v1955_v58 = vsel %vm1635_vm9, %v4521_v16, -inf }
 0x33a   : > { %1956 = vmax.xlane.f32.xlu2 %v1955_v58  ;;  %1953 = vmax.xlane.f32.xlu1 %v1952_v60 }
 0x368   : > { %v1638_v48 = vpop.xlane.xlu0 %1637 }
 0x369   : > { %v1660_v61 = vsub.f32 %v1615_v9, %v1638_v48 }
 0x36b   : > { %v1668_v19 = vmul.f32 1.442695, %v1660_v61 }
 0x36d   : > { %3478 = vpow2.f32 %v1668_v19 }
 0x373   : > { %v4527_v13 = vpop.eup %3478 }
 0x374   : > { %v1684_v14 = vsel %vm1635_vm9, %v4527_v13, 0.0 }
 0x375   : > { %v1936_v53 = vpop.xlane.xlu1 %1935  ;;  %1685 = vadd.xlane.f32.xlu1 %v1684_v14 }
 0x376   : > { %v1958_v5 = vsub.f32 %v1914_v4, %v1936_v53 }
 0x378   : > { %v1966_v31 = vmul.f32 1.442695, %v1958_v5 }
 0x37a   : > { %3480 = vpow2.f32 %v1966_v31 }
 0x37d   : > { %v1939_v22 = vpop.xlane.xlu2 %1938  ;;  %v1641_v17 = vpop.xlane.xlu1 %1640 }
 0x37e   : > { %v1959_v34 = vsub.f32 %v1916_v8, %v1939_v22  ;;  %v1661_v45 = vsub.f32 %v1617_v63, %v1641_v17 }
 0x380   : > { %v4531_v0 = vpop.eup %3480  ;;  %v1968_v42 = vmul.f32 1.442695, %v1959_v34  ;;  %v1670_v20 = vmul.f32 1.442695, %v1661_v45 }
 0x381   : > { %v1982_v46 = vsel %vm1635_vm9, %v4531_v0, 0.0 }
 0x382   : > { %3482 = vpow2.f32 %v1968_v42  ;;  %1983 = vadd.xlane.f32.xlu2 %v1982_v46 }
 0x383   : > { %3484 = vpow2.f32 %v1670_v20 }
 0x385   : > { %v1942_v25 = vpop.xlane.xlu2 %1941  ;;  %v1644_v40 = vpop.xlane.xlu1 %1643 }
 0x386   : > { %v1960_v43 = vsub.f32 %v1919_v37, %v1942_v25  ;;  %v1662_v29 = vsub.f32 %v4480_v62, %v1644_v40 }
 0x388   : > { %v4536_v21 = vpop.eup %3482  ;;  %v1970_v36 = vmul.f32 1.442695, %v1960_v43  ;;  %v1672_v10 = vmul.f32 1.442695, %v1662_v29 }
 0x389   : > { %v4538_v56 = vpop.eup %3484  ;;  %v1985_v55 = vsel %vm1635_vm9, %v4536_v21, 0.0 }
 0x38a   : > { %3486 = vpow2.f32 %v1970_v36  ;;  %v1687_v47 = vsel %vm1635_vm9, %v4538_v56, 0.0  ;;  %1986 = vadd.xlane.f32.xlu0 %v1985_v55 }
 0x38b   : > { %3488 = vpow2.f32 %v1672_v10  ;;  %1688 = vadd.xlane.f32.xlu2 %v1687_v47 }
 0x38d   : > { %v1945_v23 = vpop.xlane.xlu0 %1944  ;;  %v1647_v38 = vpop.xlane.xlu2 %1646 }
 0x38e   : > { %v1961_v28 = vsub.f32 %v4491_v15, %v1945_v23  ;;  %v1663_v57 = vsub.f32 %v4484_v30, %v1647_v38 }
 0x390   : > { %v4546_v54 = vpop.eup %3486  ;;  %v1972_v32 = vmul.f32 1.442695, %v1961_v28  ;;  %v1674_v9 = vmul.f32 1.442695, %v1663_v57 }
 0x391   : > { %v4548_v41 = vpop.eup %3488  ;;  %v1988_v63 = vsel %vm1635_vm9, %v4546_v54, 0.0 }
 0x392   : > { %3490 = vpow2.f32 %v1972_v32  ;;  %v1690_v4 = vsel %vm1635_vm9, %v4548_v41, 0.0  ;;  %1989 = vadd.xlane.f32.xlu0 %v1988_v63 }
 0x393   : > { %3492 = vpow2.f32 %v1674_v9  ;;  %1691 = vadd.xlane.f32.xlu2 %v1690_v4 }
 0x395   : > { %v1948_v50 = vpop.xlane.xlu0 %1947  ;;  %v1650_v62 = vpop.xlane.xlu2 %1649 }
 0x396   : > { %v1962_v8 = vsub.f32 %v4499_v35, %v1948_v50  ;;  %v1664_v52 = vsub.f32 %v4489_v49, %v1650_v62 }
 0x398   : > { %v4556_v12 = vpop.eup %3490  ;;  %v1974_v30 = vmul.f32 1.442695, %v1962_v8  ;;  %v1676_v37 = vmul.f32 1.442695, %v1664_v52 }
 0x399   : > { %v4558_v2 = vpop.eup %3492  ;;  %v1991_v7 = vsel %vm1635_vm9, %v4556_v12, 0.0 }
 0x39a   : > { %3494 = vpow2.f32 %v1974_v30  ;;  %v1693_v15 = vsel %vm1635_vm9, %v4558_v2, 0.0  ;;  %1992 = vadd.xlane.f32.xlu1 %v1991_v7 }
 0x39b   : > { %3496 = vpow2.f32 %v1676_v37  ;;  %1694 = vadd.xlane.f32.xlu0 %v1693_v15 }
 0x39d   : > { %v1951_v26 = vpop.xlane.xlu1 %1950  ;;  %v1653_v1 = vpop.xlane.xlu0 %1652 }
 0x39e   : > { %v1963_v49 = vsub.f32 %v4507_v51, %v1951_v26  ;;  %v1665_v35 = vsub.f32 %v4497_v33, %v1653_v1 }
 0x3a0   : > { %v4566_v27 = vpop.eup %3494  ;;  %v1976_v59 = vmul.f32 1.442695, %v1963_v49  ;;  %v1678_v3 = vmul.f32 1.442695, %v1665_v35 }
 0x3a1   : > { %v4568_v11 = vpop.eup %3496  ;;  %v1994_v6 = vsel %vm1635_vm9, %v4566_v27, 0.0 }
 0x3a2   : > { %3498 = vpow2.f32 %v1976_v59  ;;  %v1696_v39 = vsel %vm1635_vm9, %v4568_v11, 0.0  ;;  %1995 = vadd.xlane.f32.xlu1 %v1994_v6 }
 0x3a3   : > { %3500 = vpow2.f32 %v1678_v3  ;;  %1697 = vadd.xlane.f32.xlu0 %v1696_v39 }
 0x3a5   : > { %v1656_v58 = vpop.xlane.xlu0 %1655  ;;  %v1659_v51 = vpop.xlane.xlu1 %1658 }
 0x3a6   : > { %v1666_v33 = vsub.f32 %v4505_v24, %v1656_v58  ;;  %v1667_v45 = vsub.f32 %v4513_v44, %v1659_v51 }
 0x3a8   : > { %v4575_v60 = vpop.eup %3498  ;;  %v1680_v48 = vmul.f32 1.442695, %v1666_v33  ;;  %v1682_v20 = vmul.f32 1.442695, %v1667_v45 }
 0x3a9   : > { %v4577_v61 = vpop.eup %3500  ;;  %v1997_v19 = vsel %vm1635_vm9, %v4575_v60, 0.0 }
 0x3aa   : > { %3502 = vpow2.f32 %v1680_v48  ;;  %1998 = vadd.xlane.f32.xlu2 %v1997_v19  ;;  %v1699_v14 = vsel %vm1635_vm9, %v4577_v61, 0.0 }
 0x3ab   : > { %1700 = vadd.xlane.f32.xlu1 %v1699_v14 }
 0x3ad   : > { %v1957_v53 = vpop.xlane.xlu2 %1956  ;;  %v1954_v5 = vpop.xlane.xlu1 %1953 }
 0x3ae   : > { %v1965_v31 = vsub.f32 %v4521_v16, %v1957_v53  ;;  %v1964_v24 = vsub.f32 %v4515_v18, %v1954_v5 }
 0x3b0   : > { %v4585_v22 = vpop.eup %3502  ;;  %v1980_v17 = vmul.f32 1.442695, %v1965_v31  ;;  %v1978_v34 = vmul.f32 1.442695, %v1964_v24 }
 0x3b1   : > { %v1702_v42 = vsel %vm1635_vm9, %v4585_v22, 0.0 }
 0x3b2   : > { %3504 = vpow2.f32 %v1980_v17 }
 0x3b3   : > { %3506 = vpow2.f32 %v1978_v34  ;;  %1703 = vadd.xlane.f32.xlu1 %v1702_v42 }
 0x3b4   : > { %3508 = vpow2.f32 %v1682_v20 }
 0x3b8   : > { %v4590_v46 = vpop.eup %3504 }
 0x3b9   : > { %v4592_v25 = vpop.eup %3506  ;;  %v2003_v18 = vsel %vm1635_vm9, %v4590_v46, 0.0 }
 0x3ba   : > { %2004 = vadd.xlane.f32.xlu0 %v2003_v18  ;;  %v2000_v16 = vsel %vm1635_vm9, %v4592_v25, 0.0  ;;  %v4598_v44 = vpop.eup %3508 }
 0x3bb   : > { %2001 = vadd.xlane.f32.xlu2 %v2000_v16  ;;  %v1705_v40 = vsel %vm1635_vm9, %v4598_v44, 0.0 }
 0x3c3   : > { %1706 = vadd.xlane.f32.xlu2 %v1705_v40 }
 0x3e8   : > { %v1686_v29 = vpop.xlane.xlu1 %1685 }
 0x3f5   : > { %v1984_v43 = vpop.xlane.xlu2 %1983 }
 0x3f6   : > { %3510 = vrcp.f32 %v1984_v43 }
 0x3f7   : > { %3512 = vrcp.f32 %v1686_v29 }
 0x3fc   : > { %v3511_v10 = vpop.eup %3510 }
 0x3fd   : > { %v1987_v36 = vpop.xlane.xlu0 %1986  ;;  %v3513_v47 = vpop.eup %3512  ;;  %v2014_v23 = vmul.f32 %v3511_v10, %v4531_v0  ;;  %v3346_v10 = vld [vmem:[#allocation11 + $0x74] sm:$0xf0] }
 0x3fe   : > { %v1689_v55 = vpop.xlane.xlu2 %1688  ;;  %3514 = vrcp.f32 %v1987_v36  ;;  %v1716_v38 = vmul.f32 %v3513_v47, %v4527_v13  ;;  %v3151_v36 = vld [vmem:[#allocation11 + $0x70] sm:$0xf] }
 0x3ff   : > { %3516 = vrcp.f32 %v1689_v55  ;;  %v2022_v32 = vpack.c.bf16 %v2014_v23, %v2014_v23  ;;  %v3345_v55 = vld [vmem:[#allocation11 + $0x74] sm:$0xf]  ;;  %v3152_v23 = vor.u32 %v3346_v10, %v3151_v36  ;;  %v3199_v10 = vld [vmem:[#allocation11 + $0xd0] sm:$0xf] }
 0x400   : > { %v1724_v4 = vpack.c.bf16 %v1716_v38, %v1716_v38  ;;  %v3153_v38 = vld [vmem:[#allocation11 + $0x78] sm:$0xf0] }
 0x401   : > { %v2038_v30 = vunpack.c.l.b16 %v2022_v32  ;;  %2377 = vmatpush.bf16.msra.mxu0 %v3152_v23 }
 0x402   : > { %v1740_v7 = vunpack.c.l.b16 %v1724_v4 }
 0x404   : > { %v3515_v28 = vpop.eup %3514 }
 0x405   : > { %v3517_v57 = vpop.eup %3516  ;;  %v2015_v9 = vmul.f32 %v3515_v28, %v4536_v21  ;;  %v1990_v63 = vpop.xlane.xlu0 %1989  ;;  %v3143_v28 = vld [vmem:[#allocation11 + $0x60] sm:$0xf] }
 0x406   : > { %v1717_v50 = vmul.f32 %v3517_v57, %v4538_v56  ;;  %v1692_v62 = vpop.xlane.xlu2 %1691  ;;  %3518 = vrcp.f32 %v1990_v63  ;;  %v3344_v57 = vld [vmem:[#allocation11 + $0x64] sm:$0xf0]  ;;  %v3215_v63 = vld [vmem:[#allocation11 + $0xf0] sm:$0xf] }
 0x407   : > { %v2023_v8 = vpack.c.bf16 %v2015_v9, %v2015_v9  ;;  %3520 = vrcp.f32 %v1692_v62  ;;  %v3343_v9 = vld [vmem:[#allocation11 + $0x64] sm:$0xf] }
 0x408   : > { %v1725_v52 = vpack.c.bf16 %v1717_v50, %v1717_v50 }
 0x409   : > { %v2039_v37 = vunpack.c.l.b16 %v2023_v8  ;;  %v3362_v8 = vld [vmem:[#allocation11 + $0xf4] sm:$0xf0] }
 0x40a   : > { %v1741_v0 = vunpack.c.l.b16 %v1725_v52  ;;  %v3217_v52 = vld [vmem:[#allocation11 + $0xf8] sm:$0xf0] }
 0x40b   : > { %v2046_v15 = vpack.c.b16 %v2039_v37, %v2038_v30 }
 0x40c   : > { %v1748_v13 = vpack.c.b16 %v1741_v0, %v1740_v7  ;;  %v3519_v1 = vpop.eup %3518  ;;  %v3216_v7 = vor.u32 %v3362_v8, %v3215_v63  ;;  %v3121_v63 = vld [vmem:[#allocation11 + $0x38] sm:$0xf0] }
 0x40d   : > { %3057 = vmatmul.msk.bf16.vlgmr.msrb.gmra.mxu3 %vm1635_vm9, %v2046_v15  ;;  %v1993_v26 = vpop.xlane.xlu1 %1992  ;;  %v3521_v56 = vpop.eup %3520  ;;  %v2016_v49 = vmul.f32 %v3519_v1, %v4546_v54  ;;  %v3135_v15 = vld [vmem:[#allocation11 + $0x50] sm:$0xf]  ;;  %v3341_v1 = vld [vmem:[#allocation11 + $0x54] sm:$0xf] }
 0x40e   : > { %v1695_v21 = vpop.xlane.xlu0 %1694  ;;  %3053 = vmatmul.msk.bf16.vlgmr.msrb.gmra.mxu1 %vm1635_vm9, %v1748_v13  ;;  %3522 = vrcp.f32 %v1993_v26  ;;  %v1718_v35 = vmul.f32 %v3521_v56, %v4548_v41  ;;  %v3342_v13 = vld [vmem:[#allocation11 + $0x54] sm:$0xf0] }
 0x40f   : > { %3524 = vrcp.f32 %v1695_v21  ;;  %v2024_v6 = vpack.c.bf16 %v2016_v49, %v2016_v49  ;;  %v3137_v21 = vld [vmem:[#allocation11 + $0x58] sm:$0xf0]  ;;  %2406 = vmatpush.bf16.msra.mxu1 %v3216_v7  ;;  %v3335_v7 = vld [vmem:[#allocation11 + $0x24] sm:$0xf] }
 0x410   : > { %v1726_v51 = vpack.c.bf16 %v1718_v35, %v1718_v35  ;;  %v3136_v35 = vor.u32 %v3342_v13, %v3135_v15  ;;  %v3113_v15 = vld [vmem:[#allocation11 + $0x28] sm:$0xf0]  ;;  %v3183_v13 = vld [vmem:[#allocation11 + $0xb0] sm:$0xf] }
 0x411   : > { %v2040_v53 = vunpack.c.l.b16 %v2024_v6  ;;  %v3140_v6 = vor.u32 %v3341_v1, %v3137_v21  ;;  %v3116_v1 = vor.u32 %v3335_v7, %v3113_v15 }
 0x412   : > { %v1742_v31 = vunpack.c.l.b16 %v1726_v51 }
 0x414   : > { %v3523_v59 = vpop.eup %3522 }
 0x415   : > { %v3525_v3 = vpop.eup %3524  ;;  %v2017_v39 = vmul.f32 %v3523_v59, %v4556_v12  ;;  %v1996_v58 = vpop.xlane.xlu1 %1995 }
 0x416   : > { %v1719_v33 = vmul.f32 %v3525_v3, %v4558_v2  ;;  %v1698_v48 = vpop.xlane.xlu0 %1697  ;;  %3526 = vrcp.f32 %v1996_v58 }
 0x417   : > { %v2025_v19 = vpack.c.bf16 %v2017_v39, %v2017_v39  ;;  %3528 = vrcp.f32 %v1698_v48 }
 0x418   : > { %v1727_v14 = vpack.c.bf16 %v1719_v33, %v1719_v33 }
 0x419   : > { %v2041_v5 = vunpack.c.l.b16 %v2025_v19 }
 0x41a   : > { %v1743_v54 = vunpack.c.l.b16 %v1727_v14 }
 0x41b   : > { %v2047_v24 = vpack.c.b16 %v2041_v5, %v2040_v53 }
 0x41c   : > { %v1749_v41 = vpack.c.b16 %v1743_v54, %v1742_v31  ;;  %v3527_v17 = vpop.eup %3526 }
 0x41d   : > { %v1999_v34 = vpop.xlane.xlu2 %1998  ;;  %3058 = vmatmul.msk.bf16.gmra.mxu3 %vm1635_vm9, %v2047_v24  ;;  %v3529_v12 = vpop.eup %3528  ;;  %v2018_v42 = vmul.f32 %v3527_v17, %v4566_v27  ;;  %v3145_v27 = vld [vmem:[#allocation11 + $0x68] sm:$0xf0] }
 0x41e   : > { %3530 = vrcp.f32 %v1999_v34  ;;  %3054 = vmatmul.msk.bf16.gmra.mxu1 %vm1635_vm9, %v1749_v41  ;;  %v1701_v2 = vpop.xlane.xlu1 %1700  ;;  %v1720_v45 = vmul.f32 %v3529_v12, %v4568_v11  ;;  %v3156_v11 = vor.u32 %v3345_v55, %v3153_v38  ;;  %v3148_v37 = vor.u32 %v3343_v9, %v3145_v27  ;;  %v3358_v55 = vld [vmem:[#allocation11 + $0xd4] sm:$0xf0]  ;;  %v3357_v38 = vld [vmem:[#allocation11 + $0xd4] sm:$0xf] }
 0x41f   : > { %3532 = vrcp.f32 %v1701_v2  ;;  %v2026_v40 = vpack.c.bf16 %v2018_v42, %v2018_v42  ;;  %v3360_v42 = vld [vmem:[#allocation11 + $0xe4] sm:$0xf0]  ;;  %v3200_v23 = vor.u32 %v3358_v55, %v3199_v10  ;;  %v3337_v9 = vld [vmem:[#allocation11 + $0x34] sm:$0xf] }
 0x420   : > { %v1728_v16 = vpack.c.bf16 %v1720_v45, %v1720_v45  ;;  %2435 = vmatpush.bf16.msra.mxu2 %v3156_v11  ;;  %v3207_v45 = vld [vmem:[#allocation11 + $0xe0] sm:$0xf]  ;;  %v3338_v11 = vld [vmem:[#allocation11 + $0x34] sm:$0xf0] }
 0x421   : > { %v2042_v50 = vunpack.c.l.b16 %v2026_v40  ;;  %v3127_v40 = vld [vmem:[#allocation11 + $0x40] sm:$0xf] }
 0x422   : > { %v1744_v4 = vunpack.c.l.b16 %v1728_v16  ;;  %v3209_v16 = vld [vmem:[#allocation11 + $0xe8] sm:$0xf0] }
 0x424   : > { %v3531_v20 = vpop.eup %3530  ;;  %2436 = vmatpush.bf16.msra.mxu2 %v3148_v37  ;;  %v3336_v37 = vld [vmem:[#allocation11 + $0x24] sm:$0xf0] }
 0x425   : > { %v3533_v18 = vpop.eup %3532  ;;  %v2019_v43 = vmul.f32 %v3531_v20, %v4575_v60  ;;  %v3144_v60 = vor.u32 %v3344_v57, %v3143_v28  ;;  %v3359_v20 = vld [vmem:[#allocation11 + $0xe4] sm:$0xf]  ;;  %v3201_v28 = vld [vmem:[#allocation11 + $0xd8] sm:$0xf0] }
 0x426   : > { %v1721_v29 = vmul.f32 %v3533_v18, %v4577_v61  ;;  %v3361_v61 = vld [vmem:[#allocation11 + $0xf4] sm:$0xf]  ;;  %v1704_v59 = vpop.xlane.xlu1 %1703  ;;  %v3208_v18 = vor.u32 %v3360_v42, %v3207_v45  ;;  %v3204_v57 = vor.u32 %v3357_v38, %v3201_v28  ;;  %v3169_v45 = vld [vmem:[#allocation11 + $0x98] sm:$0xf0] }
 0x427   : > { %v2027_v47 = vpack.c.bf16 %v2019_v43, %v2019_v43  ;;  %v3220_v0 = vor.u32 %v3361_v61, %v3217_v52  ;;  %2378 = vmatpush.bf16.msra.mxu0 %v3144_v60  ;;  %v3340_v43 = vld [vmem:[#allocation11 + $0x44] sm:$0xf0]  ;;  %v3355_v60 = vld [vmem:[#allocation11 + $0xc4] sm:$0xf]  ;;  %v3193_v61 = vld [vmem:[#allocation11 + $0xc8] sm:$0xf0] }
 0x428   : > { %v1729_v32 = vpack.c.bf16 %v1721_v29, %v1721_v29  ;;  %2437 = vmatpush.bf16.msra.mxu2 %v3140_v6  ;;  %v3339_v29 = vld [vmem:[#allocation11 + $0x44] sm:$0xf]  ;;  %2407 = vmatpush.bf16.msra.mxu1 %v3208_v18  ;;  %v3128_v36 = vor.u32 %v3340_v43, %v3127_v40  ;;  %v3196_v52 = vor.u32 %v3355_v60, %v3193_v61  ;;  %v3333_v6 = vld [vmem:[#allocation11 + $0x14] sm:$0xf]  ;;  %v3348_v18 = vld [vmem:[#allocation11 + $0x84] sm:$0xf0] }
 0x429   : > { %v2043_v62 = vunpack.c.l.b16 %v2027_v47  ;;  %2464 = vmatpush.bf16.msra.mxu3 %v3220_v0  ;;  %v3161_v40 = vld [vmem:[#allocation11 + $0x88] sm:$0xf0] }
 0x42a   : > { %v1745_v30 = vunpack.c.l.b16 %v1729_v32  ;;  %v3119_v32 = vld [vmem:[#allocation11 + $0x30] sm:$0xf] }
 0x42b   : > { %v2048_v26 = vpack.c.b16 %v2043_v62, %v2042_v50  ;;  %2379 = vmatpush.bf16.msra.mxu0 %v3136_v35  ;;  %v3120_v27 = vor.u32 %v3338_v11, %v3119_v32  ;;  %v3191_v50 = vld [vmem:[#allocation11 + $0xc0] sm:$0xf]  ;;  %v3356_v62 = vld [vmem:[#allocation11 + $0xc4] sm:$0xf0] }
 0x42c   : > { %v1750_v56 = vpack.c.b16 %v1745_v30, %v1744_v4  ;;  %2408 = vmatpush.bf16.msra.mxu1 %v3200_v23  ;;  %v3124_v4 = vor.u32 %v3337_v9, %v3121_v63  ;;  %v3192_v8 = vor.u32 %v3356_v62, %v3191_v50  ;;  %v3111_v30 = vld [vmem:[#allocation11 + $0x20] sm:$0xf] }
 0x42d   : > { %v2005_v49 = vpop.xlane.xlu0 %2004  ;;  %3059 = vmatmul.msk.bf16.gmra.mxu3 %vm1635_vm9, %v2048_v26  ;;  %v3112_v0 = vor.u32 %v3336_v37, %v3111_v30  ;;  %v3354_v26 = vld [vmem:[#allocation11 + $0xb4] sm:$0xf0] }
 0x42e   : > { %3534 = vrcp.f32 %v2005_v49  ;;  %v2002_v3 = vpop.xlane.xlu2 %2001  ;;  %3055 = vmatmul.msk.bf16.gmra.mxu1 %vm1635_vm9, %v1750_v56  ;;  %v3184_v21 = vor.u32 %v3354_v26, %v3183_v13  ;;  %v3353_v56 = vld [vmem:[#allocation11 + $0xb4] sm:$0xf]  ;;  %v3185_v49 = vld [vmem:[#allocation11 + $0xb8] sm:$0xf0] }
 0x42f   : > { %3536 = vrcp.f32 %v2002_v3  ;;  %2380 = vmatpush.bf16.msra.mxu0 %v3128_v36  ;;  %v3188_v35 = vor.u32 %v3353_v56, %v3185_v49  ;;  %v3334_v3 = vld [vmem:[#allocation11 + $0x14] sm:$0xf0] }
 0x430   : > { %3538 = vrcp.f32 %v1704_v59  ;;  %2409 = vmatpush.bf16.msra.mxu1 %v3192_v8  ;;  %v3103_v59 = vld [vmem:[#allocation11 + $0x10] sm:$0xf] }
 0x433   : > { %2381 = vmatpush.bf16.msra.mxu0 %v3120_v27 }
 0x434   : > { %v3535_v39 = vpop.eup %3534  ;;  %2410 = vmatpush.bf16.msra.mxu1 %v3184_v21 }
 0x435   : > { %v3537_v58 = vpop.eup %3536  ;;  %v2021_v51 = vmul.f32 %v3535_v39, %v4590_v46  ;;  %v3104_v39 = vor.u32 %v3334_v3, %v3103_v59 }
 0x436   : > { %v2020_v33 = vmul.f32 %v3537_v58, %v4592_v25  ;;  %v1707_v48 = vpop.xlane.xlu2 %1706  ;;  %v3539_v19 = vpop.eup %3538  ;;  %v3105_v58 = vld [vmem:[#allocation11 + $0x18] sm:$0xf0] }
 0x437   : > { %v2029_v14 = vpack.c.bf16 %v2021_v51, %v2021_v51  ;;  %3540 = vrcp.f32 %v1707_v48  ;;  %v1722_v31 = vmul.f32 %v3539_v19, %v4585_v22  ;;  %v3212_v22 = vor.u32 %v3359_v20, %v3209_v16  ;;  %2382 = vmatpush.bf16.msra.mxu0 %v3112_v0  ;;  %v3352_v48 = vld [vmem:[#allocation11 + $0xa4] sm:$0xf0]  ;;  %v3351_v19 = vld [vmem:[#allocation11 + $0xa4] sm:$0xf]  ;;  %v3159_v20 = vld [vmem:[#allocation11 + $0x80] sm:$0xf] }
 0x438   : > { %v2028_v53 = vpack.c.bf16 %v2020_v33, %v2020_v33  ;;  %v3108_v51 = vor.u32 %v3333_v6, %v3105_v58  ;;  %v3175_v33 = vld [vmem:[#allocation11 + $0xa0] sm:$0xf]  ;;  %v3347_v16 = vld [vmem:[#allocation11 + $0x84] sm:$0xf] }
 0x439   : > { %v2045_v5 = vunpack.c.l.b16 %v2029_v14  ;;  %v1730_v17 = vpack.c.bf16 %v1722_v31, %v1722_v31  ;;  %2465 = vmatpush.bf16.msra.mxu3 %v3212_v22  ;;  %v3176_v14 = vor.u32 %v3352_v48, %v3175_v33  ;;  %v3095_v31 = vld [vmem:[#allocation11] sm:$0xf]  ;;  %v3160_v22 = vor.u32 %v3348_v18, %v3159_v20 }
 0x43a   : > { %v2044_v54 = vunpack.c.l.b16 %v2028_v53  ;;  %v3177_v53 = vld [vmem:[#allocation11 + $0xa8] sm:$0xf0]  ;;  %v3164_v43 = vor.u32 %v3347_v16, %v3161_v40 }
 0x43b   : > { %v1746_v46 = vunpack.c.l.b16 %v1730_v17  ;;  %2383 = vmatpush.bf16.msra.mxu0 %v3104_v39  ;;  %2411 = vmatpush.bf16.msra.mxu1 %v3176_v14  ;;  %v3097_v17 = vld [vmem:[#allocation11 + $0x8] sm:$0xf0] }
 0x43c   : > { %v2049_v24 = vpack.c.b16 %v2045_v5, %v2044_v54  ;;  %v3180_v5 = vor.u32 %v3351_v19, %v3177_v53  ;;  %v3332_v54 = vld [vmem:[#allocation11 + $0x4] sm:$0xf0] }
 0x43d   : > { %v3541_v41 = vpop.eup %3540  ;;  %2466 = vmatpush.bf16.msra.mxu3 %v3204_v57 }
 0x43e   : > { %v1723_v34 = vmul.f32 %v3541_v41, %v4598_v44  ;;  %3060 = vmatmul.msk.bf16.gmra.mxu3 %vm1635_vm9, %v2049_v24  ;;  %v3129_v44 = vld [vmem:[#allocation11 + $0x48] sm:$0xf0]  ;;  %v3331_v24 = vld [vmem:[#allocation11 + $0x4] sm:$0xf]  ;;  %v3096_v41 = vor.u32 %v3332_v54, %v3095_v31 }
 0x43f   : > { %v3132_v47 = vor.u32 %v3339_v29, %v3129_v44 }
 0x440   : > { %v1731_v12 = vpack.c.bf16 %v1723_v34, %v1723_v34  ;;  %v3167_v34 = vld [vmem:[#allocation11 + $0x90] sm:$0xf]  ;;  %2384 = vmatpush.bf16.msra.mxu0 %v3096_v41 }
 0x441   : > { %2438 = vmatpush.bf16.msra.mxu2 %v3132_v47  ;;  %2467 = vmatpush.bf16.msra.mxu3 %v3196_v52 }
 0x442   : > { %v1747_v2 = vunpack.c.l.b16 %v1731_v12  ;;  %v3350_v12 = vld [vmem:[#allocation11 + $0x94] sm:$0xf0] }
 0x444   : > { %v1751_v25 = vpack.c.b16 %v1747_v2, %v1746_v46  ;;  %v3100_v46 = vor.u32 %v3331_v24, %v3097_v17  ;;  %v3168_v2 = vor.u32 %v3350_v12, %v3167_v34 }
 0x445   : > { %2439 = vmatpush.bf16.msra.mxu2 %v3124_v4  ;;  %2468 = vmatpush.bf16.msra.mxu3 %v3188_v35 }
 0x446   : > { %3056 = vmatmul.msk.bf16.gmra.mxu1 %vm1635_vm9, %v1751_v25  ;;  %v3349_v25 = vld [vmem:[#allocation11 + $0x94] sm:$0xf] }
 0x447   : > { %v3172_v42 = vor.u32 %v3349_v25, %v3169_v45  ;;  %2412 = vmatpush.bf16.msra.mxu1 %v3168_v2  ;;  %v2171_v45 = vld [vmem:[%s4724_s5] sm:$0x3] }
 0x448   : > { %v4632_v40 = vperm.slane %v2171_v45, 1 }
 0x449   : > { %2440 = vmatpush.bf16.msra.mxu2 %v3116_v1  ;;  %2469 = vmatpush.bf16.msra.mxu3 %v3180_v5 }
 0x44b   : > { %2413 = vmatpush.bf16.msra.mxu1 %v3160_v22 }
 0x44d   : > { %2441 = vmatpush.bf16.msra.mxu2 %v3108_v51  ;;  %2470 = vmatpush.bf16.msra.mxu3 %v3172_v42  ;;  %v4629_v42 = vperm.slane %v2171_v45, 0  ;;  %v3551_v45 = vld [vmem:[%s3952_s14 + $0x48] sm:$0xff] }
 0x451   : > { %2442 = vmatpush.bf16.msra.mxu2 %v3100_v46  ;;  %2471 = vmatpush.bf16.msra.mxu3 %v3164_v43 }
 0x48b   : > { %v1797_v29 = vpop.f32.mrf.mxu1 }
 0x48c   : > { %v1817_v36 = vpack.c.bf16 %v1797_v29, %v1797_v29  ;;  %v3542_v29 = vld [vmem:[%s3952_s14] sm:$0xff] }
 0x48e   : > { %1825 = vst [vmem:[#allocation2] sm:$0xf] %v1817_v36 }
 0x490   : > { %v2095_v44 = vpop.f32.mrf.mxu3 }
 0x491   : > { %v2115_v10 = vpack.c.bf16 %v2095_v44, %v2095_v44 }
 0x493   : > { %2123 = vst [vmem:[#allocation2 + $0x4] sm:$0xf] %v2115_v10  ;;  %v1799_v55 = vpop.f32.mrf.mxu1 }
 0x494   : > { %v1818_v47 = vpack.c.bf16 %v1799_v55, %v1799_v55 }
 0x495   : > { %v3063_v32 = vld [vmem:[#allocation2] sm:$0xf] }
 0x496   : > { %1826 = vst [vmem:[#allocation2 + $0x8] sm:$0xf] %v1818_v47 }
 0x498   : > { %v2097_v23 = vpop.f32.mrf.mxu3 }
 0x499   : > { %v2116_v38 = vpack.c.bf16 %v2097_v23, %v2097_v23 }
 0x49a   : > { %v3323_v4 = vld [vmem:[#allocation2 + $0x4] sm:$0xf] }
 0x49b   : > { %2124 = vst [vmem:[#allocation2 + $0xc] sm:$0xf] %v2116_v38  ;;  %v1802_v28 = vpop.f32.mrf.mxu1 }
 0x49c   : > { %v1819_v57 = vpack.c.bf16 %v1802_v28, %v1802_v28  ;;  %v3543_v28 = vld [vmem:[%s3952_s14 + $0x8] sm:$0xff] }
 0x49d   : > { %v3324_v11 = vld [vmem:[#allocation2 + $0x4] sm:$0xf0] }
 0x49e   : > { %1827 = vst [vmem:[#allocation2 + $0x10] sm:$0xf] %v1819_v57  ;;  %v3064_v9 = vor.u32 %v3324_v11, %v3063_v32 }
 0x4a0   : > { %2385 = vmatmul.bf16.vlgmr.msra.gmra.mxu0 %v3064_v9  ;;  %2443 = vmatmul.bf16.vlgmr.msra.gmra.mxu2 %v3064_v9  ;;  %v2100_v27 = vpop.f32.mrf.mxu3  ;;  %v3544_v9 = vld [vmem:[%s3952_s14 + $0x10] sm:$0xff] }
 0x4a1   : > { %v2117_v63 = vpack.c.bf16 %v2100_v27, %v2100_v27 }
 0x4a2   : > { %v3065_v50 = vld [vmem:[#allocation2 + $0x8] sm:$0xf0] }
 0x4a3   : > { %2125 = vst [vmem:[#allocation2 + $0x14] sm:$0xf] %v2117_v63  ;;  %v1804_v62 = vpop.f32.mrf.mxu1  ;;  %v3068_v60 = vor.u32 %v3323_v4, %v3065_v50 }
 0x4a4   : > { %v1820_v8 = vpack.c.bf16 %v1804_v62, %v1804_v62 }
 0x4a5   : > { %2414 = vmatmul.bf16.vlgmr.msra.gmra.mxu1 %v3068_v60  ;;  %2472 = vmatmul.bf16.vlgmr.msra.gmra.mxu3 %v3068_v60  ;;  %v3071_v7 = vld [vmem:[#allocation2 + $0x10] sm:$0xf] }
 0x4a6   : > { %1828 = vst [vmem:[#allocation2 + $0x18] sm:$0xf] %v1820_v8 }
 0x4a8   : > { %v2102_v61 = vpop.f32.mrf.mxu3 }
 0x4a9   : > { %v2118_v52 = vpack.c.bf16 %v2102_v61, %v2102_v61  ;;  %v3545_v61 = vld [vmem:[%s3952_s14 + $0x18] sm:$0xff] }
 0x4aa   : > { %v3325_v1 = vld [vmem:[#allocation2 + $0x14] sm:$0xf] }
 0x4ab   : > { %2126 = vst [vmem:[#allocation2 + $0x1c] sm:$0xf] %v2118_v52  ;;  %v1807_v30 = vpop.f32.mrf.mxu1 }
 0x4ac   : > { %v1821_v37 = vpack.c.bf16 %v1807_v30, %v1807_v30 }
 0x4ad   : > { %v3326_v0 = vld [vmem:[#allocation2 + $0x14] sm:$0xf0] }
 0x4ae   : > { %1829 = vst [vmem:[#allocation2 + $0x20] sm:$0xf] %v1821_v37  ;;  %v3072_v15 = vor.u32 %v3326_v0, %v3071_v7  ;;  %v3546_v7 = vld [vmem:[%s3952_s14 + $0x20] sm:$0xff] }
 0x4b0   : > { %2390 = vmatmul.bf16.gmra.mxu0 %v3072_v15  ;;  %2448 = vmatmul.bf16.gmra.mxu2 %v3072_v15  ;;  %v2105_v13 = vpop.f32.mrf.mxu3 }
 0x4b1   : > { %v2119_v26 = vpack.c.bf16 %v2105_v13, %v2105_v13 }
 0x4b2   : > { %v3073_v21 = vld [vmem:[#allocation2 + $0x18] sm:$0xf0] }
 0x4b3   : > { %2127 = vst [vmem:[#allocation2 + $0x24] sm:$0xf] %v2119_v26  ;;  %v1809_v56 = vpop.f32.mrf.mxu1  ;;  %v3076_v49 = vor.u32 %v3325_v1, %v3073_v21 }
 0x4b4   : > { %v1822_v35 = vpack.c.bf16 %v1809_v56, %v1809_v56 }
 0x4b5   : > { %2419 = vmatmul.bf16.gmra.mxu1 %v3076_v49  ;;  %2477 = vmatmul.bf16.gmra.mxu3 %v3076_v49  ;;  %v3079_v6 = vld [vmem:[#allocation2 + $0x20] sm:$0xf]  ;;  %v3547_v49 = vld [vmem:[%s3952_s14 + $0x28] sm:$0xff] }
 0x4b6   : > { %1830 = vst [vmem:[#allocation2 + $0x28] sm:$0xf] %v1822_v35 }
 0x4b8   : > { %v2107_v59 = vpop.f32.mrf.mxu3 }
 0x4b9   : > { %v2120_v3 = vpack.c.bf16 %v2107_v59, %v2107_v59 }
 0x4ba   : > { %v3327_v48 = vld [vmem:[#allocation2 + $0x24] sm:$0xf] }
 0x4bb   : > { %2128 = vst [vmem:[#allocation2 + $0x2c] sm:$0xf] %v2120_v3 }
 0x4bd   : > { %v3328_v39 = vld [vmem:[#allocation2 + $0x24] sm:$0xf0] }
 0x4be   : > { %v3080_v58 = vor.u32 %v3328_v39, %v3079_v6  ;;  %v3548_v6 = vld [vmem:[%s3952_s14 + $0x30] sm:$0xff] }
 0x4c0   : > { %2395 = vmatmul.bf16.gmra.mxu0 %v3080_v58  ;;  %2453 = vmatmul.bf16.gmra.mxu2 %v3080_v58 }
 0x4c1   : > { %v2110_v51 = vpop.f32.mrf.mxu3 }
 0x4c2   : > { %v2121_v33 = vpack.c.bf16 %v2110_v51, %v2110_v51  ;;  %v3081_v19 = vld [vmem:[#allocation2 + $0x28] sm:$0xf0] }
 0x4c3   : > { %v1812_v14 = vpop.f32.mrf.mxu1  ;;  %v3084_v53 = vor.u32 %v3327_v48, %v3081_v19 }
 0x4c4   : > { %2129 = vst [vmem:[#allocation2 + $0x34] sm:$0xf] %v2121_v33  ;;  %v1823_v5 = vpack.c.bf16 %v1812_v14, %v1812_v14 }
 0x4c5   : > { %2424 = vmatmul.bf16.gmra.mxu1 %v3084_v53  ;;  %2482 = vmatmul.bf16.gmra.mxu3 %v3084_v53  ;;  %v3549_v53 = vld [vmem:[%s3952_s14 + $0x38] sm:$0xff] }
 0x4c6   : > { %1831 = vst [vmem:[#allocation2 + $0x30] sm:$0xf] %v1823_v5 }
 0x4c9   : > { %v2112_v31 = vpop.f32.mrf.mxu3 }
 0x4ca   : > { %v2122_v54 = vpack.c.bf16 %v2112_v31, %v2112_v31 }
 0x4cb   : > { %v1814_v24 = vpop.f32.mrf.mxu1  ;;  %v3329_v17 = vld [vmem:[#allocation2 + $0x34] sm:$0xf] }
 0x4cc   : > { %2130 = vst [vmem:[#allocation2 + $0x3c] sm:$0xf] %v2122_v54  ;;  %v1824_v41 = vpack.c.bf16 %v1814_v24, %v1814_v24  ;;  %v3550_v24 = vld [vmem:[%s3952_s14 + $0x40] sm:$0xff] }
 0x4cd   : > { %v3087_v46 = vld [vmem:[#allocation2 + $0x30] sm:$0xf] }
 0x4ce   : > { %1832 = vst [vmem:[#allocation2 + $0x38] sm:$0xf] %v1824_v41 }
 0x4d3   : > { %v3089_v34 = vld [vmem:[#allocation2 + $0x38] sm:$0xf0] }
 0x4d4   : > { %v3092_v12 = vor.u32 %v3329_v17, %v3089_v34 }
 0x4d5   : > { %v3330_v2 = vld [vmem:[#allocation2 + $0x34] sm:$0xf0] }
 0x4d6   : > { %2429 = vmatmul.bf16.gmra.mxu1 %v3092_v12  ;;  %2487 = vmatmul.bf16.gmra.mxu3 %v3092_v12  ;;  %v3088_v25 = vor.u32 %v3330_v2, %v3087_v46 }
 0x4d8   : > { %2400 = vmatmul.bf16.gmra.mxu0 %v3088_v25  ;;  %2458 = vmatmul.bf16.gmra.mxu2 %v3088_v25 }
 0x51d   : > { %v2386_v20 = vpop.f32.mrf.mxu0 }
 0x51e   : > { %v2387_v18 = vadd.f32 %v2386_v20, %v4629_v42 }
 0x522   : > { %v2415_v16 = vpop.f32.mrf.mxu1 }
 0x523   : > { %v2416_v22 = vadd.f32 %v2415_v16, %v2387_v18  ;;  %v2444_v43 = vpop.f32.mrf.mxu2 }
 0x524   : > { %v2445_v10 = vadd.f32 %v2444_v43, %v4632_v40 }
 0x525   : > { %v2493_v36 = vadd.f32 %v3542_v29, %v2416_v22  ;;  %v2388_v44 = vpop.f32.mrf.mxu0  ;;  %v3552_v22 = vld [vmem:[%s3952_s14 + $0x50] sm:$0xff] }
 0x526   : > { %v2389_v47 = vadd.f32 %v2388_v44, %v4629_v42 }
 0x527   : > { %2509 = vst [vmem:[%s4637_s11] sm:$0xff] %v2493_v36 }
 0x528   : > { %v2473_v55 = vpop.f32.mrf.mxu3 }
 0x529   : > { %v2474_v23 = vadd.f32 %v2473_v55, %v2445_v10  ;;  %v3553_v10 = vld [vmem:[%s3952_s14 + $0x58] sm:$0xff] }
 0x52a   : > { %v2417_v38 = vpop.f32.mrf.mxu1 }
 0x52b   : > { %v2494_v57 = vadd.f32 %v3543_v28, %v2474_v23  ;;  %v2418_v32 = vadd.f32 %v2417_v38, %v2389_v47  ;;  %v2446_v11 = vpop.f32.mrf.mxu2 }
 0x52c   : > { %v2447_v4 = vadd.f32 %v2446_v11, %v4632_v40 }
 0x52d   : > { %2510 = vst [vmem:[%s4637_s11 + $0x8] sm:$0xff] %v2494_v57  ;;  %v2495_v27 = vadd.f32 %v3544_v9, %v2418_v32  ;;  %v2391_v63 = vpop.f32.mrf.mxu0  ;;  %v3554_v57 = vld [vmem:[%s3952_s14 + $0x60] sm:$0xff] }
 0x52e   : > { %v2392_v62 = vadd.f32 %v2391_v63, %v4629_v42 }
 0x52f   : > { %2511 = vst [vmem:[%s4637_s11 + $0x10] sm:$0xff] %v2495_v27 }
 0x530   : > { %v2475_v50 = vpop.f32.mrf.mxu3 }
 0x531   : > { %v2476_v60 = vadd.f32 %v2475_v50, %v2447_v4 }
 0x532   : > { %v2420_v8 = vpop.f32.mrf.mxu1 }
 0x533   : > { %v2496_v52 = vadd.f32 %v3545_v61, %v2476_v60  ;;  %v2421_v30 = vadd.f32 %v2420_v8, %v2392_v62  ;;  %v2449_v37 = vpop.f32.mrf.mxu2  ;;  %v3555_v60 = vld [vmem:[%s3952_s14 + $0x68] sm:$0xff] }
 0x534   : > { %v2450_v13 = vadd.f32 %v2449_v37, %v4632_v40 }
 0x535   : > { %2512 = vst [vmem:[%s4637_s11 + $0x18] sm:$0xff] %v2496_v52  ;;  %v2497_v0 = vadd.f32 %v3546_v7, %v2421_v30  ;;  %v2393_v15 = vpop.f32.mrf.mxu0  ;;  %v3556_v52 = vld [vmem:[%s3952_s14 + $0x70] sm:$0xff] }
 0x536   : > { %v2394_v1 = vadd.f32 %v2393_v15, %v4629_v42  ;;  %v3557_v15 = vld [vmem:[%s3952_s14 + $0x78] sm:$0xff] }
 0x537   : > { %2513 = vst [vmem:[%s4637_s11 + $0x20] sm:$0xff] %v2497_v0 }
 0x538   : > { %v2478_v26 = vpop.f32.mrf.mxu3 }
 0x539   : > { %v2479_v21 = vadd.f32 %v2478_v26, %v2450_v13 }
 0x53a   : > { %v2422_v56 = vpop.f32.mrf.mxu1 }
 0x53b   : > { %v2498_v35 = vadd.f32 %v3547_v49, %v2479_v21  ;;  %v2423_v59 = vadd.f32 %v2422_v56, %v2394_v1  ;;  %v2451_v3 = vpop.f32.mrf.mxu2 }
 0x53c   : > { %v2452_v51 = vadd.f32 %v2451_v3, %v4632_v40 }
 0x53d   : > { %2514 = vst [vmem:[%s4637_s11 + $0x28] sm:$0xff] %v2498_v35  ;;  %v2499_v39 = vadd.f32 %v3548_v6, %v2423_v59  ;;  %v2396_v58 = vpop.f32.mrf.mxu0 }
 0x53e   : > { %v2397_v48 = vadd.f32 %v2396_v58, %v4629_v42 }
 0x53f   : > { %2515 = vst [vmem:[%s4637_s11 + $0x30] sm:$0xff] %v2499_v39 }
 0x540   : > { %v2480_v33 = vpop.f32.mrf.mxu3 }
 0x541   : > { %v2481_v19 = vadd.f32 %v2480_v33, %v2452_v51 }
 0x542   : > { %v2425_v14 = vpop.f32.mrf.mxu1 }
 0x543   : > { %v2500_v5 = vadd.f32 %v3549_v53, %v2481_v19  ;;  %v2426_v31 = vadd.f32 %v2425_v14, %v2397_v48  ;;  %v2454_v54 = vpop.f32.mrf.mxu2 }
 0x544   : > { %v2455_v34 = vadd.f32 %v2454_v54, %v4632_v40 }
 0x545   : > { %2516 = vst [vmem:[%s4637_s11 + $0x38] sm:$0xff] %v2500_v5  ;;  %v2501_v41 = vadd.f32 %v3550_v24, %v2426_v31  ;;  %v2398_v17 = vpop.f32.mrf.mxu0 }
 0x546   : > { %v2399_v46 = vadd.f32 %v2398_v17, %v4629_v42 }
 0x547   : > { %2517 = vst [vmem:[%s4637_s11 + $0x40] sm:$0xff] %v2501_v41 }
 0x548   : > { %v2483_v12 = vpop.f32.mrf.mxu3 }
 0x549   : > { %v2484_v2 = vadd.f32 %v2483_v12, %v2455_v34 }
 0x54a   : > { %v2427_v25 = vpop.f32.mrf.mxu1 }
 0x54b   : > { %v2502_v20 = vadd.f32 %v3551_v45, %v2484_v2  ;;  %v2428_v18 = vadd.f32 %v2427_v25, %v2399_v46  ;;  %v2456_v16 = vpop.f32.mrf.mxu2 }
 0x54c   : > { %v2457_v29 = vadd.f32 %v2456_v16, %v4632_v40 }
 0x54d   : > { %2518 = vst [vmem:[%s4637_s11 + $0x48] sm:$0xff] %v2502_v20  ;;  %v2503_v43 = vadd.f32 %v3552_v22, %v2428_v18 }
 0x54f   : > { %2519 = vst [vmem:[%s4637_s11 + $0x50] sm:$0xff] %v2503_v43 }
 0x550   : > { %v2485_v36 = vpop.f32.mrf.mxu3 }
 0x551   : > { %v2486_v44 = vadd.f32 %v2485_v36, %v2457_v29 }
 0x553   : > { %v2504_v55 = vadd.f32 %v3553_v10, %v2486_v44  ;;  %v2430_v47 = vpop.f32.mrf.mxu1 }
 0x555   : > { %2520 = vst [vmem:[%s4637_s11 + $0x58] sm:$0xff] %v2504_v55  ;;  %v2401_v23 = vpop.f32.mrf.mxu0 }
 0x556   : > { %v2402_v38 = vadd.f32 %v2401_v23, %v4629_v42 }
 0x558   : > { %v2431_v28 = vadd.f32 %v2430_v47, %v2402_v38 }
 0x559   : > { %v2488_v11 = vpop.f32.mrf.mxu3 }
 0x55a   : > { %v2505_v32 = vadd.f32 %v3554_v57, %v2431_v28 }
 0x55b   : > { %v2459_v9 = vpop.f32.mrf.mxu2  ;;  %v2432_v62 = vpop.f32.mrf.mxu1 }
 0x55c   : > { %2521 = vst [vmem:[%s4637_s11 + $0x60] sm:$0xff] %v2505_v32  ;;  %v2460_v27 = vadd.f32 %v2459_v9, %v4632_v40 }
 0x55d   : > { %v2403_v63 = vpop.f32.mrf.mxu0 }
 0x55e   : > { %v2489_v4 = vadd.f32 %v2488_v11, %v2460_v27  ;;  %v2404_v50 = vadd.f32 %v2403_v63, %v4629_v42 }
 0x560   : > { %v2506_v8 = vadd.f32 %v3555_v60, %v2489_v4  ;;  %v2433_v61 = vadd.f32 %v2432_v62, %v2404_v50 }
 0x561   : > { %v2490_v7 = vpop.f32.mrf.mxu3 }
 0x562   : > { %2522 = vst [vmem:[%s4637_s11 + $0x68] sm:$0xff] %v2506_v8  ;;  %v2507_v30 = vadd.f32 %v3556_v52, %v2433_v61 }
 0x563   : > { %v2461_v37 = vpop.f32.mrf.mxu2 }
 0x564   : > { %2523 = vst [vmem:[%s4637_s11 + $0x70] sm:$0xff] %v2507_v30  ;;  %v2462_v42 = vadd.f32 %v2461_v37, %v4632_v40 }
 0x566   : > { %v2491_v0 = vadd.f32 %v2490_v7, %v2462_v42 }
 0x568   : > { %v2508_v13 = vadd.f32 %v3557_v15, %v2491_v0 }
 0x56a   : > { %2524 = vst [vmem:[%s4637_s11 + $0x78] sm:$0xff] %v2508_v13 }
 0x56b   : > { %3735 = shalt.err (!%p3732_p11)
}
 0x56c   : > { %s3795_s29 = smov 256   ;;  %s3796_s14 = smov 16  }
 0x56d   : > { %3382 = dma.vmem_to_hbm [thread:$0]  (%p3919_p5), %s2539_s25, 2048, %s2541_s7, %s2526_s9, %s3795_s29, %s3795_s29, %s3796_s14  }
 0x56e PF: > { %s2555_s11 = sand.u32 1, %s3770_s21   ;;  %p4748_p12 = scmp.ge.s32.totalorder %s3782_s24, 2 }
 0x56f   : > { %s2556_s13 = scalar_lea.sflag [#allocation5], %s2555_s11 }
 0x570   : > { %p3402_p13 = pnand %p4748_p12, %p3867_p6 }
 0x572   : > { %p3403_p0 = pneg %p3402_p13 }
 0x574   : > { %3765 = dma.done.wait (%p3403_p0), %s2556_s13, 2048  }
 0x575   : > { %3767 = vsyncadd (%p3403_p0), %s2556_s13, 4294965248  ;;  %p21_p3 = scmp.ge.s32.totalorder %s3906_s16, 4   ;;  %s4749_s21 = smov %s3774_s22 }
 0x576   : > { %s4750_s22 = smov %s3778_s23  ;;  %s4751_s23 = smov %s3915_s19 }
 0x577   : > { %s4752_s24 = smov %s3906_s16  ;;  %23 = sbr.rel (!%p21_p3) target bundleno = 7 (0x7), region = 105 }
 0x57c   :  { %2562 = vsyncpa [#allocation4], 1 }
 0x57d   :  { %2564 = vsyncpa [#allocation4 + $0x1], 1 }
 0x57e   :  { %2565 = vsyncpa [#allocation7], 1 }
 0x57f   :  { %2566 = vsyncpa [#allocation10], 1 }
 0x580   :  { %2567 = vsyncpa [#allocation5], 1 }
 0x581   :  { %2569 = vsyncpa [#allocation5 + $0x1], 1 }

</bundles_post_ra>
